<compile_context>
chip_gen: v5e
topology: v5e:2x2
jax: 0.10.0
libtpu: 0.0.40
codegen_flags: <defaults>
</compile_context>

<pallas_src>
import functools

import jax
import jax.numpy as jnp
from jax.experimental import pallas as pl
from jax.experimental.pallas import tpu as pltpu


# ----------------------------- config (small) ------------------------------
B = 2            # batch
L = 8            # number of latent 1D tokens
M = 16           # number of masked 2D tokens (token 0 behaves like a cls token)
W = 32           # width
F = 16           # factorized_latent_dim
O = 12           # output_dim
NUM_LAYERS = 2
NUM_HEADS = 4
MLP_RATIO = 4.0
HID = int(W * MLP_RATIO)     # 128
FFN_HID = 2 * W              # 64
MAX_LATENT_TOKENS = 256
S = M + L                    # 24
O_PAD = 128                  # output dim padded to a full lane tile
EPS = 1e-5

# packed-slab row layout --------------------------------------------------
# wslab[i]:  rows 0:32   qkv_w (W,3W)  lanes 0:96
#            rows 32:64  proj_w (W,W)  lanes 0:32
#            rows 64:96  fc1_w (W,HID) lanes 0:128
#            rows 96:224 fc2_w (HID,W) lanes 0:32
W_ROWS = 3 * W + HID         # 224
# bslab rows: 0 emb_b, 1 lnpre_w, 2 lnpre_b, 3 lnpost_w, 4 lnpost_b,
#             5 ffn1_b, 6 ffn2_b(pad), 7 unused,
#             8 + 8*i + {0 ln1_w, 1 ln1_b, 2 qkv_b, 3 proj_b,
#                        4 ln2_w, 5 ln2_b, 6 fc1_b, 7 fc2_b}
B_ROWS = 8 + 8 * NUM_LAYERS  # 24
# tslab: rows 0:16 emb_w, 16:24 pos[:L], 24:56 ffn1_w, 56:120 ffn2_w(pad 128)
T_ROWS = F + L + W + FFN_HID  # 120


# ------------------------------ kernel math ---------------------------------
def _layernorm(x, w, b):
    mu = jnp.mean(x, axis=-1, keepdims=True)
    var = jnp.mean((x - mu) ** 2, axis=-1, keepdims=True)
    return (x - mu) * jax.lax.rsqrt(var + EPS) * w + b


def _gelu(x):
    c = jnp.sqrt(2.0 / jnp.pi).astype(x.dtype)
    return 0.5 * x * (1.0 + jnp.tanh(c * (x + 0.044715 * (x * x * x))))


def _dot(a, b):
    return jnp.dot(a, b, preferred_element_type=jnp.float32)


def decoder_kernel(latent_ref, masked_ref, wslab_ref, bslab_ref, tslab_ref,
                   out_ref, *, num_layers, num_heads):
    b, m, w = masked_ref.shape
    l = latent_ref.shape[1]
    f = latent_ref.shape[2]
    s = m + l
    dh = w // num_heads
    hid = wslab_ref.shape[1] - 3 * w       # 128
    ffn_hid = 2 * w                        # 64
    scale = dh ** -0.5

    def brow(r, width=w):
        # one packed bias / LN row, shape (1, width)
        return bslab_ref[r:r + 1, 0:width]

    # decoder_embed(latent) + positional embedding, both batches at once.
    emb_w = tslab_ref[0:f, 0:w]                                    # (F, W)
    pos = tslab_ref[f:f + l, 0:w]                                  # (L, W)
    lat2 = latent_ref[...].reshape(b * l, f)                       # (B*L, F)
    emb3 = (_dot(lat2, emb_w) + brow(0)).reshape(b, l, w) + pos    # (B, L, W)

    # concat([masked, latent], dim=1) in registers; fold batch onto sublanes.
    x3 = jnp.concatenate([masked_ref[...], emb3], axis=1)          # (B, S, W)
    x = x3.reshape(b * s, w)                                       # (B*S, W)

    # ln_pre
    x = _layernorm(x, brow(1), brow(2))

    # transformer (pre-norm residual attention blocks)
    for i in range(num_layers):
        base = 8 + 8 * i
        xn = _layernorm(x, brow(base + 0), brow(base + 1))
        # qkv weight is zero-padded to 128 lanes -> one dense matmul + bias.
        qkv = _dot(xn, wslab_ref[i, 0:w, :]) + bslab_ref[base + 2:base + 3, :]
        qkv3 = qkv.reshape(b, s, qkv.shape[-1])                    # (B, S, 128)
        proj_w = wslab_ref[i, w:2 * w, 0:w]                        # (W, W)

        # accumulate attention output-projection per head (no concat, small
        # live set): x += sum_h (softmax(qh kh^T) vh) @ proj_w[h*dh:(h+1)*dh]
        x = x + brow(base + 3)                                     # + proj bias
        for h in range(num_heads):
            lo = h * dh
            qh = qkv3[:, :, lo:lo + dh] * scale                    # (B, S, dh)
            kh = qkv3[:, :, w + lo:w + lo + dh]
            vh = qkv3[:, :, 2 * w + lo:2 * w + lo + dh]
            sc = jnp.einsum('bqd,bkd->bqk', qh, kh,
                            preferred_element_type=jnp.float32)    # (B, S, S)
            sc = sc - jnp.max(sc, axis=-1, keepdims=True)
            p = jnp.exp(sc)
            p = p / jnp.sum(p, axis=-1, keepdims=True)
            oh = jnp.einsum('bqk,bkd->bqd', p, vh,
                            preferred_element_type=jnp.float32)    # (B, S, dh)
            x = x + _dot(oh.reshape(b * s, dh), proj_w[lo:lo + dh, :])

        # MLP
        xn2 = _layernorm(x, brow(base + 4), brow(base + 5))
        h1 = _gelu(_dot(xn2, wslab_ref[i, 2 * w:3 * w, :])
                   + bslab_ref[base + 6:base + 7, :])              # (B*S, HID)
        x = x + _dot(h1, wslab_ref[i, 3 * w:3 * w + hid, 0:w]) + brow(base + 7)

    # ln_post + ffn on all rows; output dim padded to 128 lanes so the store
    # is fully dense (rows/lanes outside [1:M, :O] are sliced in the wrapper).
    y = _layernorm(x, brow(3), brow(4))
    h1 = jnp.tanh(_dot(y, tslab_ref[f + l:f + l + w, 0:ffn_hid])
                  + bslab_ref[5:6, 0:ffn_hid])                     # (B*S, 64)
    out_ref[...] = (_dot(h1, tslab_ref[f + l + w:f + l + w + ffn_hid, :])
                    + bslab_ref[6:7, :])                           # (B*S, 128)


# ------------------------------- wrapper -------------------------------------
def pack_params(p):
    """One-time packing of all module parameters into 3 lane-dense slabs."""
    wslab = jnp.zeros((NUM_LAYERS, W_ROWS, 128), jnp.float32)
    wslab = wslab.at[:, 0:W, 0:3 * W].set(p["qkv_w"])
    wslab = wslab.at[:, W:2 * W, 0:W].set(p["proj_w"])
    wslab = wslab.at[:, 2 * W:3 * W, 0:HID].set(p["fc1_w"])
    wslab = wslab.at[:, 3 * W:3 * W + HID, 0:W].set(p["fc2_w"])

    bslab = jnp.zeros((B_ROWS, 128), jnp.float32)
    bslab = bslab.at[0, 0:W].set(p["emb_b"][0])
    bslab = bslab.at[1, 0:W].set(p["lnpre_w"][0])
    bslab = bslab.at[2, 0:W].set(p["lnpre_b"][0])
    bslab = bslab.at[3, 0:W].set(p["lnpost_w"][0])
    bslab = bslab.at[4, 0:W].set(p["lnpost_b"][0])
    bslab = bslab.at[5, 0:FFN_HID].set(p["ffn1_b"][0])
    bslab = bslab.at[6, 0:O].set(p["ffn2_b"][0])
    for i in range(NUM_LAYERS):
        base = 8 + 8 * i
        bslab = bslab.at[base + 0, 0:W].set(p["ln1_w"][i, 0])
        bslab = bslab.at[base + 1, 0:W].set(p["ln1_b"][i, 0])
        bslab = bslab.at[base + 2, 0:3 * W].set(p["qkv_b"][i, 0])
        bslab = bslab.at[base + 3, 0:W].set(p["proj_b"][i, 0])
        bslab = bslab.at[base + 4, 0:W].set(p["ln2_w"][i, 0])
        bslab = bslab.at[base + 5, 0:W].set(p["ln2_b"][i, 0])
        bslab = bslab.at[base + 6, 0:HID].set(p["fc1_b"][i, 0])
        bslab = bslab.at[base + 7, 0:W].set(p["fc2_b"][i, 0])

    tslab = jnp.zeros((T_ROWS, 128), jnp.float32)
    tslab = tslab.at[0:F, 0:W].set(p["emb_w"])
    tslab = tslab.at[F:F + L, 0:W].set(p["pos"][:L])
    tslab = tslab.at[F + L:F + L + W, 0:FFN_HID].set(p["ffn1_w"])
    tslab = tslab.at[F + L + W:F + L + W + FFN_HID, 0:O].set(p["ffn2_w"])
    return wslab, bslab, tslab


def _full_spec(shape):
    n = len(shape)
    return pl.BlockSpec(shape, lambda i, _n=n: (0,) * _n)


@jax.jit
def decoder_pallas(latent, masked, wslab, bslab, tslab):
    in_arrays = [latent, masked, wslab, bslab, tslab]
    in_specs = [_full_spec(a.shape) for a in in_arrays]

    kernel = functools.partial(
        decoder_kernel, num_layers=NUM_LAYERS, num_heads=NUM_HEADS)

    out2 = pl.pallas_call(
        kernel,
        out_shape=jax.ShapeDtypeStruct((B * S, O_PAD), jnp.float32),
        grid_spec=pltpu.PrefetchScalarGridSpec(
            num_scalar_prefetch=0,
            grid=(1,),                         # whole batch in one grid step
            in_specs=in_specs,
            out_specs=pl.BlockSpec((B * S, O_PAD), lambda i: (0, 0)),
            scratch_shapes=[],                 # everything lives in registers
        ),
        compiler_params=pltpu.CompilerParams(
            dimension_semantics=("arbitrary",)),
    )(*in_arrays)

    # Undo batch flattening, drop the cls-like token-0 row and the lane padding.
    return out2.reshape(B, S, O_PAD)[:, 1:M, :O]


# --------------------------- pure-JAX reference ------------------------------
def decoder_ref(latent, masked, p):
    emb = jnp.einsum("blf,fw->blw", latent, p["emb_w"]) + p["emb_b"]
    emb = emb + p["pos"][:L][None]
    x = jnp.concatenate([masked, emb], axis=1)             # (B, S, W)
    x = _layernorm(x, p["lnpre_w"], p["lnpre_b"])
    dh = W // NUM_HEADS
    scale = dh ** -0.5
    for i in range(NUM_LAYERS):
        xn = _layernorm(x, p["ln1_w"][i], p["ln1_b"][i])
        qkv = jnp.einsum("bsw,wk->bsk", xn, p["qkv_w"][i]) + p["qkv_b"][i]
        q, k, v = qkv[..., :W], qkv[..., W:2 * W], qkv[..., 2 * W:]
        outs = []
        for h in range(NUM_HEADS):
            lo, hi = h * dh, (h + 1) * dh
            s = jnp.einsum("bqd,bkd->bqk", q[..., lo:hi] * scale, k[..., lo:hi])
            pr = jax.nn.softmax(s, axis=-1)
            outs.append(jnp.einsum("bqk,bkd->bqd", pr, v[..., lo:hi]))
        attn = jnp.concatenate(outs, axis=-1)
        x = x + jnp.einsum("bsw,wk->bsk", attn, p["proj_w"][i]) + p["proj_b"][i]
        xn2 = _layernorm(x, p["ln2_w"][i], p["ln2_b"][i])
        h1 = _gelu(jnp.einsum("bsw,wk->bsk", xn2, p["fc1_w"][i]) + p["fc1_b"][i])
        x = x + jnp.einsum("bsh,hw->bsw", h1, p["fc2_w"][i]) + p["fc2_b"][i]
    rec = x[:, 1:M]
    rec = _layernorm(rec, p["lnpost_w"], p["lnpost_b"])
    h1 = jnp.tanh(jnp.einsum("bsw,wk->bsk", rec, p["ffn1_w"]) + p["ffn1_b"])
    return jnp.einsum("bsh,ho->bso", h1, p["ffn2_w"]) + p["ffn2_b"]


# ------------------------------ param init -----------------------------------
def init_params(key):
    ks = iter(jax.random.split(key, 64))
    n = lambda shape, std: std * jax.random.normal(next(ks), shape, jnp.float32)
    scale = W ** (-0.5)
    params = {
        "emb_w": n((F, W), 0.02), "emb_b": jnp.zeros((1, W), jnp.float32),
        "pos": n((MAX_LATENT_TOKENS, W), scale),
        "lnpre_w": jnp.ones((1, W), jnp.float32),
        "lnpre_b": jnp.zeros((1, W), jnp.float32),
        "ln1_w": jnp.ones((NUM_LAYERS, 1, W), jnp.float32),
        "ln1_b": jnp.zeros((NUM_LAYERS, 1, W), jnp.float32),
        "qkv_w": n((NUM_LAYERS, W, 3 * W), 0.02),
        "qkv_b": jnp.zeros((NUM_LAYERS, 1, 3 * W), jnp.float32),
        "proj_w": n((NUM_LAYERS, W, W), 0.02),
        "proj_b": jnp.zeros((NUM_LAYERS, 1, W), jnp.float32),
        "ln2_w": jnp.ones((NUM_LAYERS, 1, W), jnp.float32),
        "ln2_b": jnp.zeros((NUM_LAYERS, 1, W), jnp.float32),
        "fc1_w": n((NUM_LAYERS, W, HID), 0.02),
        "fc1_b": jnp.zeros((NUM_LAYERS, 1, HID), jnp.float32),
        "fc2_w": n((NUM_LAYERS, HID, W), 0.02),
        "fc2_b": jnp.zeros((NUM_LAYERS, 1, W), jnp.float32),
        "lnpost_w": jnp.ones((1, W), jnp.float32),
        "lnpost_b": jnp.zeros((1, W), jnp.float32),
        "ffn1_w": n((W, FFN_HID), 0.02),
        "ffn1_b": jnp.zeros((1, FFN_HID), jnp.float32),
        "ffn2_w": n((FFN_HID, O), 0.02),
        "ffn2_b": jnp.zeros((1, O), jnp.float32),
    }
    return params


# --------------------------------- main ---------------------------------------
if __name__ == "__main__":
    key = jax.random.PRNGKey(0)
    k_lat, k_msk, k_par = jax.random.split(key, 3)
    latent = jax.random.normal(k_lat, (B, L, F), jnp.float32)
    masked = jax.random.normal(k_msk, (B, M, W), jnp.float32)
    params = init_params(k_par)

    # One-time packing of parameters into DMA-consolidated slabs (hoisted out
    # of the per-call path).
    wslab, bslab, tslab = pack_params(params)
    wslab, bslab, tslab = jax.block_until_ready((wslab, bslab, tslab))

    out = decoder_pallas(latent, masked, wslab, bslab, tslab)
    out = jax.block_until_ready(out)

    ref = jax.block_until_ready(decoder_ref(latent, masked, params))
    assert out.shape == (B, M - 1, O), out.shape
    # Tolerance allows for MXU default f32 matmul precision differing slightly
    # between the Mosaic kernel and the XLA reference.
    assert jnp.allclose(out, ref, atol=2e-3, rtol=2e-3), (
        float(jnp.max(jnp.abs(out - ref))))

    print("KERNEL_OK")
</pallas_src>

<mosaic_0001>
module attributes {stable_mosaic.version = 11 : i64} {
  func.func @decoder_kernel(%arg0: i32, %arg1: memref<2x8x16xf32, #tpu.memory_space<vmem>>, %arg2: memref<2x16x32xf32, #tpu.memory_space<vmem>>, %arg3: memref<2x224x128xf32, #tpu.memory_space<vmem>>, %arg4: memref<24x128xf32, #tpu.memory_space<vmem>>, %arg5: memref<120x128xf32, #tpu.memory_space<vmem>>, %arg6: memref<48x128xf32, #tpu.memory_space<vmem>>) attributes {dimension_semantics = [#tpu.dimension_semantics<arbitrary>], iteration_bounds = array<i64: 1>, scalar_prefetch = 0 : i64, scratch_operands = 0 : i64, tpu.core_type = #tpu.core_type<tc>, window_params = [{pipeline_mode = #tpu.pipeline_mode<synchronous>, transform_indices = @transform_0, window_bounds = array<i64: 2, 8, 16>}, {pipeline_mode = #tpu.pipeline_mode<synchronous>, transform_indices = @transform_1, window_bounds = array<i64: 2, 16, 32>}, {pipeline_mode = #tpu.pipeline_mode<synchronous>, transform_indices = @transform_2, window_bounds = array<i64: 2, 224, 128>}, {pipeline_mode = #tpu.pipeline_mode<synchronous>, transform_indices = @transform_3, window_bounds = array<i64: 24, 128>}, {pipeline_mode = #tpu.pipeline_mode<synchronous>, transform_indices = @transform_4, window_bounds = array<i64: 120, 128>}, {pipeline_mode = #tpu.pipeline_mode<synchronous>, transform_indices = @transform_5, window_bounds = array<i64: 48, 128>}]} {
    %c0 = arith.constant 0 : index
    %c0_0 = arith.constant 0 : index
    %0 = vector.load %arg5[%c0, %c0_0] : memref<120x128xf32, #tpu.memory_space<vmem>>, vector<16x32xf32>
    %c16 = arith.constant 16 : index
    %c0_1 = arith.constant 0 : index
    %1 = vector.load %arg5[%c16, %c0_1] : memref<120x128xf32, #tpu.memory_space<vmem>>, vector<8x32xf32>
    %c0_2 = arith.constant 0 : index
    %c0_3 = arith.constant 0 : index
    %c0_4 = arith.constant 0 : index
    %2 = vector.load %arg1[%c0_2, %c0_3, %c0_4] : memref<2x8x16xf32, #tpu.memory_space<vmem>>, vector<2x8x16xf32>
    %3 = vector.shape_cast %2 : vector<2x8x16xf32> to vector<16x16xf32>
    %cst = arith.constant dense<0.000000e+00> : vector<16x32xf32>
    %4 = tpu.matmul %3, %0, %cst {dimension_numbers = #tpu.dot_dimension_numbers<[1], [0], [0], [1], [0, 0, 1, 1], [], []>} : vector<16x16xf32>, vector<16x32xf32>, vector<16x32xf32> -> vector<16x32xf32>
    %c0_5 = arith.constant 0 : index
    %c0_6 = arith.constant 0 : index
    %5 = vector.load %arg4[%c0_5, %c0_6] : memref<24x128xf32, #tpu.memory_space<vmem>>, vector<1x32xf32>
    %6 = vector.broadcast %5 : vector<1x32xf32> to vector<16x32xf32>
    %7 = arith.addf %4, %6 : vector<16x32xf32>
    %8 = vector.shape_cast %7 : vector<16x32xf32> to vector<2x8x32xf32>
    %9 = vector.shape_cast %1 : vector<8x32xf32> to vector<1x8x32xf32>
    %10 = vector.broadcast %9 : vector<1x8x32xf32> to vector<2x8x32xf32>
    %11 = arith.addf %8, %10 : vector<2x8x32xf32>
    %c0_7 = arith.constant 0 : index
    %c0_8 = arith.constant 0 : index
    %c0_9 = arith.constant 0 : index
    %12 = vector.load %arg2[%c0_7, %c0_8, %c0_9] : memref<2x16x32xf32, #tpu.memory_space<vmem>>, vector<2x16x32xf32>
    %13 = tpu.concatenate %12, %11 in 1 : vector<2x16x32xf32>, vector<2x8x32xf32> -> vector<2x24x32xf32>
    %14 = vector.shape_cast %13 : vector<2x24x32xf32> to vector<48x32xf32>
    %c1 = arith.constant 1 : index
    %c0_10 = arith.constant 0 : index
    %15 = vector.load %arg4[%c1, %c0_10] : memref<24x128xf32, #tpu.memory_space<vmem>>, vector<1x32xf32>
    %c2 = arith.constant 2 : index
    %c0_11 = arith.constant 0 : index
    %16 = vector.load %arg4[%c2, %c0_11] : memref<24x128xf32, #tpu.memory_space<vmem>>, vector<1x32xf32>
    %cst_12 = arith.constant dense<0.000000e+00> : vector<48xf32>
    %17 = vector.multi_reduction <add>, %14, %cst_12 [1] : vector<48x32xf32> to vector<48xf32>
    %18 = vector.shape_cast %17 : vector<48xf32> to vector<48x1xf32>
    %cst_13 = arith.constant 3.200000e+01 : f32
    %19 = vector.broadcast %cst_13 : f32 to vector<48x1xf32>
    %20 = arith.divf %18, %19 : vector<48x1xf32>
    %21 = vector.broadcast %20 : vector<48x1xf32> to vector<48x32xf32>
    %22 = arith.subf %14, %21 : vector<48x32xf32>
    %23 = arith.mulf %22, %22 : vector<48x32xf32>
    %cst_14 = arith.constant dense<0.000000e+00> : vector<48xf32>
    %24 = vector.multi_reduction <add>, %23, %cst_14 [1] : vector<48x32xf32> to vector<48xf32>
    %25 = vector.shape_cast %24 : vector<48xf32> to vector<48x1xf32>
    %cst_15 = arith.constant 3.200000e+01 : f32
    %26 = vector.broadcast %cst_15 : f32 to vector<48x1xf32>
    %27 = arith.divf %25, %26 : vector<48x1xf32>
    %28 = vector.broadcast %20 : vector<48x1xf32> to vector<48x32xf32>
    %29 = arith.subf %14, %28 : vector<48x32xf32>
    %cst_16 = arith.constant 9.99999974E-6 : f32
    %30 = vector.broadcast %cst_16 : f32 to vector<48x1xf32>
    %31 = arith.addf %27, %30 : vector<48x1xf32>
    %32 = math.rsqrt %31 : vector<48x1xf32>
    %33 = vector.broadcast %32 : vector<48x1xf32> to vector<48x32xf32>
    %34 = arith.mulf %29, %33 : vector<48x32xf32>
    %35 = vector.broadcast %15 : vector<1x32xf32> to vector<48x32xf32>
    %36 = arith.mulf %34, %35 : vector<48x32xf32>
    %37 = vector.broadcast %16 : vector<1x32xf32> to vector<48x32xf32>
    %38 = arith.addf %36, %37 : vector<48x32xf32>
    %c8 = arith.constant 8 : index
    %c0_17 = arith.constant 0 : index
    %39 = vector.load %arg4[%c8, %c0_17] : memref<24x128xf32, #tpu.memory_space<vmem>>, vector<1x32xf32>
    %c9 = arith.constant 9 : index
    %c0_18 = arith.constant 0 : index
    %40 = vector.load %arg4[%c9, %c0_18] : memref<24x128xf32, #tpu.memory_space<vmem>>, vector<1x32xf32>
    %cst_19 = arith.constant dense<0.000000e+00> : vector<48xf32>
    %41 = vector.multi_reduction <add>, %38, %cst_19 [1] : vector<48x32xf32> to vector<48xf32>
    %42 = vector.shape_cast %41 : vector<48xf32> to vector<48x1xf32>
    %cst_20 = arith.constant 3.200000e+01 : f32
    %43 = vector.broadcast %cst_20 : f32 to vector<48x1xf32>
    %44 = arith.divf %42, %43 : vector<48x1xf32>
    %45 = vector.broadcast %44 : vector<48x1xf32> to vector<48x32xf32>
    %46 = arith.subf %38, %45 : vector<48x32xf32>
    %47 = arith.mulf %46, %46 : vector<48x32xf32>
    %cst_21 = arith.constant dense<0.000000e+00> : vector<48xf32>
    %48 = vector.multi_reduction <add>, %47, %cst_21 [1] : vector<48x32xf32> to vector<48xf32>
    %49 = vector.shape_cast %48 : vector<48xf32> to vector<48x1xf32>
    %cst_22 = arith.constant 3.200000e+01 : f32
    %50 = vector.broadcast %cst_22 : f32 to vector<48x1xf32>
    %51 = arith.divf %49, %50 : vector<48x1xf32>
    %52 = vector.broadcast %44 : vector<48x1xf32> to vector<48x32xf32>
    %53 = arith.subf %38, %52 : vector<48x32xf32>
    %cst_23 = arith.constant 9.99999974E-6 : f32
    %54 = vector.broadcast %cst_23 : f32 to vector<48x1xf32>
    %55 = arith.addf %51, %54 : vector<48x1xf32>
    %56 = math.rsqrt %55 : vector<48x1xf32>
    %57 = vector.broadcast %56 : vector<48x1xf32> to vector<48x32xf32>
    %58 = arith.mulf %53, %57 : vector<48x32xf32>
    %59 = vector.broadcast %39 : vector<1x32xf32> to vector<48x32xf32>
    %60 = arith.mulf %58, %59 : vector<48x32xf32>
    %61 = vector.broadcast %40 : vector<1x32xf32> to vector<48x32xf32>
    %62 = arith.addf %60, %61 : vector<48x32xf32>
    %c0_24 = arith.constant 0 : index
    %c0_25 = arith.constant 0 : index
    %c0_26 = arith.constant 0 : index
    %63 = vector.load %arg3[%c0_24, %c0_25, %c0_26] : memref<2x224x128xf32, #tpu.memory_space<vmem>>, vector<1x32x128xf32>
    %64 = vector.shape_cast %63 : vector<1x32x128xf32> to vector<32x128xf32>
    %cst_27 = arith.constant dense<0.000000e+00> : vector<48x128xf32>
    %65 = tpu.matmul %62, %64, %cst_27 {dimension_numbers = #tpu.dot_dimension_numbers<[1], [0], [0], [1], [0, 0, 1, 1], [], []>} : vector<48x32xf32>, vector<32x128xf32>, vector<48x128xf32> -> vector<48x128xf32>
    %c10 = arith.constant 10 : index
    %c0_28 = arith.constant 0 : index
    %66 = vector.load %arg4[%c10, %c0_28] : memref<24x128xf32, #tpu.memory_space<vmem>>, vector<1x128xf32>
    %67 = vector.broadcast %66 : vector<1x128xf32> to vector<48x128xf32>
    %68 = arith.addf %65, %67 : vector<48x128xf32>
    %69 = vector.shape_cast %68 : vector<48x128xf32> to vector<2x24x128xf32>
    %c0_29 = arith.constant 0 : index
    %c32 = arith.constant 32 : index
    %c0_30 = arith.constant 0 : index
    %70 = vector.load %arg3[%c0_29, %c32, %c0_30] : memref<2x224x128xf32, #tpu.memory_space<vmem>>, vector<1x32x32xf32>
    %71 = vector.shape_cast %70 : vector<1x32x32xf32> to vector<32x32xf32>
    %c11 = arith.constant 11 : index
    %c0_31 = arith.constant 0 : index
    %72 = vector.load %arg4[%c11, %c0_31] : memref<24x128xf32, #tpu.memory_space<vmem>>, vector<1x32xf32>
    %73 = vector.broadcast %72 : vector<1x32xf32> to vector<48x32xf32>
    %74 = arith.addf %38, %73 : vector<48x32xf32>
    %75 = vector.extract_strided_slice %69 {offsets = [0, 0, 0], sizes = [2, 24, 8], strides = [1, 1, 1]} : vector<2x24x128xf32> to vector<2x24x8xf32>
    %cst_32 = arith.constant 0.353553385 : f32
    %76 = vector.broadcast %cst_32 : f32 to vector<2x24x8xf32>
    %77 = arith.mulf %75, %76 : vector<2x24x8xf32>
    %78 = vector.extract_strided_slice %69 {offsets = [0, 0, 32], sizes = [2, 24, 8], strides = [1, 1, 1]} : vector<2x24x128xf32> to vector<2x24x8xf32>
    %79 = vector.extract_strided_slice %69 {offsets = [0, 0, 64], sizes = [2, 24, 8], strides = [1, 1, 1]} : vector<2x24x128xf32> to vector<2x24x8xf32>
    "tpu.trace_start"() <{level = 10 : i32, message = "bqd,bkd->bqk"}> : () -> ()
    %cst_33 = arith.constant dense<0.000000e+00> : vector<2x24x24xf32>
    %80 = tpu.matmul %77, %78, %cst_33 {dimension_numbers = #tpu.dot_dimension_numbers<[2], [2], [1], [1], [0, 0, 0, 1, 1, 1], [0], [0]>} : vector<2x24x8xf32>, vector<2x24x8xf32>, vector<2x24x24xf32> -> vector<2x24x24xf32>
    "tpu.trace_stop"() : () -> ()
    %cst_34 = arith.constant dense<0xFF800000> : vector<2x24xf32>
    %81 = vector.multi_reduction <maximumf>, %80, %cst_34 [2] : vector<2x24x24xf32> to vector<2x24xf32>
    %82 = vector.shape_cast %81 : vector<2x24xf32> to vector<2x24x1xf32>
    %83 = vector.broadcast %82 : vector<2x24x1xf32> to vector<2x24x24xf32>
    %84 = arith.subf %80, %83 : vector<2x24x24xf32>
    %85 = math.exp %84 : vector<2x24x24xf32>
    %cst_35 = arith.constant dense<0.000000e+00> : vector<2x24xf32>
    %86 = vector.multi_reduction <add>, %85, %cst_35 [2] : vector<2x24x24xf32> to vector<2x24xf32>
    %87 = vector.shape_cast %86 : vector<2x24xf32> to vector<2x24x1xf32>
    %88 = vector.broadcast %87 : vector<2x24x1xf32> to vector<2x24x24xf32>
    %89 = arith.divf %85, %88 : vector<2x24x24xf32>
    "tpu.trace_start"() <{level = 10 : i32, message = "bqk,bkd->bqd"}> : () -> ()
    %cst_36 = arith.constant dense<0.000000e+00> : vector<2x24x8xf32>
    %90 = tpu.matmul %89, %79, %cst_36 {dimension_numbers = #tpu.dot_dimension_numbers<[2], [1], [1], [2], [0, 0, 0, 1, 1, 2], [0], [0]>} : vector<2x24x24xf32>, vector<2x24x8xf32>, vector<2x24x8xf32> -> vector<2x24x8xf32>
    "tpu.trace_stop"() : () -> ()
    %91 = vector.shape_cast %90 : vector<2x24x8xf32> to vector<48x8xf32>
    %92 = vector.extract_strided_slice %71 {offsets = [0, 0], sizes = [8, 32], strides = [1, 1]} : vector<32x32xf32> to vector<8x32xf32>
    %cst_37 = arith.constant dense<0.000000e+00> : vector<48x32xf32>
    %93 = tpu.matmul %91, %92, %cst_37 {dimension_numbers = #tpu.dot_dimension_numbers<[1], [0], [0], [1], [0, 0, 1, 1], [], []>} : vector<48x8xf32>, vector<8x32xf32>, vector<48x32xf32> -> vector<48x32xf32>
    %94 = arith.addf %74, %93 : vector<48x32xf32>
    %95 = vector.extract_strided_slice %69 {offsets = [0, 0, 8], sizes = [2, 24, 8], strides = [1, 1, 1]} : vector<2x24x128xf32> to vector<2x24x8xf32>
    %cst_38 = arith.constant 0.353553385 : f32
    %96 = vector.broadcast %cst_38 : f32 to vector<2x24x8xf32>
    %97 = arith.mulf %95, %96 : vector<2x24x8xf32>
    %98 = vector.extract_strided_slice %69 {offsets = [0, 0, 40], sizes = [2, 24, 8], strides = [1, 1, 1]} : vector<2x24x128xf32> to vector<2x24x8xf32>
    %99 = vector.extract_strided_slice %69 {offsets = [0, 0, 72], sizes = [2, 24, 8], strides = [1, 1, 1]} : vector<2x24x128xf32> to vector<2x24x8xf32>
    "tpu.trace_start"() <{level = 10 : i32, message = "bqd,bkd->bqk"}> : () -> ()
    %cst_39 = arith.constant dense<0.000000e+00> : vector<2x24x24xf32>
    %100 = tpu.matmul %97, %98, %cst_39 {dimension_numbers = #tpu.dot_dimension_numbers<[2], [2], [1], [1], [0, 0, 0, 1, 1, 1], [0], [0]>} : vector<2x24x8xf32>, vector<2x24x8xf32>, vector<2x24x24xf32> -> vector<2x24x24xf32>
    "tpu.trace_stop"() : () -> ()
    %cst_40 = arith.constant dense<0xFF800000> : vector<2x24xf32>
    %101 = vector.multi_reduction <maximumf>, %100, %cst_40 [2] : vector<2x24x24xf32> to vector<2x24xf32>
    %102 = vector.shape_cast %101 : vector<2x24xf32> to vector<2x24x1xf32>
    %103 = vector.broadcast %102 : vector<2x24x1xf32> to vector<2x24x24xf32>
    %104 = arith.subf %100, %103 : vector<2x24x24xf32>
    %105 = math.exp %104 : vector<2x24x24xf32>
    %cst_41 = arith.constant dense<0.000000e+00> : vector<2x24xf32>
    %106 = vector.multi_reduction <add>, %105, %cst_41 [2] : vector<2x24x24xf32> to vector<2x24xf32>
    %107 = vector.shape_cast %106 : vector<2x24xf32> to vector<2x24x1xf32>
    %108 = vector.broadcast %107 : vector<2x24x1xf32> to vector<2x24x24xf32>
    %109 = arith.divf %105, %108 : vector<2x24x24xf32>
    "tpu.trace_start"() <{level = 10 : i32, message = "bqk,bkd->bqd"}> : () -> ()
    %cst_42 = arith.constant dense<0.000000e+00> : vector<2x24x8xf32>
    %110 = tpu.matmul %109, %99, %cst_42 {dimension_numbers = #tpu.dot_dimension_numbers<[2], [1], [1], [2], [0, 0, 0, 1, 1, 2], [0], [0]>} : vector<2x24x24xf32>, vector<2x24x8xf32>, vector<2x24x8xf32> -> vector<2x24x8xf32>
    "tpu.trace_stop"() : () -> ()
    %111 = vector.shape_cast %110 : vector<2x24x8xf32> to vector<48x8xf32>
    %112 = vector.extract_strided_slice %71 {offsets = [8, 0], sizes = [8, 32], strides = [1, 1]} : vector<32x32xf32> to vector<8x32xf32>
    %cst_43 = arith.constant dense<0.000000e+00> : vector<48x32xf32>
    %113 = tpu.matmul %111, %112, %cst_43 {dimension_numbers = #tpu.dot_dimension_numbers<[1], [0], [0], [1], [0, 0, 1, 1], [], []>} : vector<48x8xf32>, vector<8x32xf32>, vector<48x32xf32> -> vector<48x32xf32>
    %114 = arith.addf %94, %113 : vector<48x32xf32>
    %115 = vector.extract_strided_slice %69 {offsets = [0, 0, 16], sizes = [2, 24, 8], strides = [1, 1, 1]} : vector<2x24x128xf32> to vector<2x24x8xf32>
    %cst_44 = arith.constant 0.353553385 : f32
    %116 = vector.broadcast %cst_44 : f32 to vector<2x24x8xf32>
    %117 = arith.mulf %115, %116 : vector<2x24x8xf32>
    %118 = vector.extract_strided_slice %69 {offsets = [0, 0, 48], sizes = [2, 24, 8], strides = [1, 1, 1]} : vector<2x24x128xf32> to vector<2x24x8xf32>
    %119 = vector.extract_strided_slice %69 {offsets = [0, 0, 80], sizes = [2, 24, 8], strides = [1, 1, 1]} : vector<2x24x128xf32> to vector<2x24x8xf32>
    "tpu.trace_start"() <{level = 10 : i32, message = "bqd,bkd->bqk"}> : () -> ()
    %cst_45 = arith.constant dense<0.000000e+00> : vector<2x24x24xf32>
    %120 = tpu.matmul %117, %118, %cst_45 {dimension_numbers = #tpu.dot_dimension_numbers<[2], [2], [1], [1], [0, 0, 0, 1, 1, 1], [0], [0]>} : vector<2x24x8xf32>, vector<2x24x8xf32>, vector<2x24x24xf32> -> vector<2x24x24xf32>
    "tpu.trace_stop"() : () -> ()
    %cst_46 = arith.constant dense<0xFF800000> : vector<2x24xf32>
    %121 = vector.multi_reduction <maximumf>, %120, %cst_46 [2] : vector<2x24x24xf32> to vector<2x24xf32>
    %122 = vector.shape_cast %121 : vector<2x24xf32> to vector<2x24x1xf32>
    %123 = vector.broadcast %122 : vector<2x24x1xf32> to vector<2x24x24xf32>
    %124 = arith.subf %120, %123 : vector<2x24x24xf32>
    %125 = math.exp %124 : vector<2x24x24xf32>
    %cst_47 = arith.constant dense<0.000000e+00> : vector<2x24xf32>
    %126 = vector.multi_reduction <add>, %125, %cst_47 [2] : vector<2x24x24xf32> to vector<2x24xf32>
    %127 = vector.shape_cast %126 : vector<2x24xf32> to vector<2x24x1xf32>
    %128 = vector.broadcast %127 : vector<2x24x1xf32> to vector<2x24x24xf32>
    %129 = arith.divf %125, %128 : vector<2x24x24xf32>
    "tpu.trace_start"() <{level = 10 : i32, message = "bqk,bkd->bqd"}> : () -> ()
    %cst_48 = arith.constant dense<0.000000e+00> : vector<2x24x8xf32>
    %130 = tpu.matmul %129, %119, %cst_48 {dimension_numbers = #tpu.dot_dimension_numbers<[2], [1], [1], [2], [0, 0, 0, 1, 1, 2], [0], [0]>} : vector<2x24x24xf32>, vector<2x24x8xf32>, vector<2x24x8xf32> -> vector<2x24x8xf32>
    "tpu.trace_stop"() : () -> ()
    %131 = vector.shape_cast %130 : vector<2x24x8xf32> to vector<48x8xf32>
    %132 = vector.extract_strided_slice %71 {offsets = [16, 0], sizes = [8, 32], strides = [1, 1]} : vector<32x32xf32> to vector<8x32xf32>
    %cst_49 = arith.constant dense<0.000000e+00> : vector<48x32xf32>
    %133 = tpu.matmul %131, %132, %cst_49 {dimension_numbers = #tpu.dot_dimension_numbers<[1], [0], [0], [1], [0, 0, 1, 1], [], []>} : vector<48x8xf32>, vector<8x32xf32>, vector<48x32xf32> -> vector<48x32xf32>
    %134 = arith.addf %114, %133 : vector<48x32xf32>
    %135 = vector.extract_strided_slice %69 {offsets = [0, 0, 24], sizes = [2, 24, 8], strides = [1, 1, 1]} : vector<2x24x128xf32> to vector<2x24x8xf32>
    %cst_50 = arith.constant 0.353553385 : f32
    %136 = vector.broadcast %cst_50 : f32 to vector<2x24x8xf32>
    %137 = arith.mulf %135, %136 : vector<2x24x8xf32>
    %138 = vector.extract_strided_slice %69 {offsets = [0, 0, 56], sizes = [2, 24, 8], strides = [1, 1, 1]} : vector<2x24x128xf32> to vector<2x24x8xf32>
    %139 = vector.extract_strided_slice %69 {offsets = [0, 0, 88], sizes = [2, 24, 8], strides = [1, 1, 1]} : vector<2x24x128xf32> to vector<2x24x8xf32>
    "tpu.trace_start"() <{level = 10 : i32, message = "bqd,bkd->bqk"}> : () -> ()
    %cst_51 = arith.constant dense<0.000000e+00> : vector<2x24x24xf32>
    %140 = tpu.matmul %137, %138, %cst_51 {dimension_numbers = #tpu.dot_dimension_numbers<[2], [2], [1], [1], [0, 0, 0, 1, 1, 1], [0], [0]>} : vector<2x24x8xf32>, vector<2x24x8xf32>, vector<2x24x24xf32> -> vector<2x24x24xf32>
    "tpu.trace_stop"() : () -> ()
    %cst_52 = arith.constant dense<0xFF800000> : vector<2x24xf32>
    %141 = vector.multi_reduction <maximumf>, %140, %cst_52 [2] : vector<2x24x24xf32> to vector<2x24xf32>
    %142 = vector.shape_cast %141 : vector<2x24xf32> to vector<2x24x1xf32>
    %143 = vector.broadcast %142 : vector<2x24x1xf32> to vector<2x24x24xf32>
    %144 = arith.subf %140, %143 : vector<2x24x24xf32>
    %145 = math.exp %144 : vector<2x24x24xf32>
    %cst_53 = arith.constant dense<0.000000e+00> : vector<2x24xf32>
    %146 = vector.multi_reduction <add>, %145, %cst_53 [2] : vector<2x24x24xf32> to vector<2x24xf32>
    %147 = vector.shape_cast %146 : vector<2x24xf32> to vector<2x24x1xf32>
    %148 = vector.broadcast %147 : vector<2x24x1xf32> to vector<2x24x24xf32>
    %149 = arith.divf %145, %148 : vector<2x24x24xf32>
    "tpu.trace_start"() <{level = 10 : i32, message = "bqk,bkd->bqd"}> : () -> ()
    %cst_54 = arith.constant dense<0.000000e+00> : vector<2x24x8xf32>
    %150 = tpu.matmul %149, %139, %cst_54 {dimension_numbers = #tpu.dot_dimension_numbers<[2], [1], [1], [2], [0, 0, 0, 1, 1, 2], [0], [0]>} : vector<2x24x24xf32>, vector<2x24x8xf32>, vector<2x24x8xf32> -> vector<2x24x8xf32>
    "tpu.trace_stop"() : () -> ()
    %151 = vector.shape_cast %150 : vector<2x24x8xf32> to vector<48x8xf32>
    %152 = vector.extract_strided_slice %71 {offsets = [24, 0], sizes = [8, 32], strides = [1, 1]} : vector<32x32xf32> to vector<8x32xf32>
    %cst_55 = arith.constant dense<0.000000e+00> : vector<48x32xf32>
    %153 = tpu.matmul %151, %152, %cst_55 {dimension_numbers = #tpu.dot_dimension_numbers<[1], [0], [0], [1], [0, 0, 1, 1], [], []>} : vector<48x8xf32>, vector<8x32xf32>, vector<48x32xf32> -> vector<48x32xf32>
    %154 = arith.addf %134, %153 : vector<48x32xf32>
    %c12 = arith.constant 12 : index
    %c0_56 = arith.constant 0 : index
    %155 = vector.load %arg4[%c12, %c0_56] : memref<24x128xf32, #tpu.memory_space<vmem>>, vector<1x32xf32>
    %c13 = arith.constant 13 : index
    %c0_57 = arith.constant 0 : index
    %156 = vector.load %arg4[%c13, %c0_57] : memref<24x128xf32, #tpu.memory_space<vmem>>, vector<1x32xf32>
    %cst_58 = arith.constant dense<0.000000e+00> : vector<48xf32>
    %157 = vector.multi_reduction <add>, %154, %cst_58 [1] : vector<48x32xf32> to vector<48xf32>
    %158 = vector.shape_cast %157 : vector<48xf32> to vector<48x1xf32>
    %cst_59 = arith.constant 3.200000e+01 : f32
    %159 = vector.broadcast %cst_59 : f32 to vector<48x1xf32>
    %160 = arith.divf %158, %159 : vector<48x1xf32>
    %161 = vector.broadcast %160 : vector<48x1xf32> to vector<48x32xf32>
    %162 = arith.subf %154, %161 : vector<48x32xf32>
    %163 = arith.mulf %162, %162 : vector<48x32xf32>
    %cst_60 = arith.constant dense<0.000000e+00> : vector<48xf32>
    %164 = vector.multi_reduction <add>, %163, %cst_60 [1] : vector<48x32xf32> to vector<48xf32>
    %165 = vector.shape_cast %164 : vector<48xf32> to vector<48x1xf32>
    %cst_61 = arith.constant 3.200000e+01 : f32
    %166 = vector.broadcast %cst_61 : f32 to vector<48x1xf32>
    %167 = arith.divf %165, %166 : vector<48x1xf32>
    %168 = vector.broadcast %160 : vector<48x1xf32> to vector<48x32xf32>
    %169 = arith.subf %154, %168 : vector<48x32xf32>
    %cst_62 = arith.constant 9.99999974E-6 : f32
    %170 = vector.broadcast %cst_62 : f32 to vector<48x1xf32>
    %171 = arith.addf %167, %170 : vector<48x1xf32>
    %172 = math.rsqrt %171 : vector<48x1xf32>
    %173 = vector.broadcast %172 : vector<48x1xf32> to vector<48x32xf32>
    %174 = arith.mulf %169, %173 : vector<48x32xf32>
    %175 = vector.broadcast %155 : vector<1x32xf32> to vector<48x32xf32>
    %176 = arith.mulf %174, %175 : vector<48x32xf32>
    %177 = vector.broadcast %156 : vector<1x32xf32> to vector<48x32xf32>
    %178 = arith.addf %176, %177 : vector<48x32xf32>
    %c0_63 = arith.constant 0 : index
    %c64 = arith.constant 64 : index
    %c0_64 = arith.constant 0 : index
    %179 = vector.load %arg3[%c0_63, %c64, %c0_64] : memref<2x224x128xf32, #tpu.memory_space<vmem>>, vector<1x32x128xf32>
    %180 = vector.shape_cast %179 : vector<1x32x128xf32> to vector<32x128xf32>
    %cst_65 = arith.constant dense<0.000000e+00> : vector<48x128xf32>
    %181 = tpu.matmul %178, %180, %cst_65 {dimension_numbers = #tpu.dot_dimension_numbers<[1], [0], [0], [1], [0, 0, 1, 1], [], []>} : vector<48x32xf32>, vector<32x128xf32>, vector<48x128xf32> -> vector<48x128xf32>
    %c14 = arith.constant 14 : index
    %c0_66 = arith.constant 0 : index
    %182 = vector.load %arg4[%c14, %c0_66] : memref<24x128xf32, #tpu.memory_space<vmem>>, vector<1x128xf32>
    %183 = vector.broadcast %182 : vector<1x128xf32> to vector<48x128xf32>
    %184 = arith.addf %181, %183 : vector<48x128xf32>
    %cst_67 = arith.constant 0.636619746 : f32
    %185 = math.sqrt %cst_67 : f32
    %cst_68 = arith.constant 5.000000e-01 : f32
    %186 = vector.broadcast %cst_68 : f32 to vector<48x128xf32>
    %187 = arith.mulf %186, %184 : vector<48x128xf32>
    %188 = arith.mulf %184, %184 : vector<48x128xf32>
    %189 = arith.mulf %188, %184 : vector<48x128xf32>
    %cst_69 = arith.constant 4.471500e-02 : f32
    %190 = vector.broadcast %cst_69 : f32 to vector<48x128xf32>
    %191 = arith.mulf %190, %189 : vector<48x128xf32>
    %192 = arith.addf %184, %191 : vector<48x128xf32>
    %193 = vector.broadcast %185 : f32 to vector<48x128xf32>
    %194 = arith.mulf %193, %192 : vector<48x128xf32>
    %195 = math.tanh %194 : vector<48x128xf32>
    %cst_70 = arith.constant 1.000000e+00 : f32
    %196 = vector.broadcast %cst_70 : f32 to vector<48x128xf32>
    %197 = arith.addf %196, %195 : vector<48x128xf32>
    %198 = arith.mulf %187, %197 : vector<48x128xf32>
    %c0_71 = arith.constant 0 : index
    %c96 = arith.constant 96 : index
    %c0_72 = arith.constant 0 : index
    %199 = vector.load %arg3[%c0_71, %c96, %c0_72] : memref<2x224x128xf32, #tpu.memory_space<vmem>>, vector<1x128x32xf32>
    %200 = vector.shape_cast %199 : vector<1x128x32xf32> to vector<128x32xf32>
    %cst_73 = arith.constant dense<0.000000e+00> : vector<48x32xf32>
    %201 = tpu.matmul %198, %200, %cst_73 {dimension_numbers = #tpu.dot_dimension_numbers<[1], [0], [0], [1], [0, 0, 1, 1], [], []>} : vector<48x128xf32>, vector<128x32xf32>, vector<48x32xf32> -> vector<48x32xf32>
    %202 = arith.addf %154, %201 : vector<48x32xf32>
    %c15 = arith.constant 15 : index
    %c0_74 = arith.constant 0 : index
    %203 = vector.load %arg4[%c15, %c0_74] : memref<24x128xf32, #tpu.memory_space<vmem>>, vector<1x32xf32>
    %204 = vector.broadcast %203 : vector<1x32xf32> to vector<48x32xf32>
    %205 = arith.addf %202, %204 : vector<48x32xf32>
    %c16_75 = arith.constant 16 : index
    %c0_76 = arith.constant 0 : index
    %206 = vector.load %arg4[%c16_75, %c0_76] : memref<24x128xf32, #tpu.memory_space<vmem>>, vector<1x32xf32>
    %c17 = arith.constant 17 : index
    %c0_77 = arith.constant 0 : index
    %207 = vector.load %arg4[%c17, %c0_77] : memref<24x128xf32, #tpu.memory_space<vmem>>, vector<1x32xf32>
    %cst_78 = arith.constant dense<0.000000e+00> : vector<48xf32>
    %208 = vector.multi_reduction <add>, %205, %cst_78 [1] : vector<48x32xf32> to vector<48xf32>
    %209 = vector.shape_cast %208 : vector<48xf32> to vector<48x1xf32>
    %cst_79 = arith.constant 3.200000e+01 : f32
    %210 = vector.broadcast %cst_79 : f32 to vector<48x1xf32>
    %211 = arith.divf %209, %210 : vector<48x1xf32>
    %212 = vector.broadcast %211 : vector<48x1xf32> to vector<48x32xf32>
    %213 = arith.subf %205, %212 : vector<48x32xf32>
    %214 = arith.mulf %213, %213 : vector<48x32xf32>
    %cst_80 = arith.constant dense<0.000000e+00> : vector<48xf32>
    %215 = vector.multi_reduction <add>, %214, %cst_80 [1] : vector<48x32xf32> to vector<48xf32>
    %216 = vector.shape_cast %215 : vector<48xf32> to vector<48x1xf32>
    %cst_81 = arith.constant 3.200000e+01 : f32
    %217 = vector.broadcast %cst_81 : f32 to vector<48x1xf32>
    %218 = arith.divf %216, %217 : vector<48x1xf32>
    %219 = vector.broadcast %211 : vector<48x1xf32> to vector<48x32xf32>
    %220 = arith.subf %205, %219 : vector<48x32xf32>
    %cst_82 = arith.constant 9.99999974E-6 : f32
    %221 = vector.broadcast %cst_82 : f32 to vector<48x1xf32>
    %222 = arith.addf %218, %221 : vector<48x1xf32>
    %223 = math.rsqrt %222 : vector<48x1xf32>
    %224 = vector.broadcast %223 : vector<48x1xf32> to vector<48x32xf32>
    %225 = arith.mulf %220, %224 : vector<48x32xf32>
    %226 = vector.broadcast %206 : vector<1x32xf32> to vector<48x32xf32>
    %227 = arith.mulf %225, %226 : vector<48x32xf32>
    %228 = vector.broadcast %207 : vector<1x32xf32> to vector<48x32xf32>
    %229 = arith.addf %227, %228 : vector<48x32xf32>
    %c1_83 = arith.constant 1 : index
    %c0_84 = arith.constant 0 : index
    %c0_85 = arith.constant 0 : index
    %230 = vector.load %arg3[%c1_83, %c0_84, %c0_85] : memref<2x224x128xf32, #tpu.memory_space<vmem>>, vector<1x32x128xf32>
    %231 = vector.shape_cast %230 : vector<1x32x128xf32> to vector<32x128xf32>
    %cst_86 = arith.constant dense<0.000000e+00> : vector<48x128xf32>
    %232 = tpu.matmul %229, %231, %cst_86 {dimension_numbers = #tpu.dot_dimension_numbers<[1], [0], [0], [1], [0, 0, 1, 1], [], []>} : vector<48x32xf32>, vector<32x128xf32>, vector<48x128xf32> -> vector<48x128xf32>
    %c18 = arith.constant 18 : index
    %c0_87 = arith.constant 0 : index
    %233 = vector.load %arg4[%c18, %c0_87] : memref<24x128xf32, #tpu.memory_space<vmem>>, vector<1x128xf32>
    %234 = vector.broadcast %233 : vector<1x128xf32> to vector<48x128xf32>
    %235 = arith.addf %232, %234 : vector<48x128xf32>
    %236 = vector.shape_cast %235 : vector<48x128xf32> to vector<2x24x128xf32>
    %c1_88 = arith.constant 1 : index
    %c32_89 = arith.constant 32 : index
    %c0_90 = arith.constant 0 : index
    %237 = vector.load %arg3[%c1_88, %c32_89, %c0_90] : memref<2x224x128xf32, #tpu.memory_space<vmem>>, vector<1x32x32xf32>
    %238 = vector.shape_cast %237 : vector<1x32x32xf32> to vector<32x32xf32>
    %c19 = arith.constant 19 : index
    %c0_91 = arith.constant 0 : index
    %239 = vector.load %arg4[%c19, %c0_91] : memref<24x128xf32, #tpu.memory_space<vmem>>, vector<1x32xf32>
    %240 = vector.broadcast %239 : vector<1x32xf32> to vector<48x32xf32>
    %241 = arith.addf %205, %240 : vector<48x32xf32>
    %242 = vector.extract_strided_slice %236 {offsets = [0, 0, 0], sizes = [2, 24, 8], strides = [1, 1, 1]} : vector<2x24x128xf32> to vector<2x24x8xf32>
    %cst_92 = arith.constant 0.353553385 : f32
    %243 = vector.broadcast %cst_92 : f32 to vector<2x24x8xf32>
    %244 = arith.mulf %242, %243 : vector<2x24x8xf32>
    %245 = vector.extract_strided_slice %236 {offsets = [0, 0, 32], sizes = [2, 24, 8], strides = [1, 1, 1]} : vector<2x24x128xf32> to vector<2x24x8xf32>
    %246 = vector.extract_strided_slice %236 {offsets = [0, 0, 64], sizes = [2, 24, 8], strides = [1, 1, 1]} : vector<2x24x128xf32> to vector<2x24x8xf32>
    "tpu.trace_start"() <{level = 10 : i32, message = "bqd,bkd->bqk"}> : () -> ()
    %cst_93 = arith.constant dense<0.000000e+00> : vector<2x24x24xf32>
    %247 = tpu.matmul %244, %245, %cst_93 {dimension_numbers = #tpu.dot_dimension_numbers<[2], [2], [1], [1], [0, 0, 0, 1, 1, 1], [0], [0]>} : vector<2x24x8xf32>, vector<2x24x8xf32>, vector<2x24x24xf32> -> vector<2x24x24xf32>
    "tpu.trace_stop"() : () -> ()
    %cst_94 = arith.constant dense<0xFF800000> : vector<2x24xf32>
    %248 = vector.multi_reduction <maximumf>, %247, %cst_94 [2] : vector<2x24x24xf32> to vector<2x24xf32>
    %249 = vector.shape_cast %248 : vector<2x24xf32> to vector<2x24x1xf32>
    %250 = vector.broadcast %249 : vector<2x24x1xf32> to vector<2x24x24xf32>
    %251 = arith.subf %247, %250 : vector<2x24x24xf32>
    %252 = math.exp %251 : vector<2x24x24xf32>
    %cst_95 = arith.constant dense<0.000000e+00> : vector<2x24xf32>
    %253 = vector.multi_reduction <add>, %252, %cst_95 [2] : vector<2x24x24xf32> to vector<2x24xf32>
    %254 = vector.shape_cast %253 : vector<2x24xf32> to vector<2x24x1xf32>
    %255 = vector.broadcast %254 : vector<2x24x1xf32> to vector<2x24x24xf32>
    %256 = arith.divf %252, %255 : vector<2x24x24xf32>
    "tpu.trace_start"() <{level = 10 : i32, message = "bqk,bkd->bqd"}> : () -> ()
    %cst_96 = arith.constant dense<0.000000e+00> : vector<2x24x8xf32>
    %257 = tpu.matmul %256, %246, %cst_96 {dimension_numbers = #tpu.dot_dimension_numbers<[2], [1], [1], [2], [0, 0, 0, 1, 1, 2], [0], [0]>} : vector<2x24x24xf32>, vector<2x24x8xf32>, vector<2x24x8xf32> -> vector<2x24x8xf32>
    "tpu.trace_stop"() : () -> ()
    %258 = vector.shape_cast %257 : vector<2x24x8xf32> to vector<48x8xf32>
    %259 = vector.extract_strided_slice %238 {offsets = [0, 0], sizes = [8, 32], strides = [1, 1]} : vector<32x32xf32> to vector<8x32xf32>
    %cst_97 = arith.constant dense<0.000000e+00> : vector<48x32xf32>
    %260 = tpu.matmul %258, %259, %cst_97 {dimension_numbers = #tpu.dot_dimension_numbers<[1], [0], [0], [1], [0, 0, 1, 1], [], []>} : vector<48x8xf32>, vector<8x32xf32>, vector<48x32xf32> -> vector<48x32xf32>
    %261 = arith.addf %241, %260 : vector<48x32xf32>
    %262 = vector.extract_strided_slice %236 {offsets = [0, 0, 8], sizes = [2, 24, 8], strides = [1, 1, 1]} : vector<2x24x128xf32> to vector<2x24x8xf32>
    %cst_98 = arith.constant 0.353553385 : f32
    %263 = vector.broadcast %cst_98 : f32 to vector<2x24x8xf32>
    %264 = arith.mulf %262, %263 : vector<2x24x8xf32>
    %265 = vector.extract_strided_slice %236 {offsets = [0, 0, 40], sizes = [2, 24, 8], strides = [1, 1, 1]} : vector<2x24x128xf32> to vector<2x24x8xf32>
    %266 = vector.extract_strided_slice %236 {offsets = [0, 0, 72], sizes = [2, 24, 8], strides = [1, 1, 1]} : vector<2x24x128xf32> to vector<2x24x8xf32>
    "tpu.trace_start"() <{level = 10 : i32, message = "bqd,bkd->bqk"}> : () -> ()
    %cst_99 = arith.constant dense<0.000000e+00> : vector<2x24x24xf32>
    %267 = tpu.matmul %264, %265, %cst_99 {dimension_numbers = #tpu.dot_dimension_numbers<[2], [2], [1], [1], [0, 0, 0, 1, 1, 1], [0], [0]>} : vector<2x24x8xf32>, vector<2x24x8xf32>, vector<2x24x24xf32> -> vector<2x24x24xf32>
    "tpu.trace_stop"() : () -> ()
    %cst_100 = arith.constant dense<0xFF800000> : vector<2x24xf32>
    %268 = vector.multi_reduction <maximumf>, %267, %cst_100 [2] : vector<2x24x24xf32> to vector<2x24xf32>
    %269 = vector.shape_cast %268 : vector<2x24xf32> to vector<2x24x1xf32>
    %270 = vector.broadcast %269 : vector<2x24x1xf32> to vector<2x24x24xf32>
    %271 = arith.subf %267, %270 : vector<2x24x24xf32>
    %272 = math.exp %271 : vector<2x24x24xf32>
    %cst_101 = arith.constant dense<0.000000e+00> : vector<2x24xf32>
    %273 = vector.multi_reduction <add>, %272, %cst_101 [2] : vector<2x24x24xf32> to vector<2x24xf32>
    %274 = vector.shape_cast %273 : vector<2x24xf32> to vector<2x24x1xf32>
    %275 = vector.broadcast %274 : vector<2x24x1xf32> to vector<2x24x24xf32>
    %276 = arith.divf %272, %275 : vector<2x24x24xf32>
    "tpu.trace_start"() <{level = 10 : i32, message = "bqk,bkd->bqd"}> : () -> ()
    %cst_102 = arith.constant dense<0.000000e+00> : vector<2x24x8xf32>
    %277 = tpu.matmul %276, %266, %cst_102 {dimension_numbers = #tpu.dot_dimension_numbers<[2], [1], [1], [2], [0, 0, 0, 1, 1, 2], [0], [0]>} : vector<2x24x24xf32>, vector<2x24x8xf32>, vector<2x24x8xf32> -> vector<2x24x8xf32>
    "tpu.trace_stop"() : () -> ()
    %278 = vector.shape_cast %277 : vector<2x24x8xf32> to vector<48x8xf32>
    %279 = vector.extract_strided_slice %238 {offsets = [8, 0], sizes = [8, 32], strides = [1, 1]} : vector<32x32xf32> to vector<8x32xf32>
    %cst_103 = arith.constant dense<0.000000e+00> : vector<48x32xf32>
    %280 = tpu.matmul %278, %279, %cst_103 {dimension_numbers = #tpu.dot_dimension_numbers<[1], [0], [0], [1], [0, 0, 1, 1], [], []>} : vector<48x8xf32>, vector<8x32xf32>, vector<48x32xf32> -> vector<48x32xf32>
    %281 = arith.addf %261, %280 : vector<48x32xf32>
    %282 = vector.extract_strided_slice %236 {offsets = [0, 0, 16], sizes = [2, 24, 8], strides = [1, 1, 1]} : vector<2x24x128xf32> to vector<2x24x8xf32>
    %cst_104 = arith.constant 0.353553385 : f32
    %283 = vector.broadcast %cst_104 : f32 to vector<2x24x8xf32>
    %284 = arith.mulf %282, %283 : vector<2x24x8xf32>
    %285 = vector.extract_strided_slice %236 {offsets = [0, 0, 48], sizes = [2, 24, 8], strides = [1, 1, 1]} : vector<2x24x128xf32> to vector<2x24x8xf32>
    %286 = vector.extract_strided_slice %236 {offsets = [0, 0, 80], sizes = [2, 24, 8], strides = [1, 1, 1]} : vector<2x24x128xf32> to vector<2x24x8xf32>
    "tpu.trace_start"() <{level = 10 : i32, message = "bqd,bkd->bqk"}> : () -> ()
    %cst_105 = arith.constant dense<0.000000e+00> : vector<2x24x24xf32>
    %287 = tpu.matmul %284, %285, %cst_105 {dimension_numbers = #tpu.dot_dimension_numbers<[2], [2], [1], [1], [0, 0, 0, 1, 1, 1], [0], [0]>} : vector<2x24x8xf32>, vector<2x24x8xf32>, vector<2x24x24xf32> -> vector<2x24x24xf32>
    "tpu.trace_stop"() : () -> ()
    %cst_106 = arith.constant dense<0xFF800000> : vector<2x24xf32>
    %288 = vector.multi_reduction <maximumf>, %287, %cst_106 [2] : vector<2x24x24xf32> to vector<2x24xf32>
    %289 = vector.shape_cast %288 : vector<2x24xf32> to vector<2x24x1xf32>
    %290 = vector.broadcast %289 : vector<2x24x1xf32> to vector<2x24x24xf32>
    %291 = arith.subf %287, %290 : vector<2x24x24xf32>
    %292 = math.exp %291 : vector<2x24x24xf32>
    %cst_107 = arith.constant dense<0.000000e+00> : vector<2x24xf32>
    %293 = vector.multi_reduction <add>, %292, %cst_107 [2] : vector<2x24x24xf32> to vector<2x24xf32>
    %294 = vector.shape_cast %293 : vector<2x24xf32> to vector<2x24x1xf32>
    %295 = vector.broadcast %294 : vector<2x24x1xf32> to vector<2x24x24xf32>
    %296 = arith.divf %292, %295 : vector<2x24x24xf32>
    "tpu.trace_start"() <{level = 10 : i32, message = "bqk,bkd->bqd"}> : () -> ()
    %cst_108 = arith.constant dense<0.000000e+00> : vector<2x24x8xf32>
    %297 = tpu.matmul %296, %286, %cst_108 {dimension_numbers = #tpu.dot_dimension_numbers<[2], [1], [1], [2], [0, 0, 0, 1, 1, 2], [0], [0]>} : vector<2x24x24xf32>, vector<2x24x8xf32>, vector<2x24x8xf32> -> vector<2x24x8xf32>
    "tpu.trace_stop"() : () -> ()
    %298 = vector.shape_cast %297 : vector<2x24x8xf32> to vector<48x8xf32>
    %299 = vector.extract_strided_slice %238 {offsets = [16, 0], sizes = [8, 32], strides = [1, 1]} : vector<32x32xf32> to vector<8x32xf32>
    %cst_109 = arith.constant dense<0.000000e+00> : vector<48x32xf32>
    %300 = tpu.matmul %298, %299, %cst_109 {dimension_numbers = #tpu.dot_dimension_numbers<[1], [0], [0], [1], [0, 0, 1, 1], [], []>} : vector<48x8xf32>, vector<8x32xf32>, vector<48x32xf32> -> vector<48x32xf32>
    %301 = arith.addf %281, %300 : vector<48x32xf32>
    %302 = vector.extract_strided_slice %236 {offsets = [0, 0, 24], sizes = [2, 24, 8], strides = [1, 1, 1]} : vector<2x24x128xf32> to vector<2x24x8xf32>
    %cst_110 = arith.constant 0.353553385 : f32
    %303 = vector.broadcast %cst_110 : f32 to vector<2x24x8xf32>
    %304 = arith.mulf %302, %303 : vector<2x24x8xf32>
    %305 = vector.extract_strided_slice %236 {offsets = [0, 0, 56], sizes = [2, 24, 8], strides = [1, 1, 1]} : vector<2x24x128xf32> to vector<2x24x8xf32>
    %306 = vector.extract_strided_slice %236 {offsets = [0, 0, 88], sizes = [2, 24, 8], strides = [1, 1, 1]} : vector<2x24x128xf32> to vector<2x24x8xf32>
    "tpu.trace_start"() <{level = 10 : i32, message = "bqd,bkd->bqk"}> : () -> ()
    %cst_111 = arith.constant dense<0.000000e+00> : vector<2x24x24xf32>
    %307 = tpu.matmul %304, %305, %cst_111 {dimension_numbers = #tpu.dot_dimension_numbers<[2], [2], [1], [1], [0, 0, 0, 1, 1, 1], [0], [0]>} : vector<2x24x8xf32>, vector<2x24x8xf32>, vector<2x24x24xf32> -> vector<2x24x24xf32>
    "tpu.trace_stop"() : () -> ()
    %cst_112 = arith.constant dense<0xFF800000> : vector<2x24xf32>
    %308 = vector.multi_reduction <maximumf>, %307, %cst_112 [2] : vector<2x24x24xf32> to vector<2x24xf32>
    %309 = vector.shape_cast %308 : vector<2x24xf32> to vector<2x24x1xf32>
    %310 = vector.broadcast %309 : vector<2x24x1xf32> to vector<2x24x24xf32>
    %311 = arith.subf %307, %310 : vector<2x24x24xf32>
    %312 = math.exp %311 : vector<2x24x24xf32>
    %cst_113 = arith.constant dense<0.000000e+00> : vector<2x24xf32>
    %313 = vector.multi_reduction <add>, %312, %cst_113 [2] : vector<2x24x24xf32> to vector<2x24xf32>
    %314 = vector.shape_cast %313 : vector<2x24xf32> to vector<2x24x1xf32>
    %315 = vector.broadcast %314 : vector<2x24x1xf32> to vector<2x24x24xf32>
    %316 = arith.divf %312, %315 : vector<2x24x24xf32>
    "tpu.trace_start"() <{level = 10 : i32, message = "bqk,bkd->bqd"}> : () -> ()
    %cst_114 = arith.constant dense<0.000000e+00> : vector<2x24x8xf32>
    %317 = tpu.matmul %316, %306, %cst_114 {dimension_numbers = #tpu.dot_dimension_numbers<[2], [1], [1], [2], [0, 0, 0, 1, 1, 2], [0], [0]>} : vector<2x24x24xf32>, vector<2x24x8xf32>, vector<2x24x8xf32> -> vector<2x24x8xf32>
    "tpu.trace_stop"() : () -> ()
    %318 = vector.shape_cast %317 : vector<2x24x8xf32> to vector<48x8xf32>
    %319 = vector.extract_strided_slice %238 {offsets = [24, 0], sizes = [8, 32], strides = [1, 1]} : vector<32x32xf32> to vector<8x32xf32>
    %cst_115 = arith.constant dense<0.000000e+00> : vector<48x32xf32>
    %320 = tpu.matmul %318, %319, %cst_115 {dimension_numbers = #tpu.dot_dimension_numbers<[1], [0], [0], [1], [0, 0, 1, 1], [], []>} : vector<48x8xf32>, vector<8x32xf32>, vector<48x32xf32> -> vector<48x32xf32>
    %321 = arith.addf %301, %320 : vector<48x32xf32>
    %c20 = arith.constant 20 : index
    %c0_116 = arith.constant 0 : index
    %322 = vector.load %arg4[%c20, %c0_116] : memref<24x128xf32, #tpu.memory_space<vmem>>, vector<1x32xf32>
    %c21 = arith.constant 21 : index
    %c0_117 = arith.constant 0 : index
    %323 = vector.load %arg4[%c21, %c0_117] : memref<24x128xf32, #tpu.memory_space<vmem>>, vector<1x32xf32>
    %cst_118 = arith.constant dense<0.000000e+00> : vector<48xf32>
    %324 = vector.multi_reduction <add>, %321, %cst_118 [1] : vector<48x32xf32> to vector<48xf32>
    %325 = vector.shape_cast %324 : vector<48xf32> to vector<48x1xf32>
    %cst_119 = arith.constant 3.200000e+01 : f32
    %326 = vector.broadcast %cst_119 : f32 to vector<48x1xf32>
    %327 = arith.divf %325, %326 : vector<48x1xf32>
    %328 = vector.broadcast %327 : vector<48x1xf32> to vector<48x32xf32>
    %329 = arith.subf %321, %328 : vector<48x32xf32>
    %330 = arith.mulf %329, %329 : vector<48x32xf32>
    %cst_120 = arith.constant dense<0.000000e+00> : vector<48xf32>
    %331 = vector.multi_reduction <add>, %330, %cst_120 [1] : vector<48x32xf32> to vector<48xf32>
    %332 = vector.shape_cast %331 : vector<48xf32> to vector<48x1xf32>
    %cst_121 = arith.constant 3.200000e+01 : f32
    %333 = vector.broadcast %cst_121 : f32 to vector<48x1xf32>
    %334 = arith.divf %332, %333 : vector<48x1xf32>
    %335 = vector.broadcast %327 : vector<48x1xf32> to vector<48x32xf32>
    %336 = arith.subf %321, %335 : vector<48x32xf32>
    %cst_122 = arith.constant 9.99999974E-6 : f32
    %337 = vector.broadcast %cst_122 : f32 to vector<48x1xf32>
    %338 = arith.addf %334, %337 : vector<48x1xf32>
    %339 = math.rsqrt %338 : vector<48x1xf32>
    %340 = vector.broadcast %339 : vector<48x1xf32> to vector<48x32xf32>
    %341 = arith.mulf %336, %340 : vector<48x32xf32>
    %342 = vector.broadcast %322 : vector<1x32xf32> to vector<48x32xf32>
    %343 = arith.mulf %341, %342 : vector<48x32xf32>
    %344 = vector.broadcast %323 : vector<1x32xf32> to vector<48x32xf32>
    %345 = arith.addf %343, %344 : vector<48x32xf32>
    %c1_123 = arith.constant 1 : index
    %c64_124 = arith.constant 64 : index
    %c0_125 = arith.constant 0 : index
    %346 = vector.load %arg3[%c1_123, %c64_124, %c0_125] : memref<2x224x128xf32, #tpu.memory_space<vmem>>, vector<1x32x128xf32>
    %347 = vector.shape_cast %346 : vector<1x32x128xf32> to vector<32x128xf32>
    %cst_126 = arith.constant dense<0.000000e+00> : vector<48x128xf32>
    %348 = tpu.matmul %345, %347, %cst_126 {dimension_numbers = #tpu.dot_dimension_numbers<[1], [0], [0], [1], [0, 0, 1, 1], [], []>} : vector<48x32xf32>, vector<32x128xf32>, vector<48x128xf32> -> vector<48x128xf32>
    %c22 = arith.constant 22 : index
    %c0_127 = arith.constant 0 : index
    %349 = vector.load %arg4[%c22, %c0_127] : memref<24x128xf32, #tpu.memory_space<vmem>>, vector<1x128xf32>
    %350 = vector.broadcast %349 : vector<1x128xf32> to vector<48x128xf32>
    %351 = arith.addf %348, %350 : vector<48x128xf32>
    %cst_128 = arith.constant 0.636619746 : f32
    %352 = math.sqrt %cst_128 : f32
    %cst_129 = arith.constant 5.000000e-01 : f32
    %353 = vector.broadcast %cst_129 : f32 to vector<48x128xf32>
    %354 = arith.mulf %353, %351 : vector<48x128xf32>
    %355 = arith.mulf %351, %351 : vector<48x128xf32>
    %356 = arith.mulf %355, %351 : vector<48x128xf32>
    %cst_130 = arith.constant 4.471500e-02 : f32
    %357 = vector.broadcast %cst_130 : f32 to vector<48x128xf32>
    %358 = arith.mulf %357, %356 : vector<48x128xf32>
    %359 = arith.addf %351, %358 : vector<48x128xf32>
    %360 = vector.broadcast %352 : f32 to vector<48x128xf32>
    %361 = arith.mulf %360, %359 : vector<48x128xf32>
    %362 = math.tanh %361 : vector<48x128xf32>
    %cst_131 = arith.constant 1.000000e+00 : f32
    %363 = vector.broadcast %cst_131 : f32 to vector<48x128xf32>
    %364 = arith.addf %363, %362 : vector<48x128xf32>
    %365 = arith.mulf %354, %364 : vector<48x128xf32>
    %c1_132 = arith.constant 1 : index
    %c96_133 = arith.constant 96 : index
    %c0_134 = arith.constant 0 : index
    %366 = vector.load %arg3[%c1_132, %c96_133, %c0_134] : memref<2x224x128xf32, #tpu.memory_space<vmem>>, vector<1x128x32xf32>
    %367 = vector.shape_cast %366 : vector<1x128x32xf32> to vector<128x32xf32>
    %cst_135 = arith.constant dense<0.000000e+00> : vector<48x32xf32>
    %368 = tpu.matmul %365, %367, %cst_135 {dimension_numbers = #tpu.dot_dimension_numbers<[1], [0], [0], [1], [0, 0, 1, 1], [], []>} : vector<48x128xf32>, vector<128x32xf32>, vector<48x32xf32> -> vector<48x32xf32>
    %369 = arith.addf %321, %368 : vector<48x32xf32>
    %c23 = arith.constant 23 : index
    %c0_136 = arith.constant 0 : index
    %370 = vector.load %arg4[%c23, %c0_136] : memref<24x128xf32, #tpu.memory_space<vmem>>, vector<1x32xf32>
    %371 = vector.broadcast %370 : vector<1x32xf32> to vector<48x32xf32>
    %372 = arith.addf %369, %371 : vector<48x32xf32>
    %c3 = arith.constant 3 : index
    %c0_137 = arith.constant 0 : index
    %373 = vector.load %arg4[%c3, %c0_137] : memref<24x128xf32, #tpu.memory_space<vmem>>, vector<1x32xf32>
    %c4 = arith.constant 4 : index
    %c0_138 = arith.constant 0 : index
    %374 = vector.load %arg4[%c4, %c0_138] : memref<24x128xf32, #tpu.memory_space<vmem>>, vector<1x32xf32>
    %cst_139 = arith.constant dense<0.000000e+00> : vector<48xf32>
    %375 = vector.multi_reduction <add>, %372, %cst_139 [1] : vector<48x32xf32> to vector<48xf32>
    %376 = vector.shape_cast %375 : vector<48xf32> to vector<48x1xf32>
    %cst_140 = arith.constant 3.200000e+01 : f32
    %377 = vector.broadcast %cst_140 : f32 to vector<48x1xf32>
    %378 = arith.divf %376, %377 : vector<48x1xf32>
    %379 = vector.broadcast %378 : vector<48x1xf32> to vector<48x32xf32>
    %380 = arith.subf %372, %379 : vector<48x32xf32>
    %381 = arith.mulf %380, %380 : vector<48x32xf32>
    %cst_141 = arith.constant dense<0.000000e+00> : vector<48xf32>
    %382 = vector.multi_reduction <add>, %381, %cst_141 [1] : vector<48x32xf32> to vector<48xf32>
    %383 = vector.shape_cast %382 : vector<48xf32> to vector<48x1xf32>
    %cst_142 = arith.constant 3.200000e+01 : f32
    %384 = vector.broadcast %cst_142 : f32 to vector<48x1xf32>
    %385 = arith.divf %383, %384 : vector<48x1xf32>
    %386 = vector.broadcast %378 : vector<48x1xf32> to vector<48x32xf32>
    %387 = arith.subf %372, %386 : vector<48x32xf32>
    %cst_143 = arith.constant 9.99999974E-6 : f32
    %388 = vector.broadcast %cst_143 : f32 to vector<48x1xf32>
    %389 = arith.addf %385, %388 : vector<48x1xf32>
    %390 = math.rsqrt %389 : vector<48x1xf32>
    %391 = vector.broadcast %390 : vector<48x1xf32> to vector<48x32xf32>
    %392 = arith.mulf %387, %391 : vector<48x32xf32>
    %393 = vector.broadcast %373 : vector<1x32xf32> to vector<48x32xf32>
    %394 = arith.mulf %392, %393 : vector<48x32xf32>
    %395 = vector.broadcast %374 : vector<1x32xf32> to vector<48x32xf32>
    %396 = arith.addf %394, %395 : vector<48x32xf32>
    %c24 = arith.constant 24 : index
    %c0_144 = arith.constant 0 : index
    %397 = vector.load %arg5[%c24, %c0_144] : memref<120x128xf32, #tpu.memory_space<vmem>>, vector<32x64xf32>
    %cst_145 = arith.constant dense<0.000000e+00> : vector<48x64xf32>
    %398 = tpu.matmul %396, %397, %cst_145 {dimension_numbers = #tpu.dot_dimension_numbers<[1], [0], [0], [1], [0, 0, 1, 1], [], []>} : vector<48x32xf32>, vector<32x64xf32>, vector<48x64xf32> -> vector<48x64xf32>
    %c5 = arith.constant 5 : index
    %c0_146 = arith.constant 0 : index
    %399 = vector.load %arg4[%c5, %c0_146] : memref<24x128xf32, #tpu.memory_space<vmem>>, vector<1x64xf32>
    %400 = vector.broadcast %399 : vector<1x64xf32> to vector<48x64xf32>
    %401 = arith.addf %398, %400 : vector<48x64xf32>
    %402 = math.tanh %401 : vector<48x64xf32>
    %c56 = arith.constant 56 : index
    %c0_147 = arith.constant 0 : index
    %403 = vector.load %arg5[%c56, %c0_147] : memref<120x128xf32, #tpu.memory_space<vmem>>, vector<64x128xf32>
    %cst_148 = arith.constant dense<0.000000e+00> : vector<48x128xf32>
    %404 = tpu.matmul %402, %403, %cst_148 {dimension_numbers = #tpu.dot_dimension_numbers<[1], [0], [0], [1], [0, 0, 1, 1], [], []>} : vector<48x64xf32>, vector<64x128xf32>, vector<48x128xf32> -> vector<48x128xf32>
    %c6 = arith.constant 6 : index
    %c0_149 = arith.constant 0 : index
    %405 = vector.load %arg4[%c6, %c0_149] : memref<24x128xf32, #tpu.memory_space<vmem>>, vector<1x128xf32>
    %406 = vector.broadcast %405 : vector<1x128xf32> to vector<48x128xf32>
    %407 = arith.addf %404, %406 : vector<48x128xf32>
    %c0_150 = arith.constant 0 : index
    %c0_151 = arith.constant 0 : index
    %408 = vector.load %arg6[%c0_150, %c0_151] : memref<48x128xf32, #tpu.memory_space<vmem>>, vector<48x128xf32>
    tpu.vector_store %arg6[%c0_150, %c0_151], %407 {strides = array<i32>} : memref<48x128xf32, #tpu.memory_space<vmem>>, vector<48x128xf32>,
    return
  }
  func.func @transform_0(%arg0: i32) -> (i32, i32, i32) {
    %c0_i32 = arith.constant 0 : i32
    %c0_i32_0 = arith.constant 0 : i32
    %c0_i32_1 = arith.constant 0 : i32
    %c0_i32_2 = arith.constant 0 : i32
    return %c0_i32, %c0_i32_0, %c0_i32_1 : i32, i32, i32
  }
  func.func @transform_1(%arg0: i32) -> (i32, i32, i32) {
    %c0_i32 = arith.constant 0 : i32
    %c0_i32_0 = arith.constant 0 : i32
    %c0_i32_1 = arith.constant 0 : i32
    %c0_i32_2 = arith.constant 0 : i32
    return %c0_i32, %c0_i32_0, %c0_i32_1 : i32, i32, i32
  }
  func.func @transform_2(%arg0: i32) -> (i32, i32, i32) {
    %c0_i32 = arith.constant 0 : i32
    %c0_i32_0 = arith.constant 0 : i32
    %c0_i32_1 = arith.constant 0 : i32
    %c0_i32_2 = arith.constant 0 : i32
    return %c0_i32, %c0_i32_0, %c0_i32_1 : i32, i32, i32
  }
  func.func @transform_3(%arg0: i32) -> (i32, i32) {
    %c0_i32 = arith.constant 0 : i32
    %c0_i32_0 = arith.constant 0 : i32
    %c0_i32_1 = arith.constant 0 : i32
    return %c0_i32, %c0_i32_0 : i32, i32
  }
  func.func @transform_4(%arg0: i32) -> (i32, i32) {
    %c0_i32 = arith.constant 0 : i32
    %c0_i32_0 = arith.constant 0 : i32
    %c0_i32_1 = arith.constant 0 : i32
    return %c0_i32, %c0_i32_0 : i32, i32
  }
  func.func @transform_5(%arg0: i32) -> (i32, i32) {
    %c0_i32 = arith.constant 0 : i32
    %c0_i32_0 = arith.constant 0 : i32
    %c0_i32_1 = arith.constant 0 : i32
    return %c0_i32, %c0_i32_0 : i32, i32
  }
}

</mosaic_0001>

<bundles_post_ra>
// kernel: decoder_pallas.1
= control target key start
LH: loop header
LB: loop body
LE: loop exit
PB: predicated region body
PF: predicated region fallthrough
CT: control target
= control target key end

     0   :  { %10 = vsyncpa [#allocation3], 0  ;;  %s7320_s0 = inlined_call_operand.hbm [shape: f32[2,8,16], index: 0, kind: input, shape index: {}]   ;;  %s7321_s1 = inlined_call_operand.hbm [shape: f32[2,16,32], index: 1, kind: input, shape index: {}]   ;;  %s7322_s2 = inlined_call_operand.hbm [shape: f32[2,224,128], index: 2, kind: input, shape index: {}]   ;;  %s7323_s3 = inlined_call_operand.hbm [shape: f32[24,128], index: 3, kind: input, shape index: {}]   ;;  %s7324_s4 = inlined_call_operand.hbm [shape: f32[120,128], index: 4, kind: input, shape index: {}]   ;;  %s7325_s5 = inlined_call_operand.vmem [shape: f32[48,128], index: 5, kind: output, shape index: {}]  }
   0x1   :  { %11 = vsyncpa [#allocation5], 0 }
   0x2   :  { %12 = vsyncpa [#allocation8], 0  ;;  %s30_s20 = sshll.u32 %s7321_s1, 4  ;;  %s5609_s21 = smov [#allocation4]   ;;  %s31_s20 = int_to_ptr.hbm [resolvable:$true] %s30_s20 }
   0x3   :  { %s32_s22 = sshll.u32 %s5609_s21, 4  ;;  %s56_s25 = sshll.u32 %s7323_s3, 4  ;;  %s33_s22 = int_to_ptr.vmem [resolvable:$true] %s32_s22  ;;  %s57_s25 = int_to_ptr.hbm [resolvable:$true] %s56_s25 }
   0x4   :  { %s5610_s26 = smov 128   ;;  %s5611_s27 = smov 8  }
   0x5   :  { %38 = dma.hbm_to_vmem [thread:$0]  %s31_s20, 512, %s33_s22, [#allocation5], %s5610_s26, %s5610_s26, %s5611_s27  }
   0x6   :  { %s5612_s28 = smov [#allocation7]   ;;  %s17_s7 = sshll.u32 %s7320_s0, 4  ;;  %s18_s7 = int_to_ptr.hbm [resolvable:$true] %s17_s7 }
   0x7   :  { %s58_s29 = sshll.u32 %s5612_s28, 4  ;;  %s43_s9 = sshll.u32 %s7322_s2, 4  ;;  %s59_s29 = int_to_ptr.vmem [resolvable:$true] %s58_s29  ;;  %s44_s9 = int_to_ptr.hbm [resolvable:$true] %s43_s9 }
   0x8   :  { %64 = dma.hbm_to_vmem [thread:$0]  %s57_s25, 384, %s59_s29, [#allocation8], %s5610_s26, %s5610_s26, %s5611_s27  }
   0x9   :  { %s5613_s10 = smov [#allocation2]   ;;  %s5614_s3 = smov [#allocation6]  }
   0xa   :  { %s19_s11 = sshll.u32 %s5613_s10, 4  ;;  %s45_s12 = sshll.u32 %s5614_s3, 4  ;;  %s20_s11 = int_to_ptr.vmem [resolvable:$true] %s19_s11  ;;  %s46_s12 = int_to_ptr.vmem [resolvable:$true] %s45_s12 }
   0xb   :  { %25 = dma.hbm_to_vmem [thread:$0]  %s18_s7, 256, %s20_s11, [#allocation3], %s5610_s26, %s5610_s26, %s5611_s27  }
   0xc   :  { %s69_s15 = sshll.u32 %s7324_s4, 4  ;;  %s5615_s0 = smov [#allocation9]   ;;  %s70_s15 = int_to_ptr.hbm [resolvable:$true] %s69_s15 }
   0xd   :  { %51 = dma.hbm_to_vmem [thread:$0]  %s44_s9, 7168, %s46_s12, [#allocation5], %s5610_s26, %s5610_s26, %s5611_s27  }
   0xe   :  { %s71_s16 = sshll.u32 %s5615_s0, 4  ;;  %s72_s16 = int_to_ptr.vmem [resolvable:$true] %s71_s16 }
   0xf   :  { %77 = dma.hbm_to_vmem [thread:$0]  %s70_s15, 1920, %s72_s16, [#allocation8], %s5610_s26, %s5610_s26, %s5611_s27  }
  0x10   :  { %5603 = dma.done.wait [#allocation3], 256  }
  0x11   :  { %5604 = vsyncadd [#allocation3], 4294967040 }
  0x12   :  { %5605 = dma.done.wait [#allocation5], 7680  }
  0x13   :  { %5606 = vsyncadd [#allocation5], 4294959616 }
  0x14   :  { %5607 = dma.done.wait [#allocation8], 2304  }
  0x15   :  { %5608 = vsyncadd [#allocation8], 4294964992  ;;  %vm143_vm0 = vcmask 261120   ;;  %v99_v0 = vld [vmem:[#allocation9 + $0x8] sm:$0xff]  ;;  %v98_v2 = vld [vmem:[#allocation9] sm:$0xff]  ;;  %vm105_vm1 = vcmask 130048  }
  0x16   :  { %v137_v1 = vld [vmem:[#allocation4] sm:$0xff]  ;;  %126 = vmatpush.msra.mxu0 %v99_v0  ;;  %v101_v4 = vld [vmem:[#allocation2] sm:$0xff]  ;;  %v138_v5 = vld [vmem:[#allocation4 + $0x8] sm:$0xff]  ;;  %v5616_v7 = vmov 32.0   ;;  %s5617_s2 = smov 96   ;;  %s5618_s4 = smov 64  }
  0x17   :  { %v144_v3 = vsel %vm143_vm0, %v137_v1, 0.0  ;;  %v147_v6 = vsel %vm143_vm0, %v138_v5, 0.0  ;;  %5180 = vrcp.f32 %v5616_v7  ;;  %v5679_v17 = vld [vmem:[#allocation7] ss:$0 sm:$0xff]  ;;  %v5682_v21 = vld [vmem:[#allocation9 + $0x10] sm:$0xff]  ;;  %s5619_s17 = smov 88  }
  0x18   :  { %145 = vadd.xlane.f32.xlu0 %v144_v3  ;;  %127 = vmatpush.msra.mxu0 %v98_v2  ;;  %v5693_v48 = vld [vmem:[#allocation7 + $0x1] ss:$0 sm:$0xff]  ;;  %v5695_v52 = vld [vmem:[#allocation7 + $0x2] ss:$0 sm:$0xff]  ;;  %s5620_s18 = smov 120   ;;  %s5621_s19 = smov 56  }
  0x19   :  { %4820 = vmatmul.msk.f32.vlgmr.msra.gmra.mxu0 %vm105_vm1, %v101_v4  ;;  %s5622_s20 = smov 80   ;;  %s5623_s21 = smov 112  }
  0x1a   :  { %s5624_s22 = smov 48   ;;  %s5625_s23 = smov 72  }
  0x1b   :  { %s5626_s24 = smov 104   ;;  %s5627_s25 = smov 40  }
  0x1d   :  { %v5181_v8 = vpop.eup %5180 }
  0x1e   :  { %v163_v9 = vmul.f32 32.0, %v5181_v8  ;;  %vm167_vm2 = vweird.f32 %v5181_v8 }
  0x20   :  { %148 = vadd.xlane.f32.xlu0 %v147_v6  ;;  %v164_v10 = vsub.f32 1.0, %v163_v9 }
  0x22   :  { %v165_v11 = vmul.f32 %v5181_v8, %v164_v10 }
  0x24   :  { %v166_v13 = vadd.f32 %v5181_v8, %v165_v11 }
  0x26   :  { %v5676_v14 = vsel %vm167_vm2, %v5181_v8, %v166_v13 }
  0x8b   :  { %v146_v12 = vpop.xlane.xlu0 %145 }
  0x8c   :  { %v169_v18 = vmul.f32 %v5676_v14, %v146_v12 }
  0x8e   :  { %v175_v24 = vsub.f32 %v137_v1, %v169_v18  ;;  %v102_v1 = vld [vmem:[#allocation2 + $0x8] sm:$0xff] }
  0x8f   :  { %4821 = vmatmul.msk.f32.gmra.mxu0 %vm105_vm1, %v102_v1 }
  0x90   :  { %v181_v28 = vmul.f32 %v175_v24, %v175_v24 }
  0x92   :  { %v187_v29 = vsel %vm143_vm0, %v181_v28, 0.0 }
  0x93   :  { %v149_v15 = vpop.xlane.xlu0 %148 }
  0x94   :  { %v170_v16 = vmul.f32 %v5676_v14, %v149_v15 }
  0x96   :  { %v176_v19 = vsub.f32 %v138_v5, %v170_v16  ;;  %v129_v20 = vpop.f32.mrf.mxu0 }
  0x97   :  { %v130_v22 = vadd.f32 %v5679_v17, %v129_v20 }
  0x98   :  { %v182_v23 = vmul.f32 %v176_v19, %v176_v19 }
  0x99   :  { %v135_v26 = vadd.f32 %v130_v22, %v5682_v21 }
  0x9a   :  { %v190_v25 = vsel %vm143_vm0, %v182_v23, 0.0 }
  0x9b   :  { %191 = vadd.xlane.f32.xlu2 %v190_v25  ;;  %v150_v27 = vsel %vm143_vm0, %v135_v26, 0.0  ;;  %v140_v25 = vld [vmem:[#allocation4 + $0x18] sm:$0xff] }
  0x9c   :  { %151 = vadd.xlane.f32.xlu1 %v150_v27  ;;  %v156_v28 = vsel %vm143_vm0, %v140_v25, 0.0 }
  0xa4   :  { %188 = vadd.xlane.f32.xlu1 %v187_v29 }
 0x10e   :  { %v192_v30 = vpop.xlane.xlu2 %191 }
 0x10f   :  { %v206_v31 = vmul.f32 %v192_v30, %v5676_v14  ;;  %v152_v32 = vpop.xlane.xlu1 %151 }
 0x110   :  { %v171_v34 = vmul.f32 %v5676_v14, %v152_v32 }
 0x111   :  { %v212_v33 = vadd.f32 1e-05, %v206_v31  ;;  %v139_v31 = vld [vmem:[#allocation4 + $0x10] sm:$0xff] }
 0x112   :  { %v177_v35 = vsub.f32 %v135_v26, %v171_v34  ;;  %v153_v32 = vsel %vm143_vm0, %v139_v31, 0.0  ;;  %v447_v34 = vld [vmem:[#allocation6 + $0x10] sm:$0xff] }
 0x113   :  { %5182 = vrsqrt.f32 %v212_v33  ;;  %vm233_vm3 = vweird.f32 %v212_v33 }
 0x114   :  { %v183_v36 = vmul.f32 %v177_v35, %v177_v35 }
 0x116   :  { %v193_v37 = vsel %vm143_vm0, %v183_v36, 0.0  ;;  %v446_v36 = vld [vmem:[#allocation6 + $0x8] sm:$0xff] }
 0x117   :  { %194 = vadd.xlane.f32.xlu2 %v193_v37  ;;  %v189_v38 = vpop.xlane.xlu1 %188 }
 0x118   :  { %v205_v40 = vmul.f32 %v189_v38, %v5676_v14 }
 0x119   :  { %v5183_v39 = vpop.eup %5182 }
 0x11a   :  { %v228_v41 = vmul.f32 %v5183_v39, %v212_v33  ;;  %v211_v42 = vadd.f32 1e-05, %v205_v40  ;;  %vm234_vm4 = vweird.f32 %v5183_v39  ;;  %v448_v33 = vld [vmem:[#allocation6 + $0x18] sm:$0xff] }
 0x11b   :  { %vm235_vm5 = vmor %vm233_vm3, %vm234_vm4  ;;  %481 = vmatpush.msra.mxu1 %v448_v33 }
 0x11c   :  { %v229_v43 = vmul.f32 %v5183_v39, %v228_v41  ;;  %5184 = vrsqrt.f32 %v211_v42  ;;  %vm223_vm6 = vweird.f32 %v211_v42 }
 0x11d   :  { %482 = vmatpush.msra.mxu1 %v447_v34 }
 0x11e   :  { %v230_v44 = vmul.f32 0.5, %v229_v43 }
 0x11f   :  { %483 = vmatpush.msra.mxu1 %v446_v36 }
 0x120   :  { %v231_v45 = vsub.f32 1.5, %v230_v44 }
 0x122   :  { %v232_v46 = vmul.f32 %v5183_v39, %v231_v45  ;;  %v5185_v47 = vpop.eup %5184 }
 0x123   :  { %v218_v49 = vmul.f32 %v5185_v47, %v211_v42  ;;  %vm224_vm7 = vweird.f32 %v5185_v47  ;;  %v132_v42 = vpop.f32.mrf.mxu0 }
 0x124   :  { %v236_v50 = vsel %vm235_vm5, %v5183_v39, %v232_v46  ;;  %vm225_vm8 = vmor %vm223_vm6, %vm224_vm7  ;;  %v445_v39 = vld [vmem:[#allocation6] sm:$0xff]  ;;  %v133_v45 = vadd.f32 %v5679_v17, %v132_v42 }
 0x125   :  { %v278_v51 = vmul.f32 %v236_v50, %v176_v19  ;;  %v219_v53 = vmul.f32 %v5185_v47, %v218_v49  ;;  %484 = vmatpush.msra.mxu1 %v445_v39 }
 0x127   :  { %v285_v54 = vmul.f32 %v5693_v48, %v278_v51  ;;  %v220_v55 = vmul.f32 0.5, %v219_v53 }
 0x129   :  { %v5699_v56 = vadd.f32 %v5695_v52, %v285_v54  ;;  %v221_v57 = vsub.f32 1.5, %v220_v55  ;;  %v136_v55 = vadd.f32 %v133_v45, %v5682_v21 }
 0x12b   :  { %v302_v58 = vsel %vm143_vm0, %v5699_v56, 0.0  ;;  %v222_v59 = vmul.f32 %v5185_v47, %v221_v57 }
 0x12c   :  { %303 = vadd.xlane.f32.xlu1 %v302_v58 }
 0x12d   :  { %v226_v60 = vsel %vm225_vm8, %v5185_v47, %v222_v59 }
 0x12e   :  { %v277_v61 = vmul.f32 %v226_v60, %v175_v24  ;;  %v159_v60 = vsel %vm143_vm0, %v136_v55, 0.0 }
 0x130   :  { %v284_v62 = vmul.f32 %v5693_v48, %v277_v61 }
 0x132   :  { %v5705_v63 = vadd.f32 %v5695_v52, %v284_v62 }
 0x134   :  { %v299_v0 = vsel %vm143_vm0, %v5705_v63, 0.0 }
 0x135   :  { %300 = vadd.xlane.f32.xlu0 %v299_v0 }
 0x18a   :  { %v195_v2 = vpop.xlane.xlu2 %194 }
 0x18b   :  { %v207_v3 = vmul.f32 %v195_v2, %v5676_v14 }
 0x18d   :  { %v213_v4 = vadd.f32 1e-05, %v207_v3 }
 0x18f   :  { %5186 = vrsqrt.f32 %v213_v4  ;;  %vm243_vm10 = vweird.f32 %v213_v4 }
 0x195   :  { %v5187_v5 = vpop.eup %5186 }
 0x196   :  { %v238_v6 = vmul.f32 %v5187_v5, %v213_v4  ;;  %vm244_vm9 = vweird.f32 %v5187_v5 }
 0x197   :  { %vm245_vm11 = vmor %vm243_vm10, %vm244_vm9 }
 0x198   :  { %v239_v7 = vmul.f32 %v5187_v5, %v238_v6 }
 0x19a   :  { %v240_v8 = vmul.f32 0.5, %v239_v7 }
 0x19c   :  { %v241_v9 = vsub.f32 1.5, %v240_v8 }
 0x19e   :  { %v242_v10 = vmul.f32 %v5187_v5, %v241_v9 }
 0x19f   :  { %v304_v11 = vpop.xlane.xlu1 %303 }
 0x1a0   :  { %v318_v12 = vmul.f32 %v304_v11, %v5676_v14  ;;  %v246_v13 = vsel %vm245_vm11, %v5187_v5, %v242_v10 }
 0x1a1   :  { %v279_v16 = vmul.f32 %v246_v13, %v177_v35 }
 0x1a2   :  { %v5713_v15 = vsub.f32 %v5699_v56, %v318_v12 }
 0x1a3   :  { %v286_v19 = vmul.f32 %v5693_v48, %v279_v16  ;;  %v5758_v16 = vld [vmem:[#allocation7 + $0x8] ss:$0 sm:$0xff] }
 0x1a4   :  { %v330_v18 = vmul.f32 %v5713_v15, %v5713_v15 }
 0x1a5   :  { %v5720_v22 = vadd.f32 %v5695_v52, %v286_v19 }
 0x1a6   :  { %v338_v20 = vsel %vm143_vm0, %v330_v18, 0.0 }
 0x1a7   :  { %339 = vadd.xlane.f32.xlu1 %v338_v20  ;;  %v305_v23 = vsel %vm143_vm0, %v5720_v22, 0.0  ;;  %v5761_v20 = vld [vmem:[#allocation7 + $0x9] ss:$0 sm:$0xff] }
 0x1a8   :  { %306 = vadd.xlane.f32.xlu2 %v305_v23  ;;  %v301_v24 = vpop.xlane.xlu0 %300 }
 0x1a9   :  { %v317_v26 = vmul.f32 %v301_v24, %v5676_v14 }
 0x1ab   :  { %v5726_v27 = vsub.f32 %v5705_v63, %v317_v26 }
 0x1ad   :  { %v329_v29 = vmul.f32 %v5726_v27, %v5726_v27 }
 0x1af   :  { %157 = vadd.xlane.f32.xlu1 %v156_v28  ;;  %v335_v30 = vsel %vm143_vm0, %v329_v29, 0.0 }
 0x1b0   :  { %336 = vadd.xlane.f32.xlu0 %v335_v30 }
 0x1b8   :  { %154 = vadd.xlane.f32.xlu0 %v153_v32 }
 0x21a   :  { %v340_v35 = vpop.xlane.xlu1 %339 }
 0x21b   :  { %v354_v37 = vmul.f32 %v340_v35, %v5676_v14  ;;  %v307_v38 = vpop.xlane.xlu2 %306 }
 0x21c   :  { %v319_v41 = vmul.f32 %v307_v38, %v5676_v14 }
 0x21d   :  { %v360_v40 = vadd.f32 1e-05, %v354_v37 }
 0x21e   :  { %v5736_v43 = vsub.f32 %v5720_v22, %v319_v41 }
 0x21f   :  { %5188 = vrsqrt.f32 %v360_v40  ;;  %vm381_vm1 = vweird.f32 %v360_v40 }
 0x220   :  { %v331_v44 = vmul.f32 %v5736_v43, %v5736_v43 }
 0x222   :  { %v158_v46 = vpop.xlane.xlu1 %157  ;;  %v341_v49 = vsel %vm143_vm0, %v331_v44, 0.0 }
 0x223   :  { %v173_v47 = vmul.f32 %v5676_v14, %v158_v46  ;;  %342 = vadd.xlane.f32.xlu2 %v341_v49  ;;  %v337_v50 = vpop.xlane.xlu0 %336 }
 0x224   :  { %v353_v54 = vmul.f32 %v337_v50, %v5676_v14 }
 0x225   :  { %v5189_v51 = vpop.eup %5188  ;;  %v5743_v53 = vsub.f32 %v140_v25, %v173_v47 }
 0x226   :  { %v359_v57 = vadd.f32 1e-05, %v353_v54  ;;  %v376_v59 = vmul.f32 %v5189_v51, %v360_v40  ;;  %vm382_vm13 = vweird.f32 %v5189_v51 }
 0x227   :  { %v185_v58 = vmul.f32 %v5743_v53, %v5743_v53  ;;  %vm383_vm2 = vmor %vm381_vm1, %vm382_vm13 }
 0x228   :  { %5190 = vrsqrt.f32 %v359_v57  ;;  %v377_v61 = vmul.f32 %v5189_v51, %v376_v59  ;;  %vm371_vm14 = vweird.f32 %v359_v57 }
 0x229   :  { %v199_v17 = vsel %vm143_vm0, %v185_v58, 0.0 }
 0x22a   :  { %200 = vadd.xlane.f32.xlu1 %v199_v17  ;;  %v378_v21 = vmul.f32 0.5, %v377_v61 }
 0x22b   :  { %160 = vadd.xlane.f32.xlu2 %v159_v60  ;;  %v155_v62 = vpop.xlane.xlu0 %154 }
 0x22c   :  { %v172_v0 = vmul.f32 %v5676_v14, %v155_v62  ;;  %v379_v7 = vsub.f32 1.5, %v378_v21 }
 0x22e   :  { %v5191_v1 = vpop.eup %5190  ;;  %v5752_v2 = vsub.f32 %v139_v31, %v172_v0  ;;  %v380_v10 = vmul.f32 %v5189_v51, %v379_v7 }
 0x22f   :  { %v366_v3 = vmul.f32 %v5191_v1, %v359_v57  ;;  %vm372_vm12 = vweird.f32 %v5191_v1 }
 0x230   :  { %v184_v4 = vmul.f32 %v5752_v2, %v5752_v2  ;;  %vm373_vm15 = vmor %vm371_vm14, %vm372_vm12  ;;  %v384_v18 = vsel %vm383_vm2, %v5189_v51, %v380_v10 }
 0x231   :  { %v367_v5 = vmul.f32 %v5191_v1, %v366_v3  ;;  %v426_v24 = vmul.f32 %v384_v18, %v5713_v15 }
 0x232   :  { %v196_v6 = vsel %vm143_vm0, %v184_v4, 0.0 }
 0x233   :  { %v368_v8 = vmul.f32 0.5, %v367_v5  ;;  %197 = vadd.xlane.f32.xlu0 %v196_v6  ;;  %v433_v25 = vmul.f32 %v5758_v16, %v426_v24 }
 0x235   :  { %v369_v9 = vsub.f32 1.5, %v368_v8  ;;  %v440_v26 = vadd.f32 %v5761_v20, %v433_v25 }
 0x237   :  { %v370_v11 = vmul.f32 %v5191_v1, %v369_v9 }
 0x239   :  { %v374_v12 = vsel %vm373_vm15, %v5191_v1, %v370_v11  ;;  %vm531_vm15 = vcmask 64512  }
 0x23a   :  { %v425_v13 = vmul.f32 %v374_v12, %v5726_v27 }
 0x23c   :  { %v432_v19 = vmul.f32 %v5758_v16, %v425_v13  ;;  %v5796_v13 = vld [vmem:[#allocation7 + $0xa] ss:$0 sm:$0xff] }
 0x23e   :  { %v439_v23 = vadd.f32 %v5761_v20, %v432_v19 }
 0x240   :  { %4822 = vmatmul.msk.f32.vlgmr.msra.gmra.mxu1 %vm143_vm0, %v439_v23 }
 0x248   :  { %4823 = vmatmul.msk.f32.gmra.mxu1 %vm143_vm0, %v440_v26 }
 0x296   :  { %v343_v27 = vpop.xlane.xlu2 %342 }
 0x297   :  { %v355_v28 = vmul.f32 %v343_v27, %v5676_v14 }
 0x299   :  { %v361_v29 = vadd.f32 1e-05, %v355_v28 }
 0x29b   :  { %5192 = vrsqrt.f32 %v361_v29  ;;  %vm391_vm4 = vweird.f32 %v361_v29 }
 0x29d   :  { %v201_v30 = vpop.xlane.xlu1 %200 }
 0x29e   :  { %v209_v31 = vmul.f32 %v201_v30, %v5676_v14  ;;  %v161_v32 = vpop.xlane.xlu2 %160 }
 0x29f   :  { %v174_v15 = vmul.f32 %v5676_v14, %v161_v32 }
 0x2a0   :  { %v215_v33 = vadd.f32 1e-05, %v209_v31 }
 0x2a1   :  { %v5193_v34 = vpop.eup %5192  ;;  %v5772_v35 = vsub.f32 %v136_v55, %v174_v15 }
 0x2a2   :  { %5194 = vrsqrt.f32 %v215_v33  ;;  %v386_v36 = vmul.f32 %v5193_v34, %v361_v29  ;;  %vm392_vm3 = vweird.f32 %v5193_v34  ;;  %vm263_vm6 = vweird.f32 %v215_v33 }
 0x2a3   :  { %v186_v37 = vmul.f32 %v5772_v35, %v5772_v35  ;;  %vm393_vm5 = vmor %vm391_vm4, %vm392_vm3 }
 0x2a4   :  { %v387_v38 = vmul.f32 %v5193_v34, %v386_v36 }
 0x2a5   :  { %v202_v39 = vsel %vm143_vm0, %v186_v37, 0.0 }
 0x2a6   :  { %v388_v40 = vmul.f32 0.5, %v387_v38  ;;  %203 = vadd.xlane.f32.xlu2 %v202_v39  ;;  %v198_v41 = vpop.xlane.xlu0 %197 }
 0x2a7   :  { %v208_v44 = vmul.f32 %v198_v41, %v5676_v14 }
 0x2a8   :  { %v5195_v42 = vpop.eup %5194  ;;  %v389_v45 = vsub.f32 1.5, %v388_v40 }
 0x2a9   :  { %v258_v46 = vmul.f32 %v5195_v42, %v215_v33  ;;  %v214_v47 = vadd.f32 1e-05, %v208_v44  ;;  %vm264_vm7 = vweird.f32 %v5195_v42 }
 0x2aa   :  { %v390_v49 = vmul.f32 %v5193_v34, %v389_v45  ;;  %vm265_vm8 = vmor %vm263_vm6, %vm264_vm7 }
 0x2ab   :  { %v259_v50 = vmul.f32 %v5195_v42, %v258_v46  ;;  %5196 = vrsqrt.f32 %v214_v47  ;;  %vm253_vm9 = vweird.f32 %v214_v47 }
 0x2ac   :  { %v394_v54 = vsel %vm393_vm5, %v5193_v34, %v390_v49 }
 0x2ad   :  { %v260_v51 = vmul.f32 0.5, %v259_v50  ;;  %v427_v55 = vmul.f32 %v394_v54, %v5736_v43 }
 0x2af   :  { %v261_v57 = vsub.f32 1.5, %v260_v51  ;;  %v434_v58 = vmul.f32 %v5758_v16, %v427_v55 }
 0x2b1   :  { %v262_v59 = vmul.f32 %v5195_v42, %v261_v57  ;;  %v5197_v17 = vpop.eup %5196  ;;  %v441_v60 = vadd.f32 %v5761_v20, %v434_v58 }
 0x2b2   :  { %v248_v61 = vmul.f32 %v5197_v17, %v214_v47  ;;  %vm254_vm10 = vweird.f32 %v5197_v17 }
 0x2b3   :  { %v266_v62 = vsel %vm265_vm8, %v5195_v42, %v262_v59  ;;  %4824 = vmatmul.msk.f32.gmra.mxu1 %vm143_vm0, %v441_v60  ;;  %vm255_vm11 = vmor %vm253_vm9, %vm254_vm10  ;;  %vm623_vm10 = vcmask 195584  }
 0x2b4   :  { %v281_v0 = vmul.f32 %v266_v62, %v5743_v53  ;;  %v249_v1 = vmul.f32 %v5197_v17, %v248_v61 }
 0x2b6   :  { %v288_v21 = vmul.f32 %v5693_v48, %v281_v0  ;;  %v250_v3 = vmul.f32 0.5, %v249_v1 }
 0x2b8   :  { %v5785_v43 = vadd.f32 %v5695_v52, %v288_v21  ;;  %v251_v4 = vsub.f32 1.5, %v250_v3 }
 0x2ba   :  { %v311_v5 = vsel %vm143_vm0, %v5785_v43, 0.0  ;;  %v252_v6 = vmul.f32 %v5197_v17, %v251_v4 }
 0x2bb   :  { %312 = vadd.xlane.f32.xlu1 %v311_v5 }
 0x2bc   :  { %v256_v7 = vsel %vm255_vm11, %v5197_v17, %v252_v6 }
 0x2bd   :  { %v280_v8 = vmul.f32 %v256_v7, %v5752_v2  ;;  %v486_v11 = vpop.f32.mrf.mxu1 }
 0x2bf   :  { %v287_v53 = vmul.f32 %v5693_v48, %v280_v8 }
 0x2c1   :  { %v5792_v9 = vadd.f32 %v5695_v52, %v287_v53 }
 0x2c3   :  { %v308_v10 = vsel %vm143_vm0, %v5792_v9, 0.0 }
 0x2c4   :  { %309 = vadd.xlane.f32.xlu0 %v308_v10 }
 0x2c5   :  { %v489_v12 = vpop.f32.mrf.mxu1 }
 0x2c6   :  { %v5799_v18 = vadd.f32 %v5796_v13, %v489_v12 }
 0x2c8   :  { %v5844_v3 = vmul.f32 0.35355338, %v5799_v18 }
 0x2d4   :  { %527 = vrot.lane.b32.xlu1 %v5799_v18, %s5617_s2 }
 0x319   :  { %v204_v2 = vpop.xlane.xlu2 %203 }
 0x31a   :  { %v210_v19 = vmul.f32 %v204_v2, %v5676_v14 }
 0x31c   :  { %v216_v23 = vadd.f32 1e-05, %v210_v19 }
 0x31e   :  { %5198 = vrsqrt.f32 %v216_v23  ;;  %vm273_vm13 = vweird.f32 %v216_v23 }
 0x324   :  { %v5199_v24 = vpop.eup %5198 }
 0x325   :  { %v268_v25 = vmul.f32 %v5199_v24, %v216_v23  ;;  %vm274_vm12 = vweird.f32 %v5199_v24 }
 0x326   :  { %vm275_vm14 = vmor %vm273_vm13, %vm274_vm12 }
 0x327   :  { %v269_v26 = vmul.f32 %v5199_v24, %v268_v25 }
 0x329   :  { %v270_v27 = vmul.f32 0.5, %v269_v26 }
 0x32b   :  { %v271_v28 = vsub.f32 1.5, %v270_v27 }
 0x32d   :  { %v272_v29 = vmul.f32 %v5199_v24, %v271_v28 }
 0x32f   :  { %v276_v30 = vsel %vm275_vm14, %v5199_v24, %v272_v29 }
 0x330   :  { %v492_v31 = vpop.f32.mrf.mxu1  ;;  %v282_v32 = vmul.f32 %v276_v30, %v5772_v35 }
 0x331   :  { %v5806_v33 = vadd.f32 %v5796_v13, %v492_v31 }
 0x332   :  { %v289_v15 = vmul.f32 %v5693_v48, %v282_v32  ;;  %v313_v48 = vpop.xlane.xlu1 %312 }
 0x333   :  { %529 = vrot.lane.b32.xlu0 %v5806_v33, %s5617_s2  ;;  %v321_v41 = vmul.f32 %v313_v48, %v5676_v14  ;;  %v5850_v8 = vmul.f32 0.35355338, %v5806_v33 }
 0x334   :  { %v5812_v34 = vadd.f32 %v5695_v52, %v289_v15  ;;  %v5822_v52 = vadd.f32 %v5796_v13, %v486_v11 }
 0x335   :  { %v327_v42 = vsub.f32 %v5785_v43, %v321_v41 }
 0x336   :  { %v314_v36 = vsel %vm143_vm0, %v5812_v34, 0.0  ;;  %v5839_v60 = vmul.f32 0.35355338, %v5822_v52 }
 0x337   :  { %315 = vadd.xlane.f32.xlu2 %v314_v36  ;;  %v310_v37 = vpop.xlane.xlu0 %309  ;;  %v333_v44 = vmul.f32 %v327_v42, %v327_v42 }
 0x338   :  { %v320_v38 = vmul.f32 %v310_v37, %v5676_v14 }
 0x339   :  { %v347_v45 = vsel %vm143_vm0, %v333_v44, 0.0 }
 0x33a   :  { %v326_v35 = vsub.f32 %v5792_v9, %v320_v38 }
 0x33c   :  { %v332_v39 = vmul.f32 %v326_v35, %v326_v35 }
 0x33e   :  { %v344_v40 = vsel %vm143_vm0, %v332_v39, 0.0 }
 0x33f   :  { %345 = vadd.xlane.f32.xlu2 %v344_v40 }
 0x346   :  { %v528_v47 = vpop.permute.xlu1 %527 }
 0x357   :  { %525 = vrot.lane.b32.xlu2 %v5822_v52, %s5617_s2 }
 0x35d   :  { %348 = vadd.xlane.f32.xlu0 %v347_v45 }
 0x3a5   :  { %v530_v46 = vpop.permute.xlu0 %529 }
 0x3a6   :  { %4828 = vmatpush.xpose.msk.msra.mxu2 %vm531_vm15, %v530_v46 }
 0x3aa   :  { %v316_v49 = vpop.xlane.xlu2 %315  ;;  %4829 = vmatpush.xpose.msk.msra.mxu2 %vm531_vm15, %v528_v47 }
 0x3ab   :  { %v322_v50 = vmul.f32 %v316_v49, %v5676_v14 }
 0x3ad   :  { %v5831_v51 = vsub.f32 %v5812_v34, %v322_v50 }
 0x3af   :  { %v334_v54 = vmul.f32 %v5831_v51, %v5831_v51 }
 0x3b1   :  { %v350_v55 = vsel %vm143_vm0, %v334_v54, 0.0 }
 0x3b2   :  { %v346_v57 = vpop.xlane.xlu2 %345  ;;  %351 = vadd.xlane.f32.xlu1 %v350_v55  ;;  %v5879_v55 = vpack.i.bf16 %v5799_v18, %v5806_v33 }
 0x3b3   :  { %v356_v58 = vmul.f32 %v346_v57, %v5676_v14 }
 0x3b5   :  { %v362_v59 = vadd.f32 1e-05, %v356_v58 }
 0x3b7   :  { %5200 = vrsqrt.f32 %v362_v59  ;;  %vm401_vm2 = vweird.f32 %v362_v59 }
 0x3ba   :  { %v526_v17 = vpop.permute.xlu2 %525 }
 0x3bb   :  { %4830 = vmatpush.xpose.msk.msra.mxu2 %vm531_vm15, %v526_v17 }
 0x3bd   :  { %v5201_v61 = vpop.eup %5200 }
 0x3be   :  { %v396_v62 = vmul.f32 %v5201_v61, %v362_v59  ;;  %4831 = vmatmul.msk.f32.vlgmr.msra.gmra.mxu2 %vm531_vm15, %v5839_v60  ;;  %vm402_vm1 = vweird.f32 %v5201_v61 }
 0x3bf   :  { %vm403_vm3 = vmor %vm401_vm2, %vm402_vm1 }
 0x3c0   :  { %v397_v0 = vmul.f32 %v5201_v61, %v396_v62 }
 0x3c2   :  { %v398_v1 = vmul.f32 0.5, %v397_v0 }
 0x3c4   :  { %v399_v21 = vsub.f32 1.5, %v398_v1 }
 0x3c6   :  { %v400_v4 = vmul.f32 %v5201_v61, %v399_v21  ;;  %4832 = vmatmul.msk.f32.gmra.mxu2 %vm531_vm15, %v5844_v3 }
 0x3c8   :  { %v404_v5 = vsel %vm403_vm3, %v5201_v61, %v400_v4 }
 0x3c9   :  { %v428_v6 = vmul.f32 %v404_v5, %v326_v35 }
 0x3cb   :  { %v435_v7 = vmul.f32 %v5758_v16, %v428_v6 }
 0x3cd   :  { %v442_v53 = vadd.f32 %v5761_v20, %v435_v7 }
 0x3ce   :  { %4833 = vmatmul.msk.f32.gmra.mxu2 %vm531_vm15, %v5850_v8 }
 0x3cf   :  { %4825 = vmatmul.msk.f32.gmra.mxu1 %vm143_vm0, %v442_v53 }
 0x3d0   :  { %v349_v10 = vpop.xlane.xlu0 %348 }
 0x3d1   :  { %v357_v11 = vmul.f32 %v349_v10, %v5676_v14 }
 0x3d3   :  { %v363_v12 = vadd.f32 1e-05, %v357_v11 }
 0x3d5   :  { %5202 = vrsqrt.f32 %v363_v12  ;;  %vm411_vm5 = vweird.f32 %v363_v12 }
 0x3db   :  { %v5203_v2 = vpop.eup %5202 }
 0x3dc   :  { %v406_v19 = vmul.f32 %v5203_v2, %v363_v12  ;;  %vm412_vm4 = vweird.f32 %v5203_v2 }
 0x3dd   :  { %vm413_vm6 = vmor %vm411_vm5, %vm412_vm4 }
 0x3de   :  { %v407_v23 = vmul.f32 %v5203_v2, %v406_v19 }
 0x3e0   :  { %v408_v24 = vmul.f32 0.5, %v407_v23 }
 0x3e2   :  { %v409_v25 = vsub.f32 1.5, %v408_v24 }
 0x3e4   :  { %v410_v26 = vmul.f32 %v5203_v2, %v409_v25 }
 0x3e6   :  { %v414_v27 = vsel %vm413_vm6, %v5203_v2, %v410_v26 }
 0x3e7   :  { %v429_v28 = vmul.f32 %v414_v27, %v327_v42 }
 0x3e9   :  { %v436_v29 = vmul.f32 %v5758_v16, %v429_v28 }
 0x3eb   :  { %v443_v30 = vadd.f32 %v5761_v20, %v436_v29 }
 0x3ed   :  { %4826 = vmatmul.msk.f32.gmra.mxu1 %vm143_vm0, %v443_v30 }
 0x425   :  { %v352_v31 = vpop.xlane.xlu1 %351 }
 0x426   :  { %v358_v32 = vmul.f32 %v352_v31, %v5676_v14 }
 0x428   :  { %v364_v15 = vadd.f32 1e-05, %v358_v32 }
 0x42a   :  { %5204 = vrsqrt.f32 %v364_v15  ;;  %vm421_vm8 = vweird.f32 %v364_v15 }
 0x430   :  { %v5205_v36 = vpop.eup %5204 }
 0x431   :  { %v416_v37 = vmul.f32 %v5205_v36, %v364_v15  ;;  %vm422_vm7 = vweird.f32 %v5205_v36 }
 0x432   :  { %vm423_vm9 = vmor %vm421_vm8, %vm422_vm7 }
 0x433   :  { %v417_v38 = vmul.f32 %v5205_v36, %v416_v37 }
 0x435   :  { %v418_v35 = vmul.f32 0.5, %v417_v38 }
 0x437   :  { %v419_v39 = vsub.f32 1.5, %v418_v35 }
 0x439   :  { %v420_v40 = vmul.f32 %v5205_v36, %v419_v39 }
 0x43b   :  { %v424_v48 = vsel %vm423_vm9, %v5205_v36, %v420_v40 }
 0x43c   :  { %v430_v41 = vmul.f32 %v424_v48, %v5831_v51 }
 0x43e   :  { %v437_v42 = vmul.f32 %v5758_v16, %v430_v41 }
 0x440   :  { %v444_v44 = vadd.f32 %v5761_v20, %v437_v42 }
 0x441   :  { %v564_v45 = vpop.f32.mrf.mxu2 }
 0x442   :  { %4827 = vmatmul.msk.f32.gmra.mxu1 %vm143_vm0, %v444_v44  ;;  %v624_v46 = vsel %vm623_vm10, %v564_v45, -inf }
 0x443   :  { %625 = vmax.xlane.f32.xlu2 %v624_v46 }
 0x449   :  { %v567_v51 = vpop.f32.mrf.mxu2 }
 0x44a   :  { %v627_v17 = vsel %vm623_vm10, %v567_v51, -inf }
 0x44c   :  { %v495_v47 = vpop.f32.mrf.mxu1 }
 0x44d   :  { %v5867_v49 = vadd.f32 %v5796_v13, %v495_v47 }
 0x44f   :  { %576 = vrot.lane.b32.xlu1 %v5867_v49, %s5617_s2  ;;  %v5904_v2 = vmul.f32 0.35355338, %v5867_v49 }
 0x451   :  { %v570_v20 = vpop.f32.mrf.mxu2 }
 0x452   :  { %v630_v54 = vsel %vm623_vm10, %v570_v20, -inf }
 0x46a   :  { %v498_v50 = vpop.f32.mrf.mxu1 }
 0x46b   :  { %v5872_v16 = vadd.f32 %v5796_v13, %v498_v50 }
 0x46d   :  { %578 = vrot.lane.b32.xlu2 %v5872_v16, %s5617_s2  ;;  %v5911_v23 = vmul.f32 0.35355338, %v5872_v16 }
 0x479   :  { %631 = vmax.xlane.f32.xlu1 %v630_v54 }
 0x492   :  { %5073 = vrot.lane.b32.xlu1 %v5879_v55, %s5618_s4 }
 0x4bf   :  { %v501_v57 = vpop.f32.mrf.mxu1 }
 0x4c0   :  { %v5884_v58 = vadd.f32 %v5796_v13, %v501_v57  ;;  %v626_v13 = vpop.xlane.xlu2 %625 }
 0x4c1   :  { %v577_v59 = vpop.permute.xlu1 %576  ;;  %v642_v4 = vsub.f32 %v564_v45, %v626_v13 }
 0x4c2   :  { %580 = vrot.lane.b32.xlu0 %v5884_v58, %s5617_s2  ;;  %v5918_v24 = vmul.f32 0.35355338, %v5884_v58 }
 0x4c3   :  { %v648_v5 = vmul.f32 1.442695, %v642_v4 }
 0x4c8   :  { %v579_v10 = vpop.permute.xlu2 %578 }
 0x4ec   :  { %628 = vmax.xlane.f32.xlu0 %v627_v17  ;;  %v632_v61 = vpop.xlane.xlu1 %631 }
 0x4ed   :  { %v644_v62 = vsub.f32 %v570_v20, %v632_v61 }
 0x4ef   :  { %v652_v0 = vmul.f32 1.442695, %v644_v62 }
 0x4f1   :  { %5206 = vpow2.f32 %v652_v0 }
 0x4f2   :  { %5208 = vpow2.f32 %v648_v5 }
 0x4f7   :  { %v5889_v1 = vpop.eup %5206 }
 0x4f8   :  { %v666_v21 = vsel %vm623_vm10, %v5889_v1, 0.0  ;;  %v5209_v6 = vpop.eup %5208 }
 0x4f9   :  { %667 = vadd.xlane.f32.xlu1 %v666_v21  ;;  %v660_v7 = vsel %vm623_vm10, %v5209_v6, 0.0 }
 0x500   :  { %768 = vrot.lane.b32.xlu0 %v5822_v52, %s5618_s4 }
 0x504   :  { %v5074_v11 = vpop.permute.xlu1 %5073 }
 0x505   :  { %v5075_v12 = vunpack.i.l.bf16 %v5074_v11  ;;  %v5076_v19 = vunpack.i.h.bf16 %v5074_v11 }
 0x512   :  { %923 = vrot.lane.b32.xlu1 %v5799_v18, %s5619_s17 }
 0x52a   :  { %661 = vadd.xlane.f32.xlu0 %v660_v7 }
 0x534   :  { %v581_v53 = vpop.permute.xlu0 %580 }
 0x535   :  { %4834 = vmatpush.xpose.msk.msrb.mxu0 %vm531_vm15, %v581_v53 }
 0x539   :  { %4835 = vmatpush.xpose.msk.msrb.mxu0 %vm531_vm15, %v579_v10 }
 0x53d   :  { %4836 = vmatpush.xpose.msk.msrb.mxu0 %vm531_vm15, %v577_v59  ;;  %v5949_v59 = vpack.i.bf16 %v5872_v16, %v5884_v58 }
 0x53e   :  { %921 = vrot.lane.b32.xlu0 %v5822_v52, %s5619_s17 }
 0x540   :  { %4837 = vmatmul.msk.f32.vlgmr.msrb.gmra.mxu0 %vm531_vm15, %v5904_v2 }
 0x541   :  { %799 = vmatpush.msra.mxu0 %v5075_v12 }
 0x543   :  { %800 = vmatpush.msra.mxu0 %v5076_v19 }
 0x546   :  { %915 = vrot.lane.b32.xlu0 %v5839_v60, %s5620_s18 }
 0x548   :  { %4838 = vmatmul.msk.f32.gmra.mxu0 %vm531_vm15, %v5911_v23 }
 0x54e   :  { %919 = vrot.lane.b32.xlu0 %v5850_v8, %s5620_s18 }
 0x550   :  { %4839 = vmatmul.msk.f32.gmra.mxu0 %vm531_vm15, %v5918_v24 }
 0x55f   :  { %v629_v25 = vpop.xlane.xlu0 %628 }
 0x560   :  { %v643_v26 = vsub.f32 %v567_v51, %v629_v25 }
 0x562   :  { %v650_v27 = vmul.f32 1.442695, %v643_v26 }
 0x564   :  { %5210 = vpow2.f32 %v650_v27 }
 0x56a   :  { %v5922_v28 = vpop.eup %5210 }
 0x56b   :  { %v663_v29 = vsel %vm623_vm10, %v5922_v28, 0.0 }
 0x56c   :  { %664 = vadd.xlane.f32.xlu2 %v663_v29  ;;  %v668_v20 = vpop.xlane.xlu1 %667 }
 0x56d   :  { %v719_v27 = vand.u32 2147483648, %v668_v20  ;;  %vm713_vm6 = vweird.f32 %v668_v20 }
 0x572   :  { %v769_v30 = vpop.permute.xlu0 %768 }
 0x573   :  { %801 = vmatpush.msra.mxu0 %v769_v30  ;;  %v717_v30 = vand.u32 2147483647, %v668_v20 }
 0x575   :  { %vm718_vm8 = vcmp.eq.f32.partialorder %v717_v30, 8.507059e+37 }
 0x584   :  { %925 = vrot.lane.b32.xlu2 %v5806_v33, %s5619_s17  ;;  %v924_v5 = vpop.permute.xlu1 %923 }
 0x58c   :  { %917 = vrot.lane.b32.xlu2 %v5844_v3, %s5620_s18 }
 0x59d   :  { %v662_v31 = vpop.xlane.xlu0 %661 }
 0x59e   :  { %5212 = vrcp.f32 %v662_v31  ;;  %v689_v37 = vand.u32 2147483648, %v662_v31  ;;  %v687_v35 = vand.u32 2147483647, %v662_v31  ;;  %vm683_vm12 = vweird.f32 %v662_v31 }
 0x59f   :  { %5214 = vrcp.f32 %v668_v20 }
 0x5a0   :  { %v690_v40 = vor.u32 1.1754944e-38, %v689_v37  ;;  %vm688_vm14 = vcmp.eq.f32.partialorder %v687_v35, 8.507059e+37 }
 0x5a4   :  { %v5213_v32 = vpop.eup %5212 }
 0x5a5   :  { %v679_v15 = vmul.f32 %v5213_v32, %v662_v31  ;;  %vm684_vm11 = vweird.f32 %v5213_v32  ;;  %v5215_v57 = vpop.eup %5214 }
 0x5a6   :  { %vm685_vm13 = vmor %vm683_vm12, %vm684_vm11  ;;  %v709_v17 = vmul.f32 %v5215_v57, %v668_v20  ;;  %vm714_vm5 = vweird.f32 %v5215_v57 }
 0x5a7   :  { %v680_v36 = vsub.f32 1.0, %v679_v15  ;;  %vm715_vm7 = vmor %vm713_vm6, %vm714_vm5 }
 0x5a8   :  { %v710_v62 = vsub.f32 1.0, %v709_v17 }
 0x5a9   :  { %v681_v38 = vmul.f32 %v5213_v32, %v680_v36 }
 0x5aa   :  { %v711_v53 = vmul.f32 %v5215_v57, %v710_v62 }
 0x5ab   :  { %v682_v39 = vadd.f32 %v5213_v32, %v681_v38 }
 0x5ac   :  { %v712_v25 = vadd.f32 %v5215_v57, %v711_v53 }
 0x5ad   :  { %v686_v48 = vsel %vm685_vm13, %v5213_v32, %v682_v39  ;;  %v720_v32 = vor.u32 1.1754944e-38, %v719_v27 }
 0x5ae   :  { %v691_v41 = vsel %vm688_vm14, %v690_v40, %v686_v48  ;;  %v716_v31 = vsel %vm715_vm7, %v5215_v57, %v712_v25 }
 0x5af   :  { %v692_v42 = vmul.f32 %v5209_v6, %v691_v41  ;;  %v721_v15 = vsel %vm718_vm8, %v720_v32, %v716_v31 }
 0x5b0   :  { %v922_v12 = vpop.permute.xlu0 %921  ;;  %v722_v36 = vmul.f32 %v5889_v1, %v721_v15 }
 0x5b1   :  { %4840 = vmatmul.msk.f32.vlgmr.msra.gmra.mxu0 %vm623_vm10, %v692_v42 }
 0x5b8   :  { %v916_v37 = vpop.permute.xlu0 %915 }
 0x5bd   :  { %v5931_v44 = vpop.f32.mrf.mxu0 }
 0x5be   :  { %v633_v45 = vsel %vm623_vm10, %v5931_v44, -inf }
 0x5bf   :  { %634 = vmax.xlane.f32.xlu2 %v633_v45 }
 0x5c0   :  { %v920_v35 = vpop.permute.xlu0 %919 }
 0x5c5   :  { %v5935_v46 = vpop.f32.mrf.mxu0 }
 0x5c6   :  { %v636_v47 = vsel %vm623_vm10, %v5935_v46, -inf }
 0x5c7   :  { %637 = vmax.xlane.f32.xlu1 %v636_v47 }
 0x5cd   :  { %v5939_v50 = vpop.f32.mrf.mxu0 }
 0x5ce   :  { %v639_v51 = vsel %vm623_vm10, %v5939_v50, -inf }
 0x5cf   :  { %640 = vmax.xlane.f32.xlu0 %v639_v51 }
 0x5d7   :  { %975 = vrot.lane.b32.xlu2 %v5884_v58, %s5619_s17 }
 0x5df   :  { %v665_v54 = vpop.xlane.xlu2 %664 }
 0x5e0   :  { %5216 = vrcp.f32 %v665_v54  ;;  %812 = vrot.lane.b32.xlu1 %v5867_v49, %s5618_s4  ;;  %v704_v4 = vand.u32 2147483648, %v665_v54  ;;  %v702_v7 = vand.u32 2147483647, %v665_v54  ;;  %vm698_vm2 = vweird.f32 %v665_v54 }
 0x5e2   :  { %v705_v11 = vor.u32 1.1754944e-38, %v704_v4  ;;  %vm703_vm4 = vcmp.eq.f32.partialorder %v702_v7, 8.507059e+37 }
 0x5e3   :  { %5078 = vrot.lane.b32.xlu0 %v5949_v59, %s5618_s4 }
 0x5e6   :  { %v5217_v61 = vpop.eup %5216 }
 0x5e7   :  { %v694_v0 = vmul.f32 %v5217_v61, %v665_v54  ;;  %v926_v21 = vpop.permute.xlu2 %925  ;;  %vm699_vm1 = vweird.f32 %v5217_v61 }
 0x5e8   :  { %4852 = vmatpush.xpose.msk.msrb.mxu0 %vm531_vm15, %v926_v21  ;;  %vm700_vm3 = vmor %vm698_vm2, %vm699_vm1 }
 0x5e9   :  { %v695_v13 = vsub.f32 1.0, %v694_v0 }
 0x5eb   :  { %v696_v6 = vmul.f32 %v5217_v61, %v695_v13 }
 0x5ec   :  { %4853 = vmatpush.xpose.msk.msrb.mxu0 %vm531_vm15, %v924_v5 }
 0x5ed   :  { %v697_v10 = vadd.f32 %v5217_v61, %v696_v6 }
 0x5ef   :  { %v701_v19 = vsel %vm700_vm3, %v5217_v61, %v697_v10  ;;  %v918_v38 = vpop.permute.xlu2 %917 }
 0x5f0   :  { %4854 = vmatpush.xpose.msk.msrb.mxu0 %vm531_vm15, %v922_v12  ;;  %v706_v26 = vsel %vm703_vm4, %v705_v11, %v701_v19 }
 0x5f1   :  { %v707_v29 = vmul.f32 %v5922_v28, %v706_v26  ;;  %v504_v28 = vld [vmem:[#allocation6 + $0x20] sm:$0xff] }
 0x5f2   :  { %889 = vmatpush.msra.mxu3 %v504_v28 }
 0x5f3   :  { %4841 = vmatmul.msk.f32.gmra.mxu0 %vm623_vm10, %v707_v29 }
 0x5fb   :  { %4842 = vmatmul.msk.f32.gmra.mxu0 %vm623_vm10, %v722_v36 }
 0x603   :  { %4855 = vmatmul.msk.f32.vlgmr.msrb.gmra.mxu0 %vm531_vm15, %v916_v37 }
 0x60b   :  { %4856 = vmatmul.msk.f32.gmra.mxu0 %vm531_vm15, %v918_v38 }
 0x613   :  { %4857 = vmatmul.msk.f32.gmra.mxu0 %vm531_vm15, %v920_v35 }
 0x62e   :  { %v803_v39 = vpop.f32.mrf.mxu0 }
 0x62f   :  { %4846 = vmatmul.msk.f32.vlgmr.msra.gmra.mxu3 %vm531_vm15, %v803_v39 }
 0x632   :  { %v635_v40 = vpop.xlane.xlu2 %634 }
 0x633   :  { %v645_v48 = vsub.f32 %v5931_v44, %v635_v40 }
 0x635   :  { %v654_v1 = vmul.f32 1.442695, %v645_v48 }
 0x637   :  { %5218 = vpow2.f32 %v654_v1 }
 0x63a   :  { %v976_v41 = vpop.permute.xlu2 %975  ;;  %v638_v42 = vpop.xlane.xlu1 %637 }
 0x63b   :  { %v646_v45 = vsub.f32 %v5935_v46, %v638_v42  ;;  %4858 = vmatpush.xpose.msk.msrb.mxu1 %vm531_vm15, %v976_v41 }
 0x63d   :  { %v5967_v47 = vpop.eup %5218  ;;  %v656_v51 = vmul.f32 1.442695, %v646_v45 }
 0x63e   :  { %v669_v20 = vsel %vm623_vm10, %v5967_v47, 0.0 }
 0x63f   :  { %5220 = vpow2.f32 %v656_v51  ;;  %670 = vadd.xlane.f32.xlu2 %v669_v20 }
 0x642   :  { %v641_v54 = vpop.xlane.xlu0 %640 }
 0x643   :  { %v647_v57 = vsub.f32 %v5939_v50, %v641_v54 }
 0x645   :  { %v5972_v44 = vpop.eup %5220  ;;  %v658_v17 = vmul.f32 1.442695, %v647_v57 }
 0x646   :  { %v672_v61 = vsel %vm623_vm10, %v5972_v44, 0.0 }
 0x647   :  { %5222 = vpow2.f32 %v658_v17  ;;  %673 = vadd.xlane.f32.xlu1 %v672_v61 }
 0x64d   :  { %v5976_v46 = vpop.eup %5222 }
 0x64e   :  { %v675_v62 = vsel %vm623_vm10, %v5976_v46, 0.0 }
 0x64f   :  { %676 = vadd.xlane.f32.xlu2 %v675_v62 }
 0x652   :  { %v813_v50 = vpop.permute.xlu1 %812 }
 0x655   :  { %v5079_v0 = vpop.permute.xlu0 %5078 }
 0x656   :  { %v5080_v21 = vunpack.i.l.bf16 %v5079_v0  ;;  %v5081_v13 = vunpack.i.h.bf16 %v5079_v0 }
 0x658   :  { %843 = vmatpush.msrb.mxu2 %v5080_v21 }
 0x65a   :  { %844 = vmatpush.msrb.mxu2 %v5081_v13 }
 0x65c   :  { %845 = vmatpush.msrb.mxu2 %v813_v50 }
 0x670   :  { %v806_v4 = vpop.f32.mrf.mxu0 }
 0x671   :  { %4847 = vmatmul.msk.f32.gmra.mxu3 %vm531_vm15, %v806_v4 }
 0x678   :  { %v809_v5 = vpop.f32.mrf.mxu0 }
 0x679   :  { %4848 = vmatmul.msk.f32.gmra.mxu3 %vm531_vm15, %v809_v5 }
 0x680   :  { %v5982_v6 = vpop.f32.mrf.mxu0 }
 0x681   :  { %v1015_v7 = vsel %vm623_vm10, %v5982_v6, -inf }
 0x682   :  { %1016 = vmax.xlane.f32.xlu2 %v1015_v7 }
 0x688   :  { %v5986_v53 = vpop.f32.mrf.mxu0 }
 0x689   :  { %v1018_v10 = vsel %vm623_vm10, %v5986_v53, -inf }
 0x68a   :  { %1019 = vmax.xlane.f32.xlu1 %v1018_v10 }
 0x690   :  { %v5990_v11 = vpop.f32.mrf.mxu0 }
 0x691   :  { %v1021_v12 = vsel %vm623_vm10, %v5990_v11, -inf }
 0x692   :  { %1022 = vmax.xlane.f32.xlu0 %v1021_v12 }
 0x69a   :  { %5083 = vrot.lane.b32.xlu2 %v5879_v55, %s5621_s19 }
 0x6a3   :  { %971 = vrot.lane.b32.xlu1 %v5867_v49, %s5619_s17 }
 0x6a6   :  { %973 = vrot.lane.b32.xlu0 %v5872_v16, %s5619_s17 }
 0x6ab   :  { %965 = vrot.lane.b32.xlu1 %v5904_v2, %s5620_s18 }
 0x6b2   :  { %v671_v19 = vpop.xlane.xlu2 %670 }
 0x6b3   :  { %5224 = vrcp.f32 %v671_v19  ;;  %v734_v30 = vand.u32 2147483648, %v671_v19  ;;  %v732_v32 = vand.u32 2147483647, %v671_v19  ;;  %vm728_vm11 = vweird.f32 %v671_v19 }
 0x6b5   :  { %v735_v37 = vor.u32 1.1754944e-38, %v734_v30  ;;  %vm733_vm13 = vcmp.eq.f32.partialorder %v732_v32, 8.507059e+37 }
 0x6b9   :  { %v5225_v25 = vpop.eup %5224 }
 0x6ba   :  { %v724_v26 = vmul.f32 %v5225_v25, %v671_v19  ;;  %v674_v27 = vpop.xlane.xlu1 %673  ;;  %vm729_vm9 = vweird.f32 %v5225_v25 }
 0x6bb   :  { %5226 = vrcp.f32 %v674_v27  ;;  %vm730_vm12 = vmor %vm728_vm11, %vm729_vm9  ;;  %v749_v1 = vand.u32 2147483648, %v674_v27  ;;  %v747_v42 = vand.u32 2147483647, %v674_v27  ;;  %vm743_vm1 = vweird.f32 %v674_v27 }
 0x6bc   :  { %v725_v29 = vsub.f32 1.0, %v724_v26 }
 0x6bd   :  { %v750_v20 = vor.u32 1.1754944e-38, %v749_v1  ;;  %vm748_vm3 = vcmp.eq.f32.partialorder %v747_v42, 8.507059e+37 }
 0x6be   :  { %v726_v31 = vmul.f32 %v5225_v25, %v725_v29 }
 0x6c0   :  { %v727_v15 = vadd.f32 %v5225_v25, %v726_v31 }
 0x6c1   :  { %v5227_v36 = vpop.eup %5226 }
 0x6c2   :  { %v739_v38 = vmul.f32 %v5227_v36, %v674_v27  ;;  %v677_v28 = vpop.xlane.xlu2 %676  ;;  %v731_v35 = vsel %vm730_vm12, %v5225_v25, %v727_v15  ;;  %vm744_vm14 = vweird.f32 %v5227_v36 }
 0x6c3   :  { %5228 = vrcp.f32 %v677_v28  ;;  %v736_v39 = vsel %vm733_vm13, %v735_v37, %v731_v35  ;;  %vm745_vm2 = vmor %vm743_vm1, %vm744_vm14  ;;  %v764_v0 = vand.u32 2147483648, %v677_v28  ;;  %v762_v21 = vand.u32 2147483647, %v677_v28 }
 0x6c4   :  { %v740_v40 = vsub.f32 1.0, %v739_v38  ;;  %v737_v48 = vmul.f32 %v5967_v47, %v736_v39  ;;  %vm758_vm5 = vweird.f32 %v677_v28 }
 0x6c5   :  { %v765_v50 = vor.u32 1.1754944e-38, %v764_v0  ;;  %vm763_vm7 = vcmp.eq.f32.partialorder %v762_v21, 8.507059e+37 }
 0x6c6   :  { %4843 = vmatmul.msk.f32.vlgmr.msrb.gmra.mxu2 %vm623_vm10, %v737_v48  ;;  %v741_v41 = vmul.f32 %v5227_v36, %v740_v40 }
 0x6c8   :  { %v742_v45 = vadd.f32 %v5227_v36, %v741_v41 }
 0x6c9   :  { %v5229_v51 = vpop.eup %5228 }
 0x6ca   :  { %v754_v54 = vmul.f32 %v5229_v51, %v677_v28  ;;  %v746_v57 = vsel %vm745_vm2, %v5227_v36, %v742_v45  ;;  %vm759_vm4 = vweird.f32 %v5229_v51 }
 0x6cb   :  { %v751_v17 = vsel %vm748_vm3, %v750_v20, %v746_v57  ;;  %vm760_vm6 = vmor %vm758_vm5, %vm759_vm4 }
 0x6cc   :  { %v755_v61 = vsub.f32 1.0, %v754_v54  ;;  %v752_v62 = vmul.f32 %v5972_v44, %v751_v17 }
 0x6ce   :  { %4844 = vmatmul.msk.f32.gmra.mxu2 %vm623_vm10, %v752_v62  ;;  %v756_v47 = vmul.f32 %v5229_v51, %v755_v61 }
 0x6d0   :  { %v757_v13 = vadd.f32 %v5229_v51, %v756_v47 }
 0x6d2   :  { %v761_v4 = vsel %vm760_vm6, %v5229_v51, %v757_v13 }
 0x6d3   :  { %v766_v5 = vsel %vm763_vm7, %v765_v50, %v761_v4 }
 0x6d4   :  { %v767_v7 = vmul.f32 %v5976_v46, %v766_v5 }
 0x6d6   :  { %4845 = vmatmul.msk.f32.gmra.mxu2 %vm623_vm10, %v767_v7 }
 0x6f5   :  { %v1017_v10 = vpop.xlane.xlu2 %1016 }
 0x6f6   :  { %v1033_v44 = vsub.f32 %v5982_v6, %v1017_v10 }
 0x6f8   :  { %v1039_v12 = vmul.f32 1.442695, %v1033_v44 }
 0x6fa   :  { %5230 = vpow2.f32 %v1039_v12 }
 0x6fd   :  { %v5084_v19 = vpop.permute.xlu2 %5083  ;;  %v1020_v25 = vpop.xlane.xlu1 %1019 }
 0x6fe   :  { %v5085_v26 = vunpack.i.l.bf16 %v5084_v19  ;;  %v1034_v27 = vsub.f32 %v5986_v53, %v1020_v25  ;;  %v5086_v30 = vunpack.i.h.bf16 %v5084_v19 }
 0x700   :  { %v6010_v29 = vpop.eup %5230  ;;  %v1041_v31 = vmul.f32 1.442695, %v1034_v27  ;;  %1190 = vmatpush.msra.mxu2 %v5085_v26 }
 0x701   :  { %v1051_v46 = vsel %vm623_vm10, %v6010_v29, 0.0 }
 0x702   :  { %5232 = vpow2.f32 %v1041_v31  ;;  %1052 = vadd.xlane.f32.xlu2 %v1051_v46  ;;  %1191 = vmatpush.msra.mxu2 %v5086_v30 }
 0x705   :  { %v1023_v32 = vpop.xlane.xlu0 %1022 }
 0x706   :  { %v1035_v6 = vsub.f32 %v5990_v11, %v1023_v32 }
 0x708   :  { %v6015_v15 = vpop.eup %5232  ;;  %v1043_v36 = vmul.f32 1.442695, %v1035_v6 }
 0x709   :  { %v1054_v53 = vsel %vm623_vm10, %v6015_v15, 0.0 }
 0x70a   :  { %5234 = vpow2.f32 %v1043_v36  ;;  %1055 = vadd.xlane.f32.xlu0 %v1054_v53 }
 0x710   :  { %v6019_v37 = vpop.eup %5234 }
 0x711   :  { %v1057_v38 = vsel %vm623_vm10, %v6019_v37, 0.0 }
 0x712   :  { %1058 = vadd.xlane.f32.xlu1 %v1057_v38 }
 0x715   :  { %v972_v28 = vpop.permute.xlu1 %971 }
 0x718   :  { %v974_v35 = vpop.permute.xlu0 %973 }
 0x719   :  { %4859 = vmatpush.xpose.msk.msrb.mxu1 %vm531_vm15, %v974_v35 }
 0x71a   :  { %1159 = vrot.lane.b32.xlu2 %v5822_v52, %s5621_s19 }
 0x71d   :  { %4860 = vmatpush.xpose.msk.msrb.mxu1 %vm531_vm15, %v972_v28  ;;  %v966_v11 = vpop.permute.xlu1 %965 }
 0x71e   :  { %1316 = vrot.lane.b32.xlu0 %v5806_v33, %s5622_s20 }
 0x720   :  { %4861 = vmatmul.msk.f32.vlgmr.msrb.gmra.mxu1 %vm531_vm15, %v966_v11 }
 0x722   :  { %967 = vrot.lane.b32.xlu2 %v5911_v23, %s5620_s18 }
 0x726   :  { %1308 = vrot.lane.b32.xlu0 %v5844_v3, %s5623_s21 }
 0x72a   :  { %969 = vrot.lane.b32.xlu2 %v5918_v24, %s5620_s18 }
 0x732   :  { %1314 = vrot.lane.b32.xlu2 %v5799_v18, %s5622_s20 }
 0x73a   :  { %1312 = vrot.lane.b32.xlu2 %v5822_v52, %s5622_s20 }
 0x742   :  { %1306 = vrot.lane.b32.xlu2 %v5839_v60, %s5623_s21 }
 0x749   :  { %v847_v39 = vpop.f32.mrf.mxu2 }
 0x74a   :  { %4849 = vmatmul.msk.f32.gmra.mxu3 %vm531_vm15, %v847_v39 }
 0x751   :  { %v850_v40 = vpop.f32.mrf.mxu2 }
 0x752   :  { %4850 = vmatmul.msk.f32.gmra.mxu3 %vm531_vm15, %v850_v40 }
 0x759   :  { %v853_v48 = vpop.f32.mrf.mxu2 }
 0x75a   :  { %4851 = vmatmul.msk.f32.gmra.mxu3 %vm531_vm15, %v853_v48 }
 0x775   :  { %v1053_v1 = vpop.xlane.xlu2 %1052 }
 0x776   :  { %5236 = vrcp.f32 %v1053_v1  ;;  %v1080_v54 = vand.u32 2147483648, %v1053_v1  ;;  %v1078_v17 = vand.u32 2147483647, %v1053_v1  ;;  %vm1074_vm9 = vweird.f32 %v1053_v1 }
 0x778   :  { %v1081_v0 = vor.u32 1.1754944e-38, %v1080_v54  ;;  %vm1079_vm12 = vcmp.eq.f32.partialorder %v1078_v17, 8.507059e+37 }
 0x77c   :  { %v5237_v41 = vpop.eup %5236 }
 0x77d   :  { %v1070_v42 = vmul.f32 %v5237_v41, %v1053_v1  ;;  %v1160_v45 = vpop.permute.xlu2 %1159  ;;  %v1056_v51 = vpop.xlane.xlu0 %1055  ;;  %vm1075_vm8 = vweird.f32 %v5237_v41 }
 0x77e   :  { %5238 = vrcp.f32 %v1056_v51  ;;  %1192 = vmatpush.msra.mxu2 %v1160_v45  ;;  %vm1076_vm11 = vmor %vm1074_vm9, %vm1075_vm8  ;;  %v1095_v10 = vand.u32 2147483648, %v1056_v51  ;;  %v1093_v12 = vand.u32 2147483647, %v1056_v51  ;;  %vm1089_vm14 = vweird.f32 %v1056_v51 }
 0x77f   :  { %v1071_v20 = vsub.f32 1.0, %v1070_v42 }
 0x780   :  { %v1096_v26 = vor.u32 1.1754944e-38, %v1095_v10  ;;  %vm1094_vm2 = vcmp.eq.f32.partialorder %v1093_v12, 8.507059e+37 }
 0x781   :  { %v1072_v57 = vmul.f32 %v5237_v41, %v1071_v20 }
 0x783   :  { %v1073_v61 = vadd.f32 %v5237_v41, %v1072_v57 }
 0x784   :  { %v5239_v62 = vpop.eup %5238 }
 0x785   :  { %v1077_v47 = vsel %vm1076_vm11, %v5237_v41, %v1073_v61  ;;  %v1085_v21 = vmul.f32 %v5239_v62, %v1056_v51  ;;  %v968_v13 = vpop.permute.xlu2 %967  ;;  %v1059_v50 = vpop.xlane.xlu1 %1058  ;;  %vm1090_vm13 = vweird.f32 %v5239_v62  ;;  %v505_v51 = vld [vmem:[#allocation6 + $0x28] sm:$0xff] }
 0x786   :  { %5240 = vrcp.f32 %v1059_v50  ;;  %4862 = vmatmul.msk.f32.gmra.mxu1 %vm531_vm15, %v968_v13  ;;  %v1082_v4 = vsel %vm1079_vm12, %v1081_v0, %v1077_v47  ;;  %vm1091_vm1 = vmor %vm1089_vm14, %vm1090_vm13  ;;  %v1110_v36 = vand.u32 2147483648, %v1059_v50  ;;  %v1108_v38 = vand.u32 2147483647, %v1059_v50 }
 0x787   :  { %v1086_v5 = vsub.f32 1.0, %v1085_v21  ;;  %v1083_v7 = vmul.f32 %v6010_v29, %v1082_v4  ;;  %vm1104_vm4 = vweird.f32 %v1059_v50  ;;  %1280 = vmatpush.msra.mxu1 %v505_v51 }
 0x788   :  { %v1111_v35 = vor.u32 1.1754944e-38, %v1110_v36  ;;  %vm1109_vm6 = vcmp.eq.f32.partialorder %v1108_v38, 8.507059e+37 }
 0x789   :  { %4864 = vmatmul.msk.f32.vlgmr.msra.gmra.mxu2 %vm623_vm10, %v1083_v7  ;;  %v1087_v44 = vmul.f32 %v5239_v62, %v1086_v5 }
 0x78b   :  { %v1088_v19 = vadd.f32 %v5239_v62, %v1087_v44 }
 0x78c   :  { %v5241_v25 = vpop.eup %5240 }
 0x78d   :  { %v1100_v27 = vmul.f32 %v5241_v25, %v1059_v50  ;;  %v970_v30 = vpop.permute.xlu2 %969  ;;  %v1092_v31 = vsel %vm1091_vm1, %v5239_v62, %v1088_v19  ;;  %vm1105_vm3 = vweird.f32 %v5241_v25 }
 0x78e   :  { %4863 = vmatmul.msk.f32.gmra.mxu1 %vm531_vm15, %v970_v30  ;;  %v1097_v46 = vsel %vm1094_vm2, %v1096_v26, %v1092_v31  ;;  %vm1106_vm5 = vmor %vm1104_vm4, %vm1105_vm3 }
 0x78f   :  { %v1101_v32 = vsub.f32 1.0, %v1100_v27  ;;  %v1098_v29 = vmul.f32 %v6015_v15, %v1097_v46 }
 0x790   :  { %v1317_v6 = vpop.permute.xlu0 %1316 }
 0x791   :  { %4865 = vmatmul.msk.f32.gmra.mxu2 %vm623_vm10, %v1098_v29  ;;  %v1102_v53 = vmul.f32 %v5241_v25, %v1101_v32 }
 0x792   :  { %4876 = vmatpush.xpose.msk.msrb.mxu2 %vm531_vm15, %v1317_v6 }
 0x793   :  { %v1103_v28 = vadd.f32 %v5241_v25, %v1102_v53 }
 0x795   :  { %v1315_v11 = vpop.permute.xlu2 %1314  ;;  %v1107_v39 = vsel %vm1106_vm5, %v5241_v25, %v1103_v28 }
 0x796   :  { %4877 = vmatpush.xpose.msk.msrb.mxu2 %vm531_vm15, %v1315_v11  ;;  %v1112_v40 = vsel %vm1109_vm6, %v1111_v35, %v1107_v39 }
 0x797   :  { %v1113_v15 = vmul.f32 %v6019_v37, %v1112_v40 }
 0x798   :  { %v1309_v45 = vpop.permute.xlu0 %1308 }
 0x799   :  { %4866 = vmatmul.msk.f32.gmra.mxu2 %vm623_vm10, %v1113_v15 }
 0x79d   :  { %v1313_v48 = vpop.permute.xlu2 %1312  ;;  %v1006_v1 = vpop.f32.mrf.mxu1 }
 0x79e   :  { %4878 = vmatpush.xpose.msk.msrb.mxu2 %vm531_vm15, %v1313_v48  ;;  %v1024_v41 = vsel %vm623_vm10, %v1006_v1, -inf }
 0x79f   :  { %1025 = vmax.xlane.f32.xlu1 %v1024_v41 }
 0x7a5   :  { %v1307_v42 = vpop.permute.xlu2 %1306 }
 0x7a6   :  { %4879 = vmatmul.msk.f32.vlgmr.msrb.gmra.mxu2 %vm531_vm15, %v1307_v42 }
 0x7ae   :  { %4880 = vmatmul.msk.f32.gmra.mxu2 %vm531_vm15, %v1309_v45 }
 0x803   :  { %v1009_v20 = vpop.f32.mrf.mxu1 }
 0x804   :  { %v1027_v37 = vsel %vm623_vm10, %v1009_v20, -inf }
 0x805   :  { %1028 = vmax.xlane.f32.xlu2 %v1027_v37 }
 0x80b   :  { %v1012_v54 = vpop.f32.mrf.mxu1 }
 0x80c   :  { %v1194_v57 = vpop.f32.mrf.mxu2  ;;  %v1030_v17 = vsel %vm623_vm10, %v1012_v54, -inf }
 0x80d   :  { %4870 = vmatmul.msk.f32.vlgmr.msra.gmra.mxu1 %vm531_vm15, %v1194_v57  ;;  %1031 = vmax.xlane.f32.xlu0 %v1030_v17 }
 0x812   :  { %v1026_v61 = vpop.xlane.xlu1 %1025 }
 0x813   :  { %v1036_v62 = vsub.f32 %v1006_v1, %v1026_v61 }
 0x814   :  { %v1197_v0 = vpop.f32.mrf.mxu2 }
 0x815   :  { %v1045_v47 = vmul.f32 1.442695, %v1036_v62  ;;  %4871 = vmatmul.msk.f32.gmra.mxu1 %vm531_vm15, %v1197_v0 }
 0x817   :  { %5242 = vpow2.f32 %v1045_v47 }
 0x81c   :  { %v1200_v21 = vpop.f32.mrf.mxu2 }
 0x81d   :  { %v6063_v13 = vpop.eup %5242  ;;  %4872 = vmatmul.msk.f32.gmra.mxu1 %vm531_vm15, %v1200_v21 }
 0x81e   :  { %v1060_v50 = vsel %vm623_vm10, %v6063_v13, 0.0 }
 0x81f   :  { %1061 = vadd.xlane.f32.xlu1 %v1060_v50 }
 0x821   :  { %1203 = vrot.lane.b32.xlu0 %v5867_v49, %s5621_s19 }
 0x829   :  { %1360 = vrot.lane.b32.xlu0 %v5918_v24, %s5623_s21  ;;  %v6094_v30 = vpop.f32.mrf.mxu2 }
 0x82a   :  { %v1406_v31 = vsel %vm623_vm10, %v6094_v30, -inf }
 0x831   :  { %v6100_v46 = vpop.f32.mrf.mxu2 }
 0x832   :  { %v1409_v32 = vsel %vm623_vm10, %v6100_v46, -inf }
 0x878   :  { %v1029_v4 = vpop.xlane.xlu2 %1028 }
 0x879   :  { %v1037_v5 = vsub.f32 %v1009_v20, %v1029_v4 }
 0x87b   :  { %v1047_v7 = vmul.f32 1.442695, %v1037_v5 }
 0x87d   :  { %5244 = vpow2.f32 %v1047_v7 }
 0x880   :  { %v1032_v10 = vpop.xlane.xlu0 %1031 }
 0x881   :  { %v1038_v44 = vsub.f32 %v1012_v54, %v1032_v10 }
 0x883   :  { %v6072_v12 = vpop.eup %5244  ;;  %v1049_v19 = vmul.f32 1.442695, %v1038_v44 }
 0x884   :  { %v1063_v25 = vsel %vm623_vm10, %v6072_v12, 0.0 }
 0x885   :  { %5246 = vpow2.f32 %v1049_v19  ;;  %1064 = vadd.xlane.f32.xlu1 %v1063_v25 }
 0x88b   :  { %v6076_v26 = vpop.eup %5246 }
 0x88c   :  { %v1066_v27 = vsel %vm623_vm10, %v6076_v26, 0.0 }
 0x88d   :  { %1067 = vadd.xlane.f32.xlu2 %v1066_v27 }
 0x893   :  { %v1204_v17 = vpop.permute.xlu0 %1203 }
 0x89e   :  { %5088 = vrot.lane.b32.xlu1 %v5949_v59, %s5621_s19 }
 0x8a5   :  { %1366 = vrot.lane.b32.xlu2 %v5884_v58, %s5622_s20 }
 0x8a6   :  { %1364 = vrot.lane.b32.xlu1 %v5872_v16, %s5622_s20 }
 0x8ad   :  { %1356 = vrot.lane.b32.xlu2 %v5904_v2, %s5623_s21 }
 0x8b5   :  { %1358 = vrot.lane.b32.xlu2 %v5911_v23, %s5623_s21 }
 0x8bd   :  { %5093 = vrot.lane.b32.xlu2 %v5879_v55, %s5624_s22 }
 0x8c5   :  { %1550 = vrot.lane.b32.xlu2 %v5822_v52, %s5624_s22 }
 0x8cd   :  { %1707 = vrot.lane.b32.xlu2 %v5806_v33, %s5625_s23  ;;  %v1062_v33 = vpop.xlane.xlu1 %1061 }
 0x8ce   :  { %5248 = vrcp.f32 %v1062_v33  ;;  %v1125_v39 = vand.u32 2147483648, %v1062_v33  ;;  %vm1119_vm8 = vweird.f32 %v1062_v33 }
 0x8d0   :  { %1407 = vmax.xlane.f32.xlu1 %v1406_v31  ;;  %v1126_v42 = vor.u32 1.1754944e-38, %v1125_v39 }
 0x8d4   :  { %v5249_v29 = vpop.eup %5248 }
 0x8d5   :  { %1705 = vrot.lane.b32.xlu2 %v5799_v18, %s5625_s23  ;;  %v1115_v6 = vmul.f32 %v5249_v29, %v1062_v33  ;;  %vm1120_vm7 = vweird.f32 %v5249_v29 }
 0x8d6   :  { %vm1121_vm9 = vmor %vm1119_vm8, %vm1120_vm7 }
 0x8d8   :  { %1410 = vmax.xlane.f32.xlu1 %v1409_v32 }
 0x8dd   :  { %1697 = vrot.lane.b32.xlu2 %v5839_v60, %s5626_s24  ;;  %v1116_v60 = vsub.f32 1.0, %v1115_v6 }
 0x8e5   :  { %1699 = vrot.lane.b32.xlu2 %v5844_v3, %s5626_s24  ;;  %v1117_v3 = vmul.f32 %v5249_v29, %v1116_v60 }
 0x8ed   :  { %1757 = vrot.lane.b32.xlu2 %v5884_v58, %s5625_s23  ;;  %v1118_v58 = vadd.f32 %v5249_v29, %v1117_v3 }
 0x8ef   :  { %v1122_v40 = vsel %vm1121_vm9, %v5249_v29, %v1118_v58 }
 0x8f1   :  { %1362 = vrot.lane.b32.xlu1 %v5867_v49, %s5622_s20 }
 0x8f5   :  { %1747 = vrot.lane.b32.xlu2 %v5904_v2, %s5626_s24  ;;  %v1123_v2 = vand.u32 2147483647, %v1062_v33 }
 0x8f7   :  { %vm1124_vm11 = vcmp.eq.f32.partialorder %v1123_v2, 8.507059e+37 }
 0x8f8   :  { %v1065_v18 = vpop.xlane.xlu1 %1064  ;;  %v1127_v20 = vsel %vm1124_vm11, %v1126_v42, %v1122_v40 }
 0x8f9   :  { %5250 = vrcp.f32 %v1065_v18  ;;  %v1140_v57 = vand.u32 2147483648, %v1065_v18  ;;  %v1128_v61 = vmul.f32 %v6063_v13, %v1127_v20  ;;  %vm1134_vm13 = vweird.f32 %v1065_v18 }
 0x8fa   :  { %v1138_v62 = vand.u32 2147483647, %v1065_v18 }
 0x8fb   :  { %v1141_v4 = vor.u32 1.1754944e-38, %v1140_v57 }
 0x8fc   :  { %vm1139_vm1 = vcmp.eq.f32.partialorder %v1138_v62, 8.507059e+37 }
 0x8ff   :  { %v5251_v53 = vpop.eup %5250 }
 0x900   :  { %v1068_v36 = vpop.xlane.xlu2 %1067  ;;  %v1130_v38 = vmul.f32 %v5251_v53, %v1065_v18  ;;  %vm1135_vm12 = vweird.f32 %v5251_v53 }
 0x901   :  { %5252 = vrcp.f32 %v1068_v36  ;;  %vm1136_vm14 = vmor %vm1134_vm13, %vm1135_vm12  ;;  %v1155_v10 = vand.u32 2147483648, %v1068_v36  ;;  %vm1149_vm3 = vweird.f32 %v1068_v36  ;;  %v1153_v44 = vand.u32 2147483647, %v1068_v36 }
 0x902   :  { %v1131_v35 = vsub.f32 1.0, %v1130_v38 }
 0x903   :  { %v1156_v31 = vor.u32 1.1754944e-38, %v1155_v10  ;;  %vm1154_vm5 = vcmp.eq.f32.partialorder %v1153_v44, 8.507059e+37 }
 0x904   :  { %v1132_v41 = vmul.f32 %v5251_v53, %v1131_v35 }
 0x906   :  { %v1133_v54 = vadd.f32 %v5251_v53, %v1132_v41 }
 0x907   :  { %v5253_v11 = vpop.eup %5252 }
 0x908   :  { %v1367_v28 = vpop.permute.xlu2 %1366  ;;  %v1145_v15 = vmul.f32 %v5253_v11, %v1068_v36  ;;  %v1137_v21 = vsel %vm1136_vm14, %v5251_v53, %v1133_v54  ;;  %vm1150_vm2 = vweird.f32 %v5253_v11 }
 0x909   :  { %4882 = vmatpush.xpose.msk.msrb.mxu3 %vm531_vm15, %v1367_v28  ;;  %v1142_v5 = vsel %vm1139_vm1, %v1141_v4, %v1137_v21  ;;  %vm1151_vm4 = vmor %vm1149_vm3, %vm1150_vm2 }
 0x90a   :  { %v1146_v37 = vsub.f32 1.0, %v1145_v15  ;;  %v1143_v13 = vmul.f32 %v6072_v12, %v1142_v5 }
 0x90c   :  { %v1147_v50 = vmul.f32 %v5253_v11, %v1146_v37 }
 0x90e   :  { %v1148_v7 = vadd.f32 %v5253_v11, %v1147_v50 }
 0x910   :  { %v5089_v48 = vpop.permute.xlu1 %5088  ;;  %v6117_v1 = vpop.permute.xlu2 %1356  ;;  %v1152_v25 = vsel %vm1151_vm4, %v5253_v11, %v1148_v7 }
 0x911   :  { %v5090_v45 = vunpack.i.l.bf16 %v5089_v48  ;;  %v5091_v51 = vunpack.i.h.bf16 %v5089_v48  ;;  %v1157_v33 = vsel %vm1154_vm5, %v1156_v31, %v1152_v25 }
 0x912   :  { %v1158_v18 = vmul.f32 %v6076_v26, %v1157_v33 }
 0x913   :  { %1234 = vmatpush.msra.mxu0 %v5090_v45 }
 0x915   :  { %1235 = vmatpush.msra.mxu0 %v5091_v51 }
 0x917   :  { %1236 = vmatpush.msra.mxu0 %v1204_v17 }
 0x918   :  { %v1365_v0 = vpop.permute.xlu1 %1364  ;;  %v1359_v47 = vpop.permute.xlu2 %1358  ;;  %4867 = vmatmul.msk.f32.vlgmr.msra.gmra.mxu0 %vm623_vm10, %v1128_v61 }
 0x919   :  { %4883 = vmatpush.xpose.msk.msrb.mxu3 %vm531_vm15, %v1365_v0 }
 0x920   :  { %v5094_v19 = vpop.permute.xlu2 %5093  ;;  %4868 = vmatmul.msk.f32.gmra.mxu0 %vm623_vm10, %v1143_v13 }
 0x921   :  { %v5095_v27 = vunpack.i.l.bf16 %v5094_v19  ;;  %v5096_v32 = vunpack.i.h.bf16 %v5094_v19 }
 0x923   :  { %1581 = vmatpush.msrb.mxu0 %v5095_v27 }
 0x925   :  { %1582 = vmatpush.msrb.mxu0 %v5096_v32 }
 0x928   :  { %v1551_v29 = vpop.permute.xlu2 %1550  ;;  %4869 = vmatmul.msk.f32.gmra.mxu0 %vm623_vm10, %v1158_v18 }
 0x929   :  { %1583 = vmatpush.msrb.mxu0 %v1551_v29 }
 0x930   :  { %v1708_v12 = vpop.permute.xlu2 %1707 }
 0x931   :  { %4900 = vmatpush.xpose.msk.msra.mxu0 %vm531_vm15, %v1708_v12 }
 0x938   :  { %v1706_v6 = vpop.permute.xlu2 %1705 }
 0x939   :  { %4901 = vmatpush.xpose.msk.msra.mxu0 %vm531_vm15, %v1706_v6 }
 0x940   :  { %v6128_v36 = vpop.permute.xlu2 %1697 }
 0x943   :  { %v1408_v60 = vpop.xlane.xlu1 %1407 }
 0x944   :  { %v1424_v53 = vsub.f32 %v6094_v30, %v1408_v60 }
 0x946   :  { %v1430_v3 = vmul.f32 1.442695, %v1424_v53 }
 0x948   :  { %5254 = vpow2.f32 %v1430_v3  ;;  %v6131_v38 = vpop.permute.xlu2 %1699 }
 0x94b   :  { %v1411_v26 = vpop.xlane.xlu1 %1410 }
 0x94c   :  { %v1425_v28 = vsub.f32 %v6100_v46, %v1411_v26  ;;  %v1361_v46 = vpop.permute.xlu0 %1360 }
 0x94e   :  { %v5255_v58 = vpop.eup %5254  ;;  %v1432_v35 = vmul.f32 1.442695, %v1425_v28 }
 0x94f   :  { %v1442_v11 = vsel %vm623_vm10, %v5255_v58, 0.0 }
 0x950   :  { %5256 = vpow2.f32 %v1432_v35  ;;  %1443 = vadd.xlane.f32.xlu0 %v1442_v11  ;;  %v1758_v39 = vpop.permute.xlu2 %1757 }
 0x951   :  { %4906 = vmatpush.xpose.msk.msrb.mxu1 %vm531_vm15, %v1758_v39 }
 0x956   :  { %v6136_v2 = vpop.eup %5256 }
 0x957   :  { %v1445_v30 = vsel %vm623_vm10, %v6136_v2, 0.0 }
 0x958   :  { %1446 = vadd.xlane.f32.xlu1 %v1445_v30  ;;  %v1748_v3 = vpop.permute.xlu2 %1747 }
 0x963   :  { %v1363_v40 = vpop.permute.xlu1 %1362 }
 0x964   :  { %1310 = vrot.lane.b32.xlu0 %v5850_v8, %s5623_s21  ;;  %4884 = vmatpush.xpose.msk.msrb.mxu3 %vm531_vm15, %v1363_v40 }
 0x967   :  { %4885 = vmatmul.msk.f32.vlgmr.msrb.gmra.mxu3 %vm531_vm15, %v6117_v1 }
 0x968   :  { %5050 = vmatpush.msra.mxu3 %v5095_v27 }
 0x96a   :  { %5051 = vmatpush.msra.mxu3 %v5096_v32 }
 0x96c   :  { %5052 = vmatpush.msra.mxu3 %v1551_v29  ;;  %1701 = vrot.lane.b32.xlu0 %v5850_v8, %s5626_s24 }
 0x96f   :  { %4886 = vmatmul.msk.f32.gmra.mxu3 %vm531_vm15, %v1359_v47 }
 0x971   :  { %1703 = vrot.lane.b32.xlu1 %v5822_v52, %s5625_s23 }
 0x974   :  { %1755 = vrot.lane.b32.xlu0 %v5872_v16, %s5625_s23  ;;  %v6162_v16 = vpop.f32.mrf.mxu3 }
 0x977   :  { %4887 = vmatmul.msk.f32.gmra.mxu3 %vm531_vm15, %v1361_v46 }
 0x979   :  { %1753 = vrot.lane.b32.xlu1 %v5867_v49, %s5625_s23 }
 0x97c   :  { %1749 = vrot.lane.b32.xlu0 %v5911_v23, %s5626_s24  ;;  %v6164_v1 = vpop.f32.mrf.mxu3 }
 0x981   :  { %1751 = vrot.lane.b32.xlu1 %v5918_v24, %s5626_s24 }
 0x984   :  { %v6166_v42 = vpop.f32.mrf.mxu3 }
 0x98c   :  { %v6168_v20 = vpop.f32.mrf.mxu3 }
 0x994   :  { %v6172_v44 = vpop.f32.mrf.mxu3 }
 0x995   :  { %v1238_v8 = vpop.f32.mrf.mxu0 }
 0x996   :  { %4873 = vmatmul.msk.f32.gmra.mxu1 %vm531_vm15, %v1238_v8 }
 0x99c   :  { %v6176_v18 = vpop.f32.mrf.mxu3 }
 0x99d   :  { %v1241_v15 = vpop.f32.mrf.mxu0 }
 0x99e   :  { %4874 = vmatmul.msk.f32.gmra.mxu1 %vm531_vm15, %v1241_v15 }
 0x9a5   :  { %v1244_v48 = vpop.f32.mrf.mxu0 }
 0x9a6   :  { %4875 = vmatmul.msk.f32.gmra.mxu1 %vm531_vm15, %v1244_v48 }
 0x9c3   :  { %v1444_v41 = vpop.xlane.xlu0 %1443 }
 0x9c4   :  { %5258 = vrcp.f32 %v1444_v41  ;;  %v1471_v37 = vand.u32 2147483648, %v1444_v41  ;;  %v1469_v57 = vand.u32 2147483647, %v1444_v41  ;;  %vm1465_vm7 = vweird.f32 %v1444_v41 }
 0x9c6   :  { %v1472_v62 = vor.u32 1.1754944e-38, %v1471_v37  ;;  %vm1470_vm9 = vcmp.eq.f32.partialorder %v1469_v57, 8.507059e+37 }
 0x9ca   :  { %v5259_v23 = vpop.eup %5258 }
 0x9cb   :  { %v1461_v45 = vmul.f32 %v5259_v23, %v1444_v41  ;;  %v1447_v24 = vpop.xlane.xlu1 %1446  ;;  %vm1466_vm6 = vweird.f32 %v5259_v23 }
 0x9cc   :  { %5260 = vrcp.f32 %v1447_v24  ;;  %vm1467_vm8 = vmor %vm1465_vm7, %vm1466_vm6  ;;  %v1486_v7 = vand.u32 2147483648, %v1447_v24  ;;  %v1484_v13 = vand.u32 2147483647, %v1447_v24  ;;  %vm1480_vm12 = vweird.f32 %v1447_v24 }
 0x9cd   :  { %v1462_v51 = vsub.f32 1.0, %v1461_v45 }
 0x9ce   :  { %v1487_v25 = vor.u32 1.1754944e-38, %v1486_v7  ;;  %vm1485_vm14 = vcmp.eq.f32.partialorder %v1484_v13, 8.507059e+37 }
 0x9cf   :  { %v1463_v54 = vmul.f32 %v5259_v23, %v1462_v51 }
 0x9d1   :  { %v1464_v17 = vadd.f32 %v5259_v23, %v1463_v54 }
 0x9d2   :  { %v5261_v61 = vpop.eup %5260 }
 0x9d3   :  { %v1468_v0 = vsel %vm1467_vm8, %v5259_v23, %v1464_v17  ;;  %v1476_v47 = vmul.f32 %v5261_v61, %v1447_v24  ;;  %vm1481_vm11 = vweird.f32 %v5261_v61 }
 0x9d4   :  { %v1473_v21 = vsel %vm1470_vm9, %v1472_v62, %v1468_v0  ;;  %vm1482_vm13 = vmor %vm1480_vm12, %vm1481_vm11 }
 0x9d5   :  { %v1477_v50 = vsub.f32 1.0, %v1476_v47  ;;  %v1474_v4 = vmul.f32 %v5255_v58, %v1473_v21 }
 0x9d6   :  { %v1311_v5 = vpop.permute.xlu0 %1310 }
 0x9d7   :  { %4881 = vmatmul.msk.f32.gmra.mxu2 %vm531_vm15, %v1311_v5  ;;  %4888 = vmatmul.msk.f32.vlgmr.msrb.gmra.mxu0 %vm623_vm10, %v1474_v4  ;;  %v1478_v10 = vmul.f32 %v5261_v61, %v1477_v50  ;;  %v6216_v5 = vpop.f32.mrf.mxu1 }
 0x9d9   :  { %v1479_v19 = vadd.f32 %v5261_v61, %v1478_v10 }
 0x9db   :  { %v1483_v27 = vsel %vm1482_vm13, %v5261_v61, %v1479_v19 }
 0x9dc   :  { %v1488_v31 = vsel %vm1485_vm14, %v1487_v25, %v1483_v27 }
 0x9dd   :  { %v1489_v32 = vmul.f32 %v6136_v2, %v1488_v31 }
 0x9de   :  { %v1702_v33 = vpop.permute.xlu0 %1701 }
 0x9df   :  { %4889 = vmatmul.msk.f32.gmra.mxu0 %vm623_vm10, %v1489_v32  ;;  %v6218_v7 = vpop.f32.mrf.mxu1 }
 0x9e3   :  { %v1704_v29 = vpop.permute.xlu1 %1703 }
 0x9e4   :  { %4902 = vmatpush.xpose.msk.msra.mxu0 %vm531_vm15, %v1704_v29 }
 0x9e6   :  { %v1756_v12 = vpop.permute.xlu0 %1755 }
 0x9e7   :  { %4903 = vmatmul.msk.f32.vlgmr.msra.gmra.mxu0 %vm531_vm15, %v6128_v36  ;;  %4907 = vmatpush.xpose.msk.msrb.mxu1 %vm531_vm15, %v1756_v12  ;;  %v6220_v10 = vpop.f32.mrf.mxu1 }
 0x9ea   :  { %v1397_v6 = vpop.f32.mrf.mxu3 }
 0x9eb   :  { %v1754_v60 = vpop.permute.xlu1 %1753  ;;  %v1415_v53 = vsel %vm623_vm10, %v1397_v6, -inf }
 0x9ec   :  { %4908 = vmatpush.xpose.msk.msrb.mxu1 %vm531_vm15, %v1754_v60  ;;  %1416 = vmax.xlane.f32.xlu2 %v1415_v53 }
 0x9ee   :  { %v1750_v36 = vpop.permute.xlu0 %1749 }
 0x9ef   :  { %4904 = vmatmul.msk.f32.gmra.mxu0 %vm531_vm15, %v6131_v38  ;;  %4909 = vmatmul.msk.f32.vlgmr.msrb.gmra.mxu1 %vm531_vm15, %v1748_v3 }
 0x9f2   :  { %v1400_v26 = vpop.f32.mrf.mxu3 }
 0x9f3   :  { %v1418_v28 = vsel %vm623_vm10, %v1400_v26, -inf  ;;  %v1752_v11 = vpop.permute.xlu1 %1751 }
 0x9f4   :  { %1419 = vmax.xlane.f32.xlu0 %v1418_v28 }
 0x9f7   :  { %4905 = vmatmul.msk.f32.gmra.mxu0 %vm531_vm15, %v1702_v33  ;;  %4910 = vmatmul.msk.f32.gmra.mxu1 %vm531_vm15, %v1750_v36 }
 0x9fa   :  { %v1403_v58 = vpop.f32.mrf.mxu3 }
 0x9fb   :  { %v1421_v35 = vsel %vm623_vm10, %v1403_v58, -inf }
 0x9fc   :  { %1422 = vmax.xlane.f32.xlu1 %v1421_v35 }
 0x9ff   :  { %4911 = vmatmul.msk.f32.gmra.mxu1 %vm531_vm15, %v1752_v11 }
 0xa13   :  { %v6222_v13 = vpop.f32.mrf.mxu1 }
 0xa1b   :  { %v6224_v31 = vpop.f32.mrf.mxu1 }
 0xa23   :  { %v6230_v60 = vpop.f32.mrf.mxu1 }
 0xa54   :  { %v6192_v39 = vpop.f32.mrf.mxu0 }
 0xa5a   :  { %v1353_v38 = vpop.f32.mrf.mxu2 }
 0xa5b   :  { %v1412_v2 = vsel %vm623_vm10, %v1353_v38, -inf }
 0xa5c   :  { %v6195_v30 = vpop.f32.mrf.mxu0  ;;  %1413 = vmax.xlane.f32.xlu0 %v1412_v2 }
 0xa5f   :  { %v1417_v40 = vpop.xlane.xlu2 %1416 }
 0xa60   :  { %v1427_v46 = vsub.f32 %v1397_v6, %v1417_v40 }
 0xa62   :  { %v1436_v8 = vmul.f32 1.442695, %v1427_v46 }
 0xa64   :  { %5262 = vpow2.f32 %v1436_v8  ;;  %v1738_v15 = vpop.f32.mrf.mxu0 }
 0xa65   :  { %v1797_v48 = vsel %vm623_vm10, %v1738_v15, -inf }
 0xa66   :  { %1798 = vmax.xlane.f32.xlu2 %v1797_v48 }
 0xa67   :  { %v1420_v41 = vpop.xlane.xlu0 %1419 }
 0xa68   :  { %v1428_v23 = vsub.f32 %v1400_v26, %v1420_v41 }
 0xa6a   :  { %v6198_v45 = vpop.eup %5262  ;;  %v1438_v24 = vmul.f32 1.442695, %v1428_v23 }
 0xa6b   :  { %v1451_v51 = vsel %vm623_vm10, %v6198_v45, 0.0 }
 0xa6c   :  { %5264 = vpow2.f32 %v1438_v24  ;;  %v1741_v37 = vpop.f32.mrf.mxu0  ;;  %1452 = vadd.xlane.f32.xlu0 %v1451_v51  ;;  %v6236_v28 = vpop.f32.mrf.mxu1 }
 0xa6d   :  { %v1800_v50 = vsel %vm623_vm10, %v1741_v37, -inf }
 0xa6f   :  { %v1423_v54 = vpop.xlane.xlu1 %1422 }
 0xa70   :  { %v1429_v57 = vsub.f32 %v1403_v58, %v1423_v54 }
 0xa72   :  { %v6202_v17 = vpop.eup %5264  ;;  %v1440_v61 = vmul.f32 1.442695, %v1429_v57 }
 0xa73   :  { %v1454_v62 = vsel %vm623_vm10, %v6202_v17, 0.0 }
 0xa74   :  { %5266 = vpow2.f32 %v1440_v61  ;;  %v1744_v0 = vpop.f32.mrf.mxu0  ;;  %1455 = vadd.xlane.f32.xlu1 %v1454_v62  ;;  %v6240_v40 = vpop.f32.mrf.mxu1 }
 0xa75   :  { %v1803_v47 = vsel %vm623_vm10, %v1744_v0, -inf }
 0xa76   :  { %1804 = vmax.xlane.f32.xlu2 %v1803_v47 }
 0xa7a   :  { %v6207_v21 = vpop.eup %5266 }
 0xa7b   :  { %v1457_v4 = vsel %vm623_vm10, %v6207_v21, 0.0 }
 0xa7c   :  { %1801 = vmax.xlane.f32.xlu1 %v1800_v50  ;;  %1458 = vadd.xlane.f32.xlu0 %v1457_v4  ;;  %v6250_v47 = vpop.f32.mrf.mxu1 }
 0xa8e   :  { %5098 = vrot.lane.b32.xlu2 %v5949_v59, %s5624_s22 }
 0xa95   :  { %1594 = vrot.lane.b32.xlu1 %v5867_v49, %s5624_s22 }
 0xacf   :  { %v1414_v19 = vpop.xlane.xlu0 %1413 }
 0xad0   :  { %v1426_v25 = vsub.f32 %v1353_v38, %v1414_v19 }
 0xad2   :  { %v1434_v27 = vmul.f32 1.442695, %v1426_v25  ;;  %v1812_v25 = vsel %vm623_vm10, %v6250_v47, -inf }
 0xad4   :  { %5268 = vpow2.f32 %v1434_v27 }
 0xad9   :  { %v1799_v32 = vpop.xlane.xlu2 %1798 }
 0xada   :  { %v6226_v33 = vpop.eup %5268  ;;  %v1815_v29 = vsub.f32 %v1738_v15, %v1799_v32 }
 0xadb   :  { %v1448_v12 = vsel %vm623_vm10, %v6226_v33, 0.0 }
 0xadc   :  { %v1821_v6 = vmul.f32 1.442695, %v1815_v29  ;;  %1449 = vadd.xlane.f32.xlu0 %v1448_v12 }
 0xade   :  { %5270 = vpow2.f32 %v1821_v6 }
 0xadf   :  { %v1453_v3 = vpop.xlane.xlu0 %1452 }
 0xae0   :  { %5272 = vrcp.f32 %v1453_v3  ;;  %v1516_v32 = vand.u32 2147483648, %v1453_v3  ;;  %vm1510_vm2 = vweird.f32 %v1453_v3  ;;  %v1514_v29 = vand.u32 2147483647, %v1453_v3 }
 0xae2   :  { %vm1515_vm4 = vcmp.eq.f32.partialorder %v1514_v29, 8.507059e+37 }
 0xae4   :  { %v6232_v53 = vpop.eup %5270 }
 0xae5   :  { %v1833_v26 = vsel %vm623_vm10, %v6232_v53, 0.0 }
 0xae6   :  { %1834 = vadd.xlane.f32.xlu0 %v1833_v26  ;;  %v5273_v38 = vpop.eup %5272 }
 0xae7   :  { %v6238_v36 = vpop.xlane.xlu1 %1455  ;;  %v1506_v8 = vmul.f32 %v5273_v38, %v1453_v3  ;;  %vm1511_vm1 = vweird.f32 %v5273_v38 }
 0xae8   :  { %vm1512_vm3 = vmor %vm1510_vm2, %vm1511_vm1  ;;  %vm1525_vm6 = vweird.f32 %v6238_v36 }
 0xae9   :  { %v1805_v58 = vpop.xlane.xlu2 %1804  ;;  %v1507_v51 = vsub.f32 1.0, %v1506_v8  ;;  %v1529_v8 = vand.u32 2147483647, %v6238_v36 }
 0xaea   :  { %v1817_v35 = vsub.f32 %v1744_v0, %v1805_v58  ;;  %v1809_v58 = vsel %vm623_vm10, %v6240_v40, -inf }
 0xaeb   :  { %v1508_v62 = vmul.f32 %v5273_v38, %v1507_v51  ;;  %vm1530_vm8 = vcmp.eq.f32.partialorder %v1529_v8, 8.507059e+37 }
 0xaec   :  { %v1825_v11 = vmul.f32 1.442695, %v1817_v35 }
 0xaed   :  { %v1509_v4 = vadd.f32 %v5273_v38, %v1508_v62 }
 0xaee   :  { %5274 = vpow2.f32 %v1825_v11 }
 0xaef   :  { %v1802_v2 = vpop.xlane.xlu1 %1801  ;;  %5276 = vrcp.f32 %v6238_v36  ;;  %v1459_v54 = vpop.xlane.xlu0 %1458  ;;  %v1513_v12 = vsel %vm1512_vm3, %v5273_v38, %v1509_v4  ;;  %v506_v4 = vld [vmem:[#allocation6 + $0x30] sm:$0xff] }
 0xaf0   :  { %v1816_v46 = vsub.f32 %v1741_v37, %v1802_v2  ;;  %v1546_v51 = vand.u32 2147483648, %v1459_v54  ;;  %vm1540_vm11 = vweird.f32 %v1459_v54  ;;  %1671 = vmatpush.msrb.mxu3 %v506_v4 }
 0xaf1   :  { %v5099_v15 = vpop.permute.xlu2 %5098 }
 0xaf2   :  { %v1823_v48 = vmul.f32 1.442695, %v1816_v46  ;;  %v5100_v41 = vunpack.i.l.bf16 %v5099_v15  ;;  %v5101_v24 = vunpack.i.h.bf16 %v5099_v15  ;;  %v1531_v46 = vand.u32 2147483648, %v6238_v36 }
 0xaf3   :  { %v1547_v62 = vor.u32 1.1754944e-38, %v1546_v51 }
 0xaf4   :  { %v6243_v23 = vpop.eup %5274  ;;  %5278 = vpow2.f32 %v1823_v48  ;;  %1625 = vmatpush.msra.mxu2 %v5100_v41  ;;  %v1532_v48 = vor.u32 1.1754944e-38, %v1531_v46 }
 0xaf5   :  { %v1839_v57 = vsel %vm623_vm10, %v6243_v23, 0.0  ;;  %v5277_v61 = vpop.eup %5276  ;;  %5280 = vrcp.f32 %v1459_v54 }
 0xaf6   :  { %1626 = vmatpush.msra.mxu2 %v5101_v24  ;;  %1840 = vadd.xlane.f32.xlu1 %v1839_v57  ;;  %v1521_v37 = vmul.f32 %v5277_v61, %v6238_v36  ;;  %vm1526_vm5 = vweird.f32 %v5277_v61 }
 0xaf7   :  { %vm1527_vm7 = vmor %vm1525_vm6, %vm1526_vm5 }
 0xaf8   :  { %v1522_v19 = vsub.f32 1.0, %v1521_v37 }
 0xafa   :  { %v6248_v0 = vpop.eup %5278  ;;  %5103 = vrot.lane.b32.xlu0 %v5879_v55, %s5627_s25  ;;  %v1523_v26 = vmul.f32 %v5277_v61, %v1522_v19  ;;  %v1517_v55 = vor.u32 1.1754944e-38, %v1516_v32 }
 0xafb   :  { %v1836_v50 = vsel %vm623_vm10, %v6248_v0, 0.0  ;;  %v5281_v27 = vpop.eup %5280 }
 0xafc   :  { %1837 = vadd.xlane.f32.xlu2 %v1836_v50  ;;  %v1536_v6 = vmul.f32 %v5281_v27, %v1459_v54  ;;  %v1518_v35 = vsel %vm1515_vm4, %v1517_v55, %v1513_v12  ;;  %v1524_v2 = vadd.f32 %v5277_v61, %v1523_v26  ;;  %vm1541_vm9 = vweird.f32 %v5281_v27 }
 0xafd   :  { %v1519_v38 = vmul.f32 %v6198_v45, %v1518_v35  ;;  %v1544_v45 = vand.u32 2147483647, %v1459_v54  ;;  %vm1542_vm12 = vmor %vm1540_vm11, %vm1541_vm9  ;;  %v1806_v50 = vsel %vm623_vm10, %v6236_v28, -inf }
 0xafe   :  { %1813 = vmax.xlane.f32.xlu1 %v1812_v25  ;;  %v1537_v11 = vsub.f32 1.0, %v1536_v6 }
 0xaff   :  { %vm1545_vm13 = vcmp.eq.f32.partialorder %v1544_v45, 8.507059e+37 }
 0xb00   :  { %v1538_v15 = vmul.f32 %v5281_v27, %v1537_v11 }
 0xb02   :  { %1941 = vrot.lane.b32.xlu0 %v5822_v52, %s5627_s25  ;;  %v1528_v52 = vsel %vm1527_vm7, %v5277_v61, %v1524_v2  ;;  %v1539_v24 = vadd.f32 %v5281_v27, %v1538_v15 }
 0xb03   :  { %v1533_v41 = vsel %vm1530_vm8, %v1532_v48, %v1528_v52 }
 0xb04   :  { %1810 = vmax.xlane.f32.xlu2 %v1809_v58  ;;  %v1534_v57 = vmul.f32 %v6202_v17, %v1533_v41  ;;  %v1543_v36 = vsel %vm1542_vm12, %v5281_v27, %v1539_v24 }
 0xb05   :  { %v1548_v37 = vsel %vm1545_vm13, %v1547_v62, %v1543_v36 }
 0xb06   :  { %v1549_v61 = vmul.f32 %v6207_v21, %v1548_v37 }
 0xb07   :  { %v1595_v3 = vpop.permute.xlu1 %1594 }
 0xb08   :  { %1627 = vmatpush.msra.mxu2 %v1595_v3 }
 0xb09   :  { %4891 = vmatmul.msk.f32.vlgmr.msra.gmra.mxu2 %vm623_vm10, %v1519_v38 }
 0xb11   :  { %4892 = vmatmul.msk.f32.gmra.mxu2 %vm623_vm10, %v1534_v57 }
 0xb19   :  { %4893 = vmatmul.msk.f32.gmra.mxu2 %vm623_vm10, %v1549_v61 }
 0xb2c   :  { %1807 = vmax.xlane.f32.xlu0 %v1806_v50 }
 0xb4f   :  { %v1450_v17 = vpop.xlane.xlu0 %1449 }
 0xb50   :  { %5282 = vrcp.f32 %v1450_v17  ;;  %v1501_v27 = vand.u32 2147483648, %v1450_v17  ;;  %v1499_v12 = vand.u32 2147483647, %v1450_v17  ;;  %vm1495_vm1 = vweird.f32 %v1450_v17 }
 0xb52   :  { %v1502_v6 = vor.u32 1.1754944e-38, %v1501_v27  ;;  %vm1500_vm3 = vcmp.eq.f32.partialorder %v1499_v12, 8.507059e+37 }
 0xb56   :  { %v5283_v54 = vpop.eup %5282 }
 0xb57   :  { %v1491_v19 = vmul.f32 %v5283_v54, %v1450_v17  ;;  %vm1496_vm14 = vweird.f32 %v5283_v54 }
 0xb58   :  { %vm1497_vm2 = vmor %vm1495_vm1, %vm1496_vm14 }
 0xb59   :  { %v1492_v25 = vsub.f32 1.0, %v1491_v19  ;;  %v1835_v32 = vpop.xlane.xlu0 %1834 }
 0xb5a   :  { %5284 = vrcp.f32 %v1835_v32  ;;  %v1862_v8 = vand.u32 2147483648, %v1835_v32  ;;  %vm1856_vm5 = vweird.f32 %v1835_v32  ;;  %v1860_v52 = vand.u32 2147483647, %v1835_v32 }
 0xb5b   :  { %v1493_v29 = vmul.f32 %v5283_v54, %v1492_v25 }
 0xb5c   :  { %v1863_v41 = vor.u32 1.1754944e-38, %v1862_v8  ;;  %vm1861_vm7 = vcmp.eq.f32.partialorder %v1860_v52, 8.507059e+37 }
 0xb5d   :  { %v1494_v21 = vadd.f32 %v5283_v54, %v1493_v29 }
 0xb5f   :  { %v1498_v26 = vsel %vm1497_vm2, %v5283_v54, %v1494_v21 }
 0xb60   :  { %v5285_v55 = vpop.eup %5284  ;;  %v1503_v58 = vsel %vm1500_vm3, %v1502_v6, %v1498_v26 }
 0xb61   :  { %v1852_v35 = vmul.f32 %v5285_v55, %v1835_v32  ;;  %v1504_v11 = vmul.f32 %v6226_v33, %v1503_v58  ;;  %vm1857_vm4 = vweird.f32 %v5285_v55 }
 0xb62   :  { %vm1858_vm6 = vmor %vm1856_vm5, %vm1857_vm4 }
 0xb63   :  { %v1853_v2 = vsub.f32 1.0, %v1852_v35  ;;  %4890 = vmatmul.msk.f32.vlgmr.msra.gmra.mxu3 %vm623_vm10, %v1504_v11 }
 0xb65   :  { %v1854_v46 = vmul.f32 %v5285_v55, %v1853_v2 }
 0xb67   :  { %v1855_v38 = vadd.f32 %v5285_v55, %v1854_v46 }
 0xb69   :  { %v6275_v3 = vpop.xlane.xlu1 %1840  ;;  %v1859_v33 = vsel %vm1858_vm6, %v5285_v55, %v1855_v38 }
 0xb6a   :  { %5286 = vrcp.f32 %v6275_v3  ;;  %v1864_v45 = vsel %vm1861_vm7, %v1863_v41, %v1859_v33  ;;  %v1892_v58 = vand.u32 2147483648, %v6275_v3  ;;  %vm1886_vm14 = vweird.f32 %v6275_v3 }
 0xb6b   :  { %4894 = vmatmul.msk.f32.vlgmr.msrb.gmra.mxu3 %vm531_vm15, %v6192_v39  ;;  %v1865_v62 = vmul.f32 %v6232_v53, %v1864_v45  ;;  %v1890_v35 = vand.u32 2147483647, %v6275_v3 }
 0xb6c   :  { %v5104_v15 = vpop.permute.xlu0 %5103  ;;  %v1893_v38 = vor.u32 1.1754944e-38, %v1892_v58 }
 0xb6d   :  { %v5105_v48 = vunpack.i.l.bf16 %v5104_v15  ;;  %v5106_v24 = vunpack.i.h.bf16 %v5104_v15  ;;  %vm1891_vm2 = vcmp.eq.f32.partialorder %v1890_v35, 8.507059e+37 }
 0xb6f   :  { %v1838_v51 = vpop.xlane.xlu2 %1837  ;;  %1972 = vmatpush.msrb.mxu2 %v5105_v48 }
 0xb70   :  { %v5287_v57 = vpop.eup %5286  ;;  %5288 = vrcp.f32 %v1838_v51  ;;  %v1877_v27 = vand.u32 2147483648, %v1838_v51  ;;  %vm1871_vm9 = vweird.f32 %v1838_v51 }
 0xb71   :  { %1973 = vmatpush.msrb.mxu2 %v5106_v24  ;;  %v1882_v36 = vmul.f32 %v5287_v57, %v6275_v3  ;;  %v1814_v4 = vpop.xlane.xlu1 %1813  ;;  %vm1887_vm13 = vweird.f32 %v5287_v57 }
 0xb72   :  { %v1820_v25 = vsub.f32 %v6250_v47, %v1814_v4  ;;  %v1878_v6 = vor.u32 1.1754944e-38, %v1877_v27  ;;  %vm1888_vm1 = vmor %vm1886_vm14, %vm1887_vm13 }
 0xb73   :  { %4895 = vmatmul.msk.f32.gmra.mxu3 %vm531_vm15, %v6195_v30  ;;  %v1883_v61 = vsub.f32 1.0, %v1882_v36  ;;  %v1875_v30 = vand.u32 2147483647, %v1838_v51 }
 0xb74   :  { %v1942_v39 = vpop.permute.xlu0 %1941  ;;  %v1831_v21 = vmul.f32 1.442695, %v1820_v25 }
 0xb75   :  { %1974 = vmatpush.msrb.mxu2 %v1942_v39  ;;  %v1884_v12 = vmul.f32 %v5287_v57, %v1883_v61  ;;  %vm1876_vm12 = vcmp.eq.f32.partialorder %v1875_v30, 8.507059e+37 }
 0xb76   :  { %v5289_v37 = vpop.eup %5288  ;;  %4912 = vmatmul.msk.f32.vlgmr.msrb.gmra.mxu2 %vm623_vm10, %v1865_v62 }
 0xb77   :  { %v1867_v50 = vmul.f32 %v5289_v37, %v1838_v51  ;;  %v1811_v17 = vpop.xlane.xlu2 %1810  ;;  %vm1872_vm8 = vweird.f32 %v5289_v37  ;;  %v1885_v55 = vadd.f32 %v5287_v57, %v1884_v12 }
 0xb78   :  { %v1819_v54 = vsub.f32 %v6240_v40, %v1811_v17  ;;  %vm1873_vm11 = vmor %vm1871_vm9, %vm1872_vm8 }
 0xb79   :  { %v1868_v19 = vsub.f32 1.0, %v1867_v50  ;;  %v1889_v46 = vsel %vm1888_vm1, %v5287_v57, %v1885_v55 }
 0xb7a   :  { %v1829_v32 = vmul.f32 1.442695, %v1819_v54  ;;  %v1894_v8 = vsel %vm1891_vm2, %v1893_v38, %v1889_v46 }
 0xb7b   :  { %v1869_v29 = vmul.f32 %v5289_v37, %v1868_v19 }
 0xb7c   :  { %5290 = vpow2.f32 %v1829_v32 }
 0xb7d   :  { %v1870_v53 = vadd.f32 %v5289_v37, %v1869_v29  ;;  %5292 = vpow2.f32 %v1831_v21 }
 0xb7f   :  { %v1874_v26 = vsel %vm1873_vm11, %v5289_v37, %v1870_v53 }
 0xb80   :  { %v1879_v40 = vsel %vm1876_vm12, %v1878_v6, %v1874_v26 }
 0xb81   :  { %v1880_v47 = vmul.f32 %v6248_v0, %v1879_v40  ;;  %v1895_v0 = vmul.f32 %v6243_v23, %v1894_v8  ;;  %v507_v23 = vld [vmem:[#allocation6 + $0x38] sm:$0xff] }
 0xb82   :  { %v6291_v11 = vpop.eup %5290  ;;  %2062 = vmatpush.msra.mxu1 %v507_v23 }
 0xb83   :  { %4913 = vmatmul.msk.f32.gmra.mxu2 %vm623_vm10, %v1880_v47  ;;  %v1845_v2 = vsel %vm623_vm10, %v6291_v11, 0.0  ;;  %v6296_v52 = vpop.eup %5292 }
 0xb84   :  { %1846 = vadd.xlane.f32.xlu1 %v1845_v2  ;;  %v1848_v3 = vsel %vm623_vm10, %v6296_v52, 0.0 }
 0xb8b   :  { %4914 = vmatmul.msk.f32.gmra.mxu2 %vm623_vm10, %v1895_v0 }
 0xb8c   :  { %1849 = vadd.xlane.f32.xlu1 %v1848_v3  ;;  %v1629_v51 = vpop.f32.mrf.mxu2 }
 0xb94   :  { %v1632_v45 = vpop.f32.mrf.mxu2 }
 0xb9f   :  { %v1808_v15 = vpop.xlane.xlu0 %1807 }
 0xba0   :  { %v1818_v48 = vsub.f32 %v6236_v28, %v1808_v15  ;;  %v1635_v28 = vpop.f32.mrf.mxu2 }
 0xba2   :  { %v1827_v33 = vmul.f32 1.442695, %v1818_v48 }
 0xba4   :  { %5294 = vpow2.f32 %v1827_v33 }
 0xba5   :  { %1985 = vrot.lane.b32.xlu1 %v5867_v49, %s5627_s25 }
 0xbaa   :  { %v5295_v41 = vpop.eup %5294 }
 0xbab   :  { %v1842_v24 = vsel %vm623_vm10, %v5295_v41, 0.0 }
 0xbac   :  { %1843 = vadd.xlane.f32.xlu2 %v1842_v24 }
 0xbc4   :  { %5108 = vrot.lane.b32.xlu2 %v5949_v59, %s5627_s25 }
 0xbe6   :  { %v1591_v57 = vpop.f32.mrf.mxu3 }
 0xbe7   :  { %4896 = vmatmul.msk.f32.gmra.mxu3 %vm531_vm15, %v1591_v57 }
 0xbef   :  { %4897 = vmatmul.msk.f32.gmra.mxu3 %vm531_vm15, %v1629_v51 }
 0xbf7   :  { %4898 = vmatmul.msk.f32.gmra.mxu3 %vm531_vm15, %v1632_v45  ;;  %v1847_v39 = vpop.xlane.xlu1 %1846 }
 0xbf8   :  { %5296 = vrcp.f32 %v1847_v39  ;;  %v1922_v46 = vand.u32 2147483648, %v1847_v39  ;;  %vm1916_vm8 = vweird.f32 %v1847_v39  ;;  %v1920_v8 = vand.u32 2147483647, %v1847_v39 }
 0xbf9   :  { %v1976_v49 = vpop.f32.mrf.mxu2 }
 0xbfa   :  { %4918 = vmatmul.msk.f32.vlgmr.msra.gmra.mxu1 %vm531_vm15, %v1976_v49  ;;  %v1923_v15 = vor.u32 1.1754944e-38, %v1922_v46  ;;  %vm1921_vm11 = vcmp.eq.f32.partialorder %v1920_v8, 8.507059e+37  ;;  %v6320_v49 = vld [vmem:[#allocation7 + $0xb] ss:$0 sm:$0xff] }
 0xbfe   :  { %v5297_v62 = vpop.eup %5296 }
 0xbff   :  { %4899 = vmatmul.msk.f32.gmra.mxu3 %vm531_vm15, %v1635_v28  ;;  %v1850_v37 = vpop.xlane.xlu1 %1849  ;;  %v1912_v50 = vmul.f32 %v5297_v62, %v1847_v39  ;;  %vm1917_vm6 = vweird.f32 %v5297_v62 }
 0xc00   :  { %vm1918_vm9 = vmor %vm1916_vm8, %vm1917_vm6  ;;  %v1937_v24 = vand.u32 2147483648, %v1850_v37  ;;  %vm1931_vm13 = vweird.f32 %v1850_v37  ;;  %v1935_v51 = vand.u32 2147483647, %v1850_v37 }
 0xc01   :  { %v1913_v17 = vsub.f32 1.0, %v1912_v50 }
 0xc02   :  { %v1938_v57 = vor.u32 1.1754944e-38, %v1937_v24  ;;  %vm1936_vm1 = vcmp.eq.f32.partialorder %v1935_v51, 8.507059e+37  ;;  %v514_v51 = vadd.f32 %v6320_v49, %v5785_v43 }
 0xc03   :  { %v1914_v12 = vmul.f32 %v5297_v62, %v1913_v17 }
 0xc05   :  { %v1915_v35 = vadd.f32 %v5297_v62, %v1914_v12 }
 0xc06   :  { %v1979_v36 = vpop.f32.mrf.mxu2 }
 0xc07   :  { %4919 = vmatmul.msk.f32.gmra.mxu1 %vm531_vm15, %v1979_v36  ;;  %v1919_v0 = vsel %vm1918_vm9, %v5297_v62, %v1915_v35  ;;  %v510_v36 = vadd.f32 %v6320_v49, %v5705_v63 }
 0xc08   :  { %v1924_v48 = vsel %vm1921_vm11, %v1923_v15, %v1919_v0  ;;  %v513_v15 = vadd.f32 %v6320_v49, %v5792_v9 }
 0xc09   :  { %v1925_v23 = vmul.f32 %v6291_v11, %v1924_v48  ;;  %v909_v11 = vadd.f32 %v6162_v16, %v510_v36 }
 0xc0a   :  { %v912_v48 = vadd.f32 %v6168_v20, %v513_v15 }
 0xc0b   :  { %v1300_v39 = vadd.f32 %v6216_v5, %v909_v11  ;;  %v512_v5 = vadd.f32 %v6320_v49, %v5720_v22 }
 0xc0e   :  { %v1982_v59 = vpop.f32.mrf.mxu2 }
 0xc0f   :  { %4920 = vmatmul.msk.f32.gmra.mxu1 %vm531_vm15, %v1982_v59  ;;  %v1673_v59 = vpop.f32.mrf.mxu3 }
 0xc10   :  { %v1691_v62 = vadd.f32 %v1673_v59, %v1300_v39 }
 0xc17   :  { %v1986_v26 = vpop.permute.xlu1 %1985  ;;  %v1676_v17 = vpop.f32.mrf.mxu3 }
 0xc1f   :  { %v1844_v61 = vpop.xlane.xlu2 %1843 }
 0xc20   :  { %5298 = vrcp.f32 %v1844_v61  ;;  %v1907_v29 = vand.u32 2147483648, %v1844_v61  ;;  %v1905_v6 = vand.u32 2147483647, %v1844_v61  ;;  %vm1901_vm4 = vweird.f32 %v1844_v61 }
 0xc21   :  { %5300 = vrcp.f32 %v1850_v37 }
 0xc22   :  { %v1908_v40 = vor.u32 1.1754944e-38, %v1907_v29  ;;  %vm1906_vm7 = vcmp.eq.f32.partialorder %v1905_v6, 8.507059e+37 }
 0xc26   :  { %v5299_v4 = vpop.eup %5298 }
 0xc27   :  { %v1897_v54 = vmul.f32 %v5299_v4, %v1844_v61  ;;  %v5109_v19 = vpop.permute.xlu2 %5108  ;;  %v5301_v25 = vpop.eup %5300  ;;  %vm1902_vm3 = vweird.f32 %v5299_v4 }
 0xc28   :  { %v5110_v32 = vunpack.i.l.bf16 %v5109_v19  ;;  %v5111_v30 = vunpack.i.h.bf16 %v5109_v19  ;;  %v1927_v53 = vmul.f32 %v5301_v25, %v1850_v37  ;;  %vm1903_vm5 = vmor %vm1901_vm4, %vm1902_vm3  ;;  %vm1932_vm12 = vweird.f32 %v5301_v25 }
 0xc29   :  { %v1898_v27 = vsub.f32 1.0, %v1897_v54  ;;  %vm1933_vm14 = vmor %vm1931_vm13, %vm1932_vm12 }
 0xc2a   :  { %2016 = vmatpush.msrb.mxu0 %v5110_v32  ;;  %v1928_v58 = vsub.f32 1.0, %v1927_v53 }
 0xc2b   :  { %v1899_v21 = vmul.f32 %v5299_v4, %v1898_v27 }
 0xc2c   :  { %2017 = vmatpush.msrb.mxu0 %v5111_v30  ;;  %v1929_v3 = vmul.f32 %v5301_v25, %v1928_v58 }
 0xc2d   :  { %v1900_v55 = vadd.f32 %v5299_v4, %v1899_v21 }
 0xc2e   :  { %2018 = vmatpush.msrb.mxu0 %v1986_v26  ;;  %v1930_v33 = vadd.f32 %v5301_v25, %v1929_v3 }
 0xc2f   :  { %v1904_v47 = vsel %vm1903_vm5, %v5299_v4, %v1900_v55 }
 0xc30   :  { %v1909_v2 = vsel %vm1906_vm7, %v1908_v40, %v1904_v47 }
 0xc31   :  { %v1910_v38 = vmul.f32 %v5295_v41, %v1909_v2  ;;  %v1934_v41 = vsel %vm1933_vm14, %v5301_v25, %v1930_v33  ;;  %v911_v25 = vadd.f32 %v6166_v42, %v512_v5  ;;  %v1303_v33 = vadd.f32 %v6222_v13, %v912_v48 }
 0xc32   :  { %v1939_v45 = vsel %vm1936_vm1, %v1938_v57, %v1934_v41  ;;  %v515_v13 = vadd.f32 %v6320_v49, %v5812_v34  ;;  %v2239_v34 = vld [vmem:[#allocation6 + $0x58] sm:$0xff] }
 0xc33   :  { %4915 = vmatmul.msk.f32.vlgmr.msrb.gmra.mxu0 %vm623_vm10, %v1910_v38  ;;  %v1940_v28 = vmul.f32 %v6296_v52, %v1939_v45  ;;  %v511_v52 = vadd.f32 %v6320_v49, %v5699_v56  ;;  %v1302_v56 = vadd.f32 %v6220_v10, %v911_v25  ;;  %v913_v45 = vadd.f32 %v6172_v44, %v514_v51  ;;  %v2238_v49 = vld [vmem:[#allocation6 + $0x50] sm:$0xff] }
 0xc34   :  { %v914_v43 = vadd.f32 %v6176_v18, %v515_v13  ;;  %2272 = vmatpush.msra.mxu2 %v2239_v34  ;;  %v2237_v18 = vld [vmem:[#allocation6 + $0x48] sm:$0xff]  ;;  %v2361_v13 = vld [vmem:[#allocation6 + $0xc0] sm:$0xff] }
 0xc35   :  { %v910_v4 = vadd.f32 %v6164_v1, %v511_v52  ;;  %v1304_v9 = vadd.f32 %v6224_v31, %v913_v45  ;;  %v2236_v52 = vld [vmem:[#allocation6 + $0x40] sm:$0xff] }
 0xc36   :  { %v1305_v44 = vadd.f32 %v6230_v60, %v914_v43  ;;  %2273 = vmatpush.msra.mxu2 %v2238_v49 }
 0xc37   :  { %v1301_v63 = vadd.f32 %v6218_v7, %v910_v4 }
 0xc38   :  { %2274 = vmatpush.msra.mxu2 %v2237_v18 }
 0xc39   :  { %v1692_v16 = vadd.f32 %v1676_v17, %v1301_v63 }
 0xc3a   :  { %2275 = vmatpush.msra.mxu2 %v2236_v52 }
 0xc3b   :  { %4916 = vmatmul.msk.f32.gmra.mxu0 %vm623_vm10, %v1925_v23 }
 0xc43   :  { %4917 = vmatmul.msk.f32.gmra.mxu0 %vm623_vm10, %v1940_v28 }
 0xc6a   :  { %v1679_v27 = vpop.f32.mrf.mxu3 }
 0xc6b   :  { %v1693_v1 = vadd.f32 %v1679_v27, %v1302_v56 }
 0xc72   :  { %v1682_v3 = vpop.f32.mrf.mxu3 }
 0xc73   :  { %v1694_v24 = vadd.f32 %v1682_v3, %v1303_v33 }
 0xc77   :  { %v2064_v37 = vpop.f32.mrf.mxu1 }
 0xc78   :  { %v6326_v61 = vadd.f32 %v2064_v37, %v1691_v62 }
 0xc7a   :  { %v2090_v50 = vsel %vm143_vm0, %v6326_v61, 0.0  ;;  %v1685_v57 = vpop.f32.mrf.mxu3 }
 0xc7b   :  { %2091 = vadd.xlane.f32.xlu0 %v2090_v50  ;;  %v1695_v36 = vadd.f32 %v1685_v57, %v1304_v9 }
 0xc82   :  { %v1688_v39 = vpop.f32.mrf.mxu3 }
 0xc83   :  { %v1696_v62 = vadd.f32 %v1688_v39, %v1305_v44 }
 0xc84   :  { %v2067_v54 = vpop.f32.mrf.mxu1 }
 0xc85   :  { %v6336_v19 = vadd.f32 %v2067_v54, %v1692_v16 }
 0xc87   :  { %v2093_v32 = vsel %vm143_vm0, %v6336_v19, 0.0 }
 0xc88   :  { %2094 = vadd.xlane.f32.xlu2 %v2093_v32 }
 0xc8c   :  { %v2070_v29 = vpop.f32.mrf.mxu1 }
 0xc8d   :  { %v6342_v30 = vadd.f32 %v2070_v29, %v1693_v1  ;;  %v6396_v29 = vld [vmem:[#allocation7 + $0xc] ss:$0 sm:$0xff] }
 0xc8f   :  { %v2096_v7 = vsel %vm143_vm0, %v6342_v30, 0.0 }
 0xc90   :  { %2097 = vadd.xlane.f32.xlu0 %v2096_v7 }
 0xcb0   :  { %v2020_v22 = vpop.f32.mrf.mxu0 }
 0xcb1   :  { %4921 = vmatmul.msk.f32.gmra.mxu1 %vm531_vm15, %v2020_v22 }
 0xcb8   :  { %v2023_v12 = vpop.f32.mrf.mxu0 }
 0xcb9   :  { %4922 = vmatmul.msk.f32.gmra.mxu1 %vm531_vm15, %v2023_v12 }
 0xcc0   :  { %v2026_v42 = vpop.f32.mrf.mxu0 }
 0xcc1   :  { %4923 = vmatmul.msk.f32.gmra.mxu1 %vm531_vm15, %v2026_v42 }
 0xcee   :  { %v2092_v53 = vpop.xlane.xlu0 %2091 }
 0xcef   :  { %v2108_v10 = vmul.f32 %v2092_v53, %v5676_v14  ;;  %v6400_v53 = vld [vmem:[#allocation7 + $0xd] ss:$0 sm:$0xff] }
 0xcf1   :  { %v6351_v21 = vsub.f32 %v6326_v61, %v2108_v10 }
 0xcf3   :  { %v2120_v6 = vmul.f32 %v6351_v21, %v6351_v21 }
 0xcf5   :  { %v2126_v26 = vsel %vm143_vm0, %v2120_v6, 0.0 }
 0xcf6   :  { %2127 = vadd.xlane.f32.xlu0 %v2126_v26 }
 0xcfb   :  { %v2095_v55 = vpop.xlane.xlu2 %2094 }
 0xcfc   :  { %v2109_v40 = vmul.f32 %v2095_v55, %v5676_v14 }
 0xcfe   :  { %v6358_v58 = vsub.f32 %v6336_v19, %v2109_v40 }
 0xd00   :  { %v2121_v47 = vmul.f32 %v6358_v58, %v6358_v58 }
 0xd02   :  { %v2129_v35 = vsel %vm143_vm0, %v2121_v47, 0.0 }
 0xd03   :  { %v2098_v2 = vpop.xlane.xlu0 %2097  ;;  %2130 = vadd.xlane.f32.xlu1 %v2129_v35 }
 0xd04   :  { %v2110_v46 = vmul.f32 %v2098_v2, %v5676_v14 }
 0xd06   :  { %v6365_v38 = vsub.f32 %v6342_v30, %v2110_v46 }
 0xd08   :  { %v2122_v8 = vmul.f32 %v6365_v38, %v6365_v38 }
 0xd0a   :  { %v2132_v0 = vsel %vm143_vm0, %v2122_v8, 0.0 }
 0xd0b   :  { %2133 = vadd.xlane.f32.xlu0 %v2132_v0 }
 0xd2e   :  { %v2073_v23 = vpop.f32.mrf.mxu1 }
 0xd2f   :  { %v6376_v41 = vadd.f32 %v2073_v23, %v1694_v24 }
 0xd31   :  { %v2099_v28 = vsel %vm143_vm0, %v6376_v41, 0.0 }
 0xd32   :  { %2100 = vadd.xlane.f32.xlu0 %v2099_v28 }
 0xd36   :  { %v2076_v20 = vpop.f32.mrf.mxu1 }
 0xd37   :  { %v6384_v11 = vadd.f32 %v2076_v20, %v1695_v36  ;;  %v2363_v36 = vld [vmem:[#allocation6 + $0xd0] sm:$0xff]  ;;  %v2362_v20 = vld [vmem:[#allocation6 + $0xc8] sm:$0xff] }
 0xd39   :  { %v2102_v59 = vsel %vm143_vm0, %v6384_v11, 0.0 }
 0xd3a   :  { %2103 = vadd.xlane.f32.xlu0 %v2102_v59 }
 0xd3e   :  { %v2079_v37 = vpop.f32.mrf.mxu1 }
 0xd3f   :  { %v6390_v50 = vadd.f32 %v2079_v37, %v1696_v62 }
 0xd41   :  { %v2105_v31 = vsel %vm143_vm0, %v6390_v50, 0.0 }
 0xd42   :  { %2106 = vadd.xlane.f32.xlu2 %v2105_v31 }
 0xd69   :  { %v2128_v4 = vpop.xlane.xlu0 %2127 }
 0xd6a   :  { %v2144_v17 = vmul.f32 %v2128_v4, %v5676_v14 }
 0xd6c   :  { %v2150_v60 = vadd.f32 1e-05, %v2144_v17 }
 0xd6e   :  { %5302 = vrsqrt.f32 %v2150_v60  ;;  %vm2162_vm3 = vweird.f32 %v2150_v60 }
 0xd74   :  { %v5303_v63 = vpop.eup %5302 }
 0xd75   :  { %v2157_v16 = vmul.f32 %v5303_v63, %v2150_v60  ;;  %vm2163_vm2 = vweird.f32 %v5303_v63 }
 0xd76   :  { %v2131_v54 = vpop.xlane.xlu1 %2130  ;;  %vm2164_vm4 = vmor %vm2162_vm3, %vm2163_vm2 }
 0xd77   :  { %v2158_v5 = vmul.f32 %v5303_v63, %v2157_v16  ;;  %v2145_v25 = vmul.f32 %v2131_v54, %v5676_v14  ;;  %v2359_v16 = vld [vmem:[#allocation6 + $0xb0] sm:$0xff]  ;;  %v2358_v54 = vld [vmem:[#allocation6 + $0xa8] sm:$0xff] }
 0xd79   :  { %v2159_v32 = vmul.f32 0.5, %v2158_v5  ;;  %v2151_v27 = vadd.f32 1e-05, %v2145_v25  ;;  %v2357_v5 = vld [vmem:[#allocation6 + $0xa0] sm:$0xff]  ;;  %v2356_v25 = vld [vmem:[#allocation6 + $0x98] sm:$0xff] }
 0xd7b   :  { %v2160_v56 = vsub.f32 1.5, %v2159_v32  ;;  %5304 = vrsqrt.f32 %v2151_v27  ;;  %vm2172_vm6 = vweird.f32 %v2151_v27  ;;  %v2355_v32 = vld [vmem:[#allocation6 + $0x90] sm:$0xff] }
 0xd7d   :  { %v2161_v1 = vmul.f32 %v5303_v63, %v2160_v56  ;;  %v2353_v56 = vld [vmem:[#allocation6 + $0x80] sm:$0xff] }
 0xd7e   :  { %v2134_v7 = vpop.xlane.xlu0 %2133 }
 0xd7f   :  { %v2165_v22 = vsel %vm2164_vm4, %v5303_v63, %v2161_v1  ;;  %v2146_v12 = vmul.f32 %v2134_v7, %v5676_v14  ;;  %v2360_v63 = vld [vmem:[#allocation6 + $0xb8] sm:$0xff]  ;;  %v2351_v7 = vld [vmem:[#allocation6 + $0x70] sm:$0xff] }
 0xd80   :  { %v2216_v42 = vmul.f32 %v2165_v22, %v6351_v21  ;;  %v2352_v1 = vld [vmem:[#allocation6 + $0x78] sm:$0xff]  ;;  %v2350_v22 = vld [vmem:[#allocation6 + $0x68] sm:$0xff] }
 0xd81   :  { %v5305_v10 = vpop.eup %5304  ;;  %v2152_v6 = vadd.f32 1e-05, %v2146_v12  ;;  %v2349_v12 = vld [vmem:[#allocation6 + $0x60] sm:$0xff] }
 0xd82   :  { %v2223_v26 = vmul.f32 %v6396_v29, %v2216_v42  ;;  %v2167_v55 = vmul.f32 %v5305_v10, %v2151_v27  ;;  %vm2173_vm5 = vweird.f32 %v5305_v10  ;;  %v2354_v27 = vld [vmem:[#allocation6 + $0x88] sm:$0xff] }
 0xd83   :  { %5306 = vrsqrt.f32 %v2152_v6  ;;  %vm2174_vm7 = vmor %vm2172_vm6, %vm2173_vm5  ;;  %vm2182_vm9 = vweird.f32 %v2152_v6  ;;  %v6434_v42 = vld [vmem:[#allocation7 + $0xe] ss:$0 sm:$0xff] }
 0xd84   :  { %v2168_v40 = vmul.f32 %v5305_v10, %v2167_v55  ;;  %v2230_v47 = vadd.f32 %v6400_v53, %v2223_v26 }
 0xd86   :  { %v2169_v35 = vmul.f32 0.5, %v2168_v40  ;;  %4924 = vmatmul.msk.f32.vlgmr.msra.gmra.mxu2 %vm143_vm0, %v2230_v47 }
 0xd88   :  { %v2170_v2 = vsub.f32 1.5, %v2169_v35 }
 0xd89   :  { %v5307_v46 = vpop.eup %5306 }
 0xd8a   :  { %v2171_v8 = vmul.f32 %v5305_v10, %v2170_v2  ;;  %v2177_v21 = vmul.f32 %v5307_v46, %v2152_v6  ;;  %vm2183_vm8 = vweird.f32 %v5307_v46 }
 0xd8b   :  { %vm2184_vm11 = vmor %vm2182_vm9, %vm2183_vm8 }
 0xd8c   :  { %v2175_v0 = vsel %vm2174_vm7, %v5305_v10, %v2171_v8  ;;  %v2178_v3 = vmul.f32 %v5307_v46, %v2177_v21 }
 0xd8d   :  { %v2217_v15 = vmul.f32 %v2175_v0, %v6358_v58  ;;  %v2364_v58 = vld [vmem:[#allocation6 + $0xd8] sm:$0xff] }
 0xd8e   :  { %v2179_v48 = vmul.f32 0.5, %v2178_v3  ;;  %2365 = vmatpush.msra.mxu3 %v2364_v58 }
 0xd8f   :  { %v2224_v33 = vmul.f32 %v6396_v29, %v2217_v15 }
 0xd90   :  { %v2180_v24 = vsub.f32 1.5, %v2179_v48  ;;  %2366 = vmatpush.msra.mxu3 %v2363_v36 }
 0xd91   :  { %v2231_v23 = vadd.f32 %v6400_v53, %v2224_v33 }
 0xd92   :  { %v2181_v51 = vmul.f32 %v5307_v46, %v2180_v24  ;;  %2367 = vmatpush.msra.mxu3 %v2362_v20 }
 0xd93   :  { %4925 = vmatmul.msk.f32.gmra.mxu2 %vm143_vm0, %v2231_v23 }
 0xd94   :  { %v2185_v57 = vsel %vm2184_vm11, %v5307_v46, %v2181_v51  ;;  %2368 = vmatpush.msra.mxu3 %v2361_v13 }
 0xd95   :  { %v2218_v45 = vmul.f32 %v2185_v57, %v6365_v38 }
 0xd96   :  { %2369 = vmatpush.msra.mxu3 %v2360_v63 }
 0xd97   :  { %v2225_v28 = vmul.f32 %v6396_v29, %v2218_v45 }
 0xd98   :  { %2370 = vmatpush.msra.mxu3 %v2359_v16 }
 0xd99   :  { %v2232_v9 = vadd.f32 %v6400_v53, %v2225_v28 }
 0xd9a   :  { %2371 = vmatpush.msra.mxu3 %v2358_v54 }
 0xd9b   :  { %4926 = vmatmul.msk.f32.gmra.mxu2 %vm143_vm0, %v2232_v9 }
 0xd9c   :  { %2372 = vmatpush.msra.mxu3 %v2357_v5 }
 0xd9e   :  { %2373 = vmatpush.msra.mxu3 %v2356_v25 }
 0xda0   :  { %2374 = vmatpush.msra.mxu3 %v2355_v32 }
 0xda2   :  { %2375 = vmatpush.msra.mxu3 %v2354_v27 }
 0xda4   :  { %2376 = vmatpush.msra.mxu3 %v2353_v56 }
 0xda5   :  { %v2101_v43 = vpop.xlane.xlu0 %2100 }
 0xda6   :  { %v2111_v59 = vmul.f32 %v2101_v43, %v5676_v14  ;;  %2377 = vmatpush.msra.mxu3 %v2352_v1 }
 0xda8   :  { %v6415_v39 = vsub.f32 %v6376_v41, %v2111_v59  ;;  %2378 = vmatpush.msra.mxu3 %v2351_v7 }
 0xdaa   :  { %v2123_v38 = vmul.f32 %v6415_v39, %v6415_v39  ;;  %2379 = vmatpush.msra.mxu3 %v2350_v22 }
 0xdac   :  { %v2135_v44 = vsel %vm143_vm0, %v2123_v38, 0.0  ;;  %2380 = vmatpush.msra.mxu3 %v2349_v12 }
 0xdad   :  { %2136 = vadd.xlane.f32.xlu0 %v2135_v44  ;;  %v2104_v62 = vpop.xlane.xlu0 %2103 }
 0xdae   :  { %v2112_v37 = vmul.f32 %v2104_v62, %v5676_v14 }
 0xdb0   :  { %v6422_v31 = vsub.f32 %v6384_v11, %v2112_v37 }
 0xdb2   :  { %v2124_v34 = vmul.f32 %v6422_v31, %v6422_v31 }
 0xdb4   :  { %v2138_v49 = vsel %vm143_vm0, %v2124_v34, 0.0 }
 0xdb5   :  { %2139 = vadd.xlane.f32.xlu2 %v2138_v49  ;;  %v2107_v18 = vpop.xlane.xlu2 %2106 }
 0xdb6   :  { %v2113_v52 = vmul.f32 %v2107_v18, %v5676_v14 }
 0xdb8   :  { %v6429_v4 = vsub.f32 %v6390_v50, %v2113_v52 }
 0xdba   :  { %v2125_v17 = vmul.f32 %v6429_v4, %v6429_v4 }
 0xdbc   :  { %v2141_v60 = vsel %vm143_vm0, %v2125_v17, 0.0 }
 0xdbd   :  { %2142 = vadd.xlane.f32.xlu0 %v2141_v60 }
 0xe09   :  { %v2277_v10 = vpop.f32.mrf.mxu2 }
 0xe0a   :  { %v2278_v6 = vadd.f32 %v6434_v42, %v2277_v10 }
 0xe0c   :  { %v2301_v26 = vmul.f32 %v2278_v6, %v2278_v6  ;;  %v2295_v3 = vmul.f32 0.5, %v2278_v6 }
 0xe0e   :  { %v2307_v55 = vmul.f32 %v2301_v26, %v2278_v6 }
 0xe10   :  { %v2313_v40 = vmul.f32 0.044715, %v2307_v55 }
 0xe12   :  { %v2319_v47 = vadd.f32 %v2313_v40, %v2278_v6 }
 0xe14   :  { %v2325_v35 = vmul.f32 0.7978845, %v2319_v47 }
 0xe16   :  { %5308 = vtanh.f32 %v2325_v35  ;;  %v2280_v2 = vpop.f32.mrf.mxu2 }
 0xe17   :  { %v2281_v46 = vadd.f32 %v6434_v42, %v2280_v2 }
 0xe19   :  { %v2302_v8 = vmul.f32 %v2281_v46, %v2281_v46  ;;  %v2296_v62 = vmul.f32 0.5, %v2281_v46 }
 0xe1b   :  { %v2308_v21 = vmul.f32 %v2302_v8, %v2281_v46 }
 0xe1c   :  { %v5309_v0 = vpop.eup %5308 }
 0xe1d   :  { %v2337_v15 = vadd.f32 1.0, %v5309_v0  ;;  %v2314_v48 = vmul.f32 0.044715, %v2308_v21 }
 0xe1e   :  { %v2283_v33 = vpop.f32.mrf.mxu2 }
 0xe1f   :  { %v2284_v24 = vadd.f32 %v6434_v42, %v2283_v33  ;;  %v2343_v23 = vmul.f32 %v2337_v15, %v2295_v3  ;;  %v2320_v51 = vadd.f32 %v2314_v48, %v2281_v46 }
 0xe20   :  { %v2137_v57 = vpop.xlane.xlu0 %2136 }
 0xe21   :  { %v2303_v45 = vmul.f32 %v2284_v24, %v2284_v24  ;;  %v2147_v28 = vmul.f32 %v2137_v57, %v5676_v14  ;;  %2381 = vmatmul.f32.vlgmr.msra.gmra.mxu3 %v2343_v23  ;;  %v2326_v9 = vmul.f32 0.7978845, %v2320_v51  ;;  %v2297_v25 = vmul.f32 0.5, %v2284_v24 }
 0xe23   :  { %v2153_v58 = vadd.f32 1e-05, %v2147_v28  ;;  %5310 = vtanh.f32 %v2326_v9  ;;  %v2309_v36 = vmul.f32 %v2303_v45, %v2284_v24 }
 0xe25   :  { %5312 = vrsqrt.f32 %v2153_v58  ;;  %v2315_v20 = vmul.f32 0.044715, %v2309_v36  ;;  %vm2192_vm13 = vweird.f32 %v2153_v58 }
 0xe27   :  { %v2321_v13 = vadd.f32 %v2315_v20, %v2284_v24 }
 0xe28   :  { %v2140_v43 = vpop.xlane.xlu2 %2139 }
 0xe29   :  { %v5311_v59 = vpop.eup %5310  ;;  %v2148_v38 = vmul.f32 %v2140_v43, %v5676_v14  ;;  %v2327_v44 = vmul.f32 0.7978845, %v2321_v13 }
 0xe2a   :  { %v2338_v37 = vadd.f32 1.0, %v5311_v59 }
 0xe2b   :  { %v5313_v34 = vpop.eup %5312  ;;  %v2154_v49 = vadd.f32 1e-05, %v2148_v38  ;;  %5314 = vtanh.f32 %v2327_v44 }
 0xe2c   :  { %v2187_v18 = vmul.f32 %v5313_v34, %v2153_v58  ;;  %v2344_v52 = vmul.f32 %v2338_v37, %v2296_v62  ;;  %vm2193_vm12 = vweird.f32 %v5313_v34 }
 0xe2d   :  { %5316 = vrsqrt.f32 %v2154_v49  ;;  %vm2194_vm14 = vmor %vm2192_vm13, %vm2193_vm12  ;;  %vm2202_vm2 = vweird.f32 %v2154_v49 }
 0xe2e   :  { %v2188_v17 = vmul.f32 %v5313_v34, %v2187_v18  ;;  %2384 = vmatmul.f32.gmra.mxu3 %v2344_v52 }
 0xe30   :  { %v2189_v60 = vmul.f32 0.5, %v2188_v17  ;;  %v2143_v63 = vpop.xlane.xlu0 %2142 }
 0xe31   :  { %v5315_v16 = vpop.eup %5314  ;;  %v2149_v54 = vmul.f32 %v2143_v63, %v5676_v14 }
 0xe32   :  { %v2190_v5 = vsub.f32 1.5, %v2189_v60  ;;  %v2339_v32 = vadd.f32 1.0, %v5315_v16 }
 0xe33   :  { %v5317_v27 = vpop.eup %5316  ;;  %v2155_v56 = vadd.f32 1e-05, %v2149_v54 }
 0xe34   :  { %v2191_v1 = vmul.f32 %v5313_v34, %v2190_v5  ;;  %v2197_v7 = vmul.f32 %v5317_v27, %v2154_v49  ;;  %v2345_v22 = vmul.f32 %v2339_v32, %v2297_v25  ;;  %vm2203_vm1 = vweird.f32 %v5317_v27 }
 0xe35   :  { %5318 = vrsqrt.f32 %v2155_v56  ;;  %vm2204_vm3 = vmor %vm2202_vm2, %vm2203_vm1  ;;  %vm2212_vm5 = vweird.f32 %v2155_v56 }
 0xe36   :  { %v2195_v12 = vsel %vm2194_vm14, %v5313_v34, %v2191_v1  ;;  %v2198_v10 = vmul.f32 %v5317_v27, %v2197_v7  ;;  %2387 = vmatmul.f32.gmra.mxu3 %v2345_v22 }
 0xe37   :  { %v2219_v6 = vmul.f32 %v2195_v12, %v6415_v39 }
 0xe38   :  { %v2199_v26 = vmul.f32 0.5, %v2198_v10 }
 0xe39   :  { %v2226_v55 = vmul.f32 %v6396_v29, %v2219_v6 }
 0xe3a   :  { %v2200_v40 = vsub.f32 1.5, %v2199_v26 }
 0xe3b   :  { %v5319_v47 = vpop.eup %5318  ;;  %v2233_v35 = vadd.f32 %v6400_v53, %v2226_v55 }
 0xe3c   :  { %v2201_v2 = vmul.f32 %v5317_v27, %v2200_v40  ;;  %v2207_v46 = vmul.f32 %v5319_v47, %v2155_v56  ;;  %vm2213_vm4 = vweird.f32 %v5319_v47 }
 0xe3d   :  { %4927 = vmatmul.msk.f32.gmra.mxu2 %vm143_vm0, %v2233_v35  ;;  %vm2214_vm6 = vmor %vm2212_vm5, %vm2213_vm4 }
 0xe3e   :  { %v2208_v8 = vmul.f32 %v5319_v47, %v2207_v46  ;;  %v2205_v21 = vsel %vm2204_vm3, %v5317_v27, %v2201_v2 }
 0xe3f   :  { %v2220_v0 = vmul.f32 %v2205_v21, %v6422_v31  ;;  %v6454_v31 = vld [vmem:[#allocation7 + $0xf] ss:$0 sm:$0xff] }
 0xe40   :  { %v2209_v3 = vmul.f32 0.5, %v2208_v8 }
 0xe41   :  { %v2227_v39 = vmul.f32 %v6396_v29, %v2220_v0 }
 0xe42   :  { %v2210_v15 = vsub.f32 1.5, %v2209_v3 }
 0xe43   :  { %v2234_v48 = vadd.f32 %v6400_v53, %v2227_v39 }
 0xe44   :  { %v2211_v33 = vmul.f32 %v5319_v47, %v2210_v15 }
 0xe45   :  { %4928 = vmatmul.msk.f32.gmra.mxu2 %vm143_vm0, %v2234_v48 }
 0xe46   :  { %v2215_v24 = vsel %vm2214_vm6, %v5319_v47, %v2211_v33 }
 0xe47   :  { %v2221_v23 = vmul.f32 %v2215_v24, %v6429_v4 }
 0xe49   :  { %v2228_v51 = vmul.f32 %v6396_v29, %v2221_v23 }
 0xe4b   :  { %v2235_v57 = vadd.f32 %v6400_v53, %v2228_v51 }
 0xe4d   :  { %4929 = vmatmul.msk.f32.gmra.mxu2 %vm143_vm0, %v2235_v57 }
 0xea4   :  { %v2382_v45 = vpop.f32.mrf.mxu3 }
 0xea5   :  { %v2400_v28 = vadd.f32 %v2382_v45, %v6326_v61 }
 0xea7   :  { %v6458_v9 = vadd.f32 %v6454_v31, %v2400_v28 }
 0xea9   :  { %v2416_v58 = vsel %vm143_vm0, %v6458_v9, 0.0 }
 0xeaa   :  { %2417 = vadd.xlane.f32.xlu2 %v2416_v58 }
 0xeb1   :  { %v2385_v36 = vpop.f32.mrf.mxu3 }
 0xeb2   :  { %v2401_v4 = vadd.f32 %v2385_v36, %v6336_v19 }
 0xeb4   :  { %v6464_v29 = vadd.f32 %v6454_v31, %v2401_v4 }
 0xeb6   :  { %v2419_v53 = vsel %vm143_vm0, %v6464_v29, 0.0 }
 0xeb7   :  { %2420 = vadd.xlane.f32.xlu0 %v2419_v53 }
 0xeb9   :  { %v2388_v20 = vpop.f32.mrf.mxu3 }
 0xeba   :  { %v2402_v61 = vadd.f32 %v2388_v20, %v6342_v30 }
 0xebc   :  { %v6470_v13 = vadd.f32 %v6454_v31, %v2402_v61 }
 0xebe   :  { %v2422_v43 = vsel %vm143_vm0, %v6470_v13, 0.0 }
 0xebf   :  { %2423 = vadd.xlane.f32.xlu1 %v2422_v43 }
 0xec0   :  { %v2286_v59 = vpop.f32.mrf.mxu2 }
 0xec1   :  { %v2287_v19 = vadd.f32 %v6434_v42, %v2286_v59 }
 0xec3   :  { %v2304_v38 = vmul.f32 %v2287_v19, %v2287_v19  ;;  %v2298_v32 = vmul.f32 0.5, %v2287_v19 }
 0xec5   :  { %v2310_v44 = vmul.f32 %v2304_v38, %v2287_v19 }
 0xec7   :  { %v2316_v62 = vmul.f32 0.044715, %v2310_v44  ;;  %v2566_v44 = vld [vmem:[#allocation6 + $0xf8] sm:$0xff] }
 0xec8   :  { %v2289_v37 = vpop.f32.mrf.mxu2  ;;  %2599 = vmatpush.msra.mxu0 %v2566_v44 }
 0xec9   :  { %v2290_v34 = vadd.f32 %v6434_v42, %v2289_v37  ;;  %v2322_v49 = vadd.f32 %v2316_v62, %v2287_v19  ;;  %v2564_v62 = vld [vmem:[#allocation6 + $0xe8] sm:$0xff]  ;;  %v2563_v37 = vld [vmem:[#allocation6 + $0xe0] sm:$0xff] }
 0xecb   :  { %v2305_v18 = vmul.f32 %v2290_v34, %v2290_v34  ;;  %v2328_v52 = vmul.f32 0.7978845, %v2322_v49  ;;  %v2299_v6 = vmul.f32 0.5, %v2290_v34 }
 0xecd   :  { %5320 = vtanh.f32 %v2328_v52  ;;  %v2311_v30 = vmul.f32 %v2305_v18, %v2290_v34 }
 0xecf   :  { %v2317_v17 = vmul.f32 0.044715, %v2311_v30 }
 0xed0   :  { %v2292_v60 = vpop.f32.mrf.mxu2 }
 0xed1   :  { %v2293_v63 = vadd.f32 %v6434_v42, %v2292_v60  ;;  %v2323_v16 = vadd.f32 %v2317_v17, %v2290_v34 }
 0xed3   :  { %v5321_v54 = vpop.eup %5320  ;;  %v2306_v5 = vmul.f32 %v2293_v63, %v2293_v63  ;;  %v2329_v25 = vmul.f32 0.7978845, %v2323_v16  ;;  %v2300_v40 = vmul.f32 0.5, %v2293_v63 }
 0xed4   :  { %v2340_v27 = vadd.f32 1.0, %v5321_v54 }
 0xed5   :  { %5322 = vtanh.f32 %v2329_v25  ;;  %v2312_v56 = vmul.f32 %v2306_v5, %v2293_v63  ;;  %v6514_v5 = vld [vmem:[#allocation7 + $0x10] ss:$0 sm:$0xff] }
 0xed6   :  { %v2346_v1 = vmul.f32 %v2340_v27, %v2298_v32 }
 0xed7   :  { %v2318_v7 = vmul.f32 0.044715, %v2312_v56 }
 0xed8   :  { %2390 = vmatmul.f32.gmra.mxu3 %v2346_v1  ;;  %v6517_v1 = vld [vmem:[#allocation7 + $0x11] ss:$0 sm:$0xff] }
 0xed9   :  { %v2324_v22 = vadd.f32 %v2318_v7, %v2293_v63 }
 0xedb   :  { %v5323_v12 = vpop.eup %5322  ;;  %v2330_v10 = vmul.f32 0.7978845, %v2324_v22 }
 0xedc   :  { %v2341_v26 = vadd.f32 1.0, %v5323_v12 }
 0xedd   :  { %5324 = vtanh.f32 %v2330_v10 }
 0xede   :  { %v2347_v55 = vmul.f32 %v2341_v26, %v2299_v6 }
 0xee0   :  { %2393 = vmatmul.f32.gmra.mxu3 %v2347_v55 }
 0xee3   :  { %v5325_v42 = vpop.eup %5324 }
 0xee4   :  { %v2342_v47 = vadd.f32 1.0, %v5325_v42 }
 0xee6   :  { %v2348_v35 = vmul.f32 %v2342_v47, %v2300_v40 }
 0xee8   :  { %2396 = vmatmul.f32.gmra.mxu3 %v2348_v35 }
 0xf1d   :  { %v2418_v2 = vpop.xlane.xlu2 %2417 }
 0xf1e   :  { %v2434_v46 = vmul.f32 %v2418_v2, %v5676_v14 }
 0xf20   :  { %v2440_v8 = vsub.f32 %v6458_v9, %v2434_v46 }
 0xf22   :  { %v2446_v21 = vmul.f32 %v2440_v8, %v2440_v8 }
 0xf24   :  { %v2452_v0 = vsel %vm143_vm0, %v2446_v21, 0.0 }
 0xf25   :  { %2453 = vadd.xlane.f32.xlu2 %v2452_v0 }
 0xf2a   :  { %v2421_v3 = vpop.xlane.xlu0 %2420 }
 0xf2b   :  { %v2435_v39 = vmul.f32 %v2421_v3, %v5676_v14 }
 0xf2d   :  { %v6482_v15 = vsub.f32 %v6464_v29, %v2435_v39 }
 0xf2f   :  { %v2447_v48 = vmul.f32 %v6482_v15, %v6482_v15 }
 0xf31   :  { %v2455_v33 = vsel %vm143_vm0, %v2447_v48, 0.0 }
 0xf32   :  { %v2424_v24 = vpop.xlane.xlu1 %2423  ;;  %2456 = vadd.xlane.f32.xlu0 %v2455_v33 }
 0xf33   :  { %v2436_v23 = vmul.f32 %v2424_v24, %v5676_v14 }
 0xf35   :  { %v6489_v51 = vsub.f32 %v6470_v13, %v2436_v23 }
 0xf37   :  { %v2448_v57 = vmul.f32 %v6489_v51, %v6489_v51 }
 0xf39   :  { %v2458_v45 = vsel %vm143_vm0, %v2448_v57, 0.0 }
 0xf3a   :  { %2459 = vadd.xlane.f32.xlu1 %v2458_v45 }
 0xf5b   :  { %v2391_v28 = vpop.f32.mrf.mxu3 }
 0xf5c   :  { %v2403_v58 = vadd.f32 %v2391_v28, %v6376_v41 }
 0xf5e   :  { %v6496_v36 = vadd.f32 %v6454_v31, %v2403_v58 }
 0xf60   :  { %v2425_v4 = vsel %vm143_vm0, %v6496_v36, 0.0 }
 0xf61   :  { %2426 = vadd.xlane.f32.xlu2 %v2425_v4 }
 0xf63   :  { %v2394_v53 = vpop.f32.mrf.mxu3 }
 0xf64   :  { %v2404_v20 = vadd.f32 %v2394_v53, %v6384_v11  ;;  %v2565_v11 = vld [vmem:[#allocation6 + $0xf0] sm:$0xff] }
 0xf65   :  { %2600 = vmatpush.msra.mxu0 %v2565_v11 }
 0xf66   :  { %v6502_v61 = vadd.f32 %v6454_v31, %v2404_v20 }
 0xf67   :  { %2601 = vmatpush.msra.mxu0 %v2564_v62 }
 0xf68   :  { %v2428_v43 = vsel %vm143_vm0, %v6502_v61, 0.0 }
 0xf69   :  { %2429 = vadd.xlane.f32.xlu0 %v2428_v43  ;;  %2602 = vmatpush.msra.mxu0 %v2563_v37  ;;  %v6543_v37 = vld [vmem:[#allocation7 + $0x12] ss:$0 sm:$0xff] }
 0xf6b   :  { %v2397_v59 = vpop.f32.mrf.mxu3 }
 0xf6c   :  { %v2405_v41 = vadd.f32 %v2397_v59, %v6390_v50 }
 0xf6e   :  { %v6508_v19 = vadd.f32 %v6454_v31, %v2405_v41 }
 0xf70   :  { %v2431_v38 = vsel %vm143_vm0, %v6508_v19, 0.0 }
 0xf71   :  { %2432 = vadd.xlane.f32.xlu1 %v2431_v38 }
 0xf98   :  { %v2454_v34 = vpop.xlane.xlu2 %2453 }
 0xf99   :  { %v2470_v49 = vmul.f32 %v2454_v34, %v5676_v14 }
 0xf9b   :  { %v2476_v18 = vadd.f32 1e-05, %v2470_v49 }
 0xf9d   :  { %5326 = vrsqrt.f32 %v2476_v18  ;;  %vm2488_vm8 = vweird.f32 %v2476_v18 }
 0xfa3   :  { %v5327_v50 = vpop.eup %5326 }
 0xfa4   :  { %v2483_v31 = vmul.f32 %v5327_v50, %v2476_v18  ;;  %vm2489_vm7 = vweird.f32 %v5327_v50 }
 0xfa5   :  { %v2457_v52 = vpop.xlane.xlu0 %2456  ;;  %vm2490_vm9 = vmor %vm2488_vm8, %vm2489_vm7 }
 0xfa6   :  { %v2484_v30 = vmul.f32 %v5327_v50, %v2483_v31  ;;  %v2471_v17 = vmul.f32 %v2457_v52, %v5676_v14 }
 0xfa8   :  { %v2485_v60 = vmul.f32 0.5, %v2484_v30  ;;  %v2477_v63 = vadd.f32 1e-05, %v2471_v17 }
 0xfaa   :  { %v2486_v16 = vsub.f32 1.5, %v2485_v60  ;;  %5328 = vrsqrt.f32 %v2477_v63  ;;  %vm2498_vm12 = vweird.f32 %v2477_v63 }
 0xfac   :  { %v2487_v54 = vmul.f32 %v5327_v50, %v2486_v16 }
 0xfad   :  { %v2460_v25 = vpop.xlane.xlu1 %2459 }
 0xfae   :  { %v2491_v32 = vsel %vm2490_vm9, %v5327_v50, %v2487_v54  ;;  %v2472_v27 = vmul.f32 %v2460_v25, %v5676_v14 }
 0xfaf   :  { %v2542_v56 = vmul.f32 %v2491_v32, %v2440_v8 }
 0xfb0   :  { %v5329_v7 = vpop.eup %5328  ;;  %v2478_v22 = vadd.f32 1e-05, %v2472_v27 }
 0xfb1   :  { %v2549_v12 = vmul.f32 %v6514_v5, %v2542_v56  ;;  %v2493_v10 = vmul.f32 %v5329_v7, %v2477_v63  ;;  %vm2499_vm11 = vweird.f32 %v5329_v7 }
 0xfb2   :  { %5330 = vrsqrt.f32 %v2478_v22  ;;  %vm2500_vm13 = vmor %vm2498_vm12, %vm2499_vm11  ;;  %vm2508_vm1 = vweird.f32 %v2478_v22 }
 0xfb3   :  { %v2494_v6 = vmul.f32 %v5329_v7, %v2493_v10  ;;  %v2556_v26 = vadd.f32 %v6517_v1, %v2549_v12 }
 0xfb5   :  { %v2495_v55 = vmul.f32 0.5, %v2494_v6  ;;  %4930 = vmatmul.msk.f32.vlgmr.msra.gmra.mxu0 %vm143_vm0, %v2556_v26 }
 0xfb7   :  { %v2496_v42 = vsub.f32 1.5, %v2495_v55 }
 0xfb8   :  { %v5331_v40 = vpop.eup %5330 }
 0xfb9   :  { %v2497_v47 = vmul.f32 %v5329_v7, %v2496_v42  ;;  %v2503_v35 = vmul.f32 %v5331_v40, %v2478_v22  ;;  %vm2509_vm14 = vweird.f32 %v5331_v40 }
 0xfba   :  { %vm2510_vm2 = vmor %vm2508_vm1, %vm2509_vm14 }
 0xfbb   :  { %v2501_v2 = vsel %vm2500_vm13, %v5329_v7, %v2497_v47  ;;  %v2504_v46 = vmul.f32 %v5331_v40, %v2503_v35 }
 0xfbc   :  { %v2543_v8 = vmul.f32 %v2501_v2, %v6482_v15 }
 0xfbd   :  { %v2505_v21 = vmul.f32 0.5, %v2504_v46 }
 0xfbe   :  { %v2550_v0 = vmul.f32 %v6514_v5, %v2543_v8 }
 0xfbf   :  { %v2506_v3 = vsub.f32 1.5, %v2505_v21 }
 0xfc0   :  { %v2557_v39 = vadd.f32 %v6517_v1, %v2550_v0 }
 0xfc1   :  { %v2507_v48 = vmul.f32 %v5331_v40, %v2506_v3 }
 0xfc2   :  { %4931 = vmatmul.msk.f32.gmra.mxu0 %vm143_vm0, %v2557_v39 }
 0xfc3   :  { %v2511_v33 = vsel %vm2510_vm2, %v5331_v40, %v2507_v48 }
 0xfc4   :  { %v2544_v24 = vmul.f32 %v2511_v33, %v6489_v51 }
 0xfc6   :  { %v2551_v23 = vmul.f32 %v6514_v5, %v2544_v24 }
 0xfc8   :  { %v2558_v57 = vadd.f32 %v6517_v1, %v2551_v23 }
 0xfca   :  { %4932 = vmatmul.msk.f32.gmra.mxu0 %vm143_vm0, %v2558_v57 }
 0xfd4   :  { %v2427_v15 = vpop.xlane.xlu2 %2426 }
 0xfd5   :  { %v2437_v45 = vmul.f32 %v2427_v15, %v5676_v14 }
 0xfd7   :  { %v2443_v28 = vsub.f32 %v6496_v36, %v2437_v45 }
 0xfd9   :  { %v2449_v58 = vmul.f32 %v2443_v28, %v2443_v28 }
 0xfdb   :  { %v2461_v4 = vsel %vm143_vm0, %v2449_v58, 0.0 }
 0xfdc   :  { %v2430_v53 = vpop.xlane.xlu0 %2429  ;;  %2462 = vadd.xlane.f32.xlu2 %v2461_v4 }
 0xfdd   :  { %v2438_v20 = vmul.f32 %v2430_v53, %v5676_v14 }
 0xfdf   :  { %v2444_v51 = vsub.f32 %v6502_v61, %v2438_v20 }
 0xfe1   :  { %v2450_v43 = vmul.f32 %v2444_v51, %v2444_v51 }
 0xfe3   :  { %v2464_v59 = vsel %vm143_vm0, %v2450_v43, 0.0 }
 0xfe4   :  { %2465 = vadd.xlane.f32.xlu0 %v2464_v59  ;;  %v2433_v41 = vpop.xlane.xlu1 %2432 }
 0xfe5   :  { %v2439_v38 = vmul.f32 %v2433_v41, %v5676_v14 }
 0xfe7   :  { %v6538_v44 = vsub.f32 %v6508_v19, %v2439_v38 }
 0xfe9   :  { %v2451_v11 = vmul.f32 %v6538_v44, %v6538_v44 }
 0xfeb   :  { %v2467_v62 = vsel %vm143_vm0, %v2451_v11, 0.0 }
 0xfec   :  { %2468 = vadd.xlane.f32.xlu1 %v2467_v62 }
0x1032   :  { %v2604_v34 = vpop.f32.mrf.mxu0 }
0x1033   :  { %v6546_v49 = vadd.f32 %v6543_v37, %v2604_v34 }
0x1035   :  { %2643 = vrot.lane.b32.xlu1 %v6546_v49, %s5617_s2  ;;  %v6577_v59 = vmul.f32 0.35355338, %v6546_v49 }
0x103f   :  { %v2607_v18 = vpop.f32.mrf.mxu0 }
0x1040   :  { %v6551_v50 = vadd.f32 %v6543_v37, %v2607_v18 }
0x1042   :  { %2645 = vrot.lane.b32.xlu0 %v6551_v50, %s5617_s2 }
0x1047   :  { %v2610_v31 = vpop.f32.mrf.mxu0 }
0x1048   :  { %v6556_v52 = vadd.f32 %v6543_v37, %v2610_v31 }
0x104a   :  { %2647 = vrot.lane.b32.xlu2 %v6556_v52, %s5617_s2  ;;  %v6614_v18 = vpack.i.bf16 %v6551_v50, %v6556_v52 }
0x104f   :  { %v2463_v30 = vpop.xlane.xlu2 %2462 }
0x1050   :  { %v2473_v17 = vmul.f32 %v2463_v30, %v5676_v14 }
0x1052   :  { %v2479_v60 = vadd.f32 1e-05, %v2473_v17 }
0x1054   :  { %5332 = vrsqrt.f32 %v2479_v60  ;;  %vm2518_vm4 = vweird.f32 %v2479_v60 }
0x1057   :  { %v2466_v63 = vpop.xlane.xlu0 %2465 }
0x1058   :  { %v2474_v16 = vmul.f32 %v2466_v63, %v5676_v14 }
0x105a   :  { %v5333_v54 = vpop.eup %5332  ;;  %v2480_v25 = vadd.f32 1e-05, %v2474_v16 }
0x105b   :  { %v2513_v32 = vmul.f32 %v5333_v54, %v2479_v60  ;;  %vm2519_vm3 = vweird.f32 %v5333_v54 }
0x105c   :  { %5334 = vrsqrt.f32 %v2480_v25  ;;  %vm2520_vm5 = vmor %vm2518_vm4, %vm2519_vm3  ;;  %vm2528_vm7 = vweird.f32 %v2480_v25 }
0x105d   :  { %v2514_v27 = vmul.f32 %v5333_v54, %v2513_v32 }
0x105f   :  { %v2515_v56 = vmul.f32 0.5, %v2514_v27  ;;  %v2469_v7 = vpop.xlane.xlu1 %2468 }
0x1060   :  { %v2475_v22 = vmul.f32 %v2469_v7, %v5676_v14 }
0x1061   :  { %v2516_v12 = vsub.f32 1.5, %v2515_v56 }
0x1062   :  { %v5335_v10 = vpop.eup %5334  ;;  %v2481_v6 = vadd.f32 1e-05, %v2475_v22 }
0x1063   :  { %v2517_v26 = vmul.f32 %v5333_v54, %v2516_v12  ;;  %v2523_v55 = vmul.f32 %v5335_v10, %v2480_v25  ;;  %vm2529_vm6 = vweird.f32 %v5335_v10 }
0x1064   :  { %5336 = vrsqrt.f32 %v2481_v6  ;;  %vm2530_vm8 = vmor %vm2528_vm7, %vm2529_vm6  ;;  %vm2538_vm11 = vweird.f32 %v2481_v6 }
0x1065   :  { %v2521_v42 = vsel %vm2520_vm5, %v5333_v54, %v2517_v26  ;;  %v2524_v40 = vmul.f32 %v5335_v10, %v2523_v55 }
0x1066   :  { %v2545_v47 = vmul.f32 %v2521_v42, %v2443_v28 }
0x1067   :  { %v2525_v35 = vmul.f32 0.5, %v2524_v40 }
0x1068   :  { %v2552_v2 = vmul.f32 %v6514_v5, %v2545_v47 }
0x1069   :  { %v2526_v46 = vsub.f32 1.5, %v2525_v35 }
0x106a   :  { %v5337_v8 = vpop.eup %5336  ;;  %v2559_v21 = vadd.f32 %v6517_v1, %v2552_v2 }
0x106b   :  { %v2527_v0 = vmul.f32 %v5335_v10, %v2526_v46  ;;  %v2533_v3 = vmul.f32 %v5337_v8, %v2481_v6  ;;  %vm2539_vm9 = vweird.f32 %v5337_v8 }
0x106c   :  { %4933 = vmatmul.msk.f32.gmra.mxu0 %vm143_vm0, %v2559_v21  ;;  %vm2540_vm12 = vmor %vm2538_vm11, %vm2539_vm9 }
0x106d   :  { %v2531_v39 = vsel %vm2530_vm8, %v5335_v10, %v2527_v0  ;;  %v2534_v48 = vmul.f32 %v5337_v8, %v2533_v3 }
0x106e   :  { %v2546_v33 = vmul.f32 %v2531_v39, %v2444_v51 }
0x106f   :  { %v2535_v24 = vmul.f32 0.5, %v2534_v48 }
0x1070   :  { %v2553_v23 = vmul.f32 %v6514_v5, %v2546_v33 }
0x1071   :  { %v2536_v57 = vsub.f32 1.5, %v2535_v24 }
0x1072   :  { %v2560_v15 = vadd.f32 %v6517_v1, %v2553_v23 }
0x1073   :  { %v2537_v45 = vmul.f32 %v5337_v8, %v2536_v57 }
0x1074   :  { %4934 = vmatmul.msk.f32.gmra.mxu0 %vm143_vm0, %v2560_v15 }
0x1075   :  { %v2541_v28 = vsel %vm2540_vm12, %v5337_v8, %v2537_v45 }
0x1076   :  { %v2547_v58 = vmul.f32 %v2541_v28, %v6538_v44 }
0x1078   :  { %v2554_v4 = vmul.f32 %v6514_v5, %v2547_v58  ;;  %v6582_v5 = vmul.f32 0.35355338, %v6551_v50 }
0x107a   :  { %v2561_v53 = vadd.f32 %v6517_v1, %v2554_v4  ;;  %v6587_v1 = vmul.f32 0.35355338, %v6556_v52 }
0x107c   :  { %4935 = vmatmul.msk.f32.gmra.mxu0 %vm143_vm0, %v2561_v53 }
0x10a4   :  { %v2648_v20 = vpop.permute.xlu2 %2647 }
0x10a5   :  { %4936 = vmatpush.xpose.msk.msrb.mxu1 %vm531_vm15, %v2648_v20 }
0x10a7   :  { %v2644_v43 = vpop.permute.xlu1 %2643 }
0x10b4   :  { %v2646_v51 = vpop.permute.xlu0 %2645 }
0x10b5   :  { %4937 = vmatpush.xpose.msk.msrb.mxu1 %vm531_vm15, %v2646_v51 }
0x10b9   :  { %4938 = vmatpush.xpose.msk.msrb.mxu1 %vm531_vm15, %v2644_v43 }
0x10bc   :  { %4939 = vmatmul.msk.f32.vlgmr.msrb.gmra.mxu1 %vm531_vm15, %v6577_v59 }
0x10c4   :  { %4940 = vmatmul.msk.f32.gmra.mxu1 %vm531_vm15, %v6582_v5 }
0x10cc   :  { %4941 = vmatmul.msk.f32.gmra.mxu1 %vm531_vm15, %v6587_v1 }
0x10e9   :  { %v2613_v41 = vpop.f32.mrf.mxu0 }
0x10ea   :  { %v6592_v38 = vadd.f32 %v6543_v37, %v2613_v41 }
0x10ec   :  { %2693 = vrot.lane.b32.xlu1 %v6592_v38, %s5617_s2 }
0x10f1   :  { %v2616_v44 = vpop.f32.mrf.mxu0 }
0x10f2   :  { %v6597_v11 = vadd.f32 %v6543_v37, %v2616_v44 }
0x10f4   :  { %2695 = vrot.lane.b32.xlu2 %v6597_v11, %s5617_s2  ;;  %3037 = vrot.lane.b32.xlu1 %v6546_v49, %s5619_s17  ;;  %v6641_v32 = vmul.f32 0.35355338, %v6597_v11 }
0x10f9   :  { %v2619_v62 = vpop.f32.mrf.mxu0 }
0x10fa   :  { %v6604_v34 = vadd.f32 %v6543_v37, %v2619_v62  ;;  %v6629_v37 = vmul.f32 0.35355338, %v6592_v38 }
0x10fc   :  { %2697 = vrot.lane.b32.xlu0 %v6604_v34, %s5617_s2  ;;  %3039 = vrot.lane.b32.xlu2 %v6551_v50, %s5619_s17  ;;  %v6656_v40 = vmul.f32 0.35355338, %v6604_v34 }
0x10fd   :  { %3035 = vrot.lane.b32.xlu1 %v6587_v1, %s5620_s18 }
0x1104   :  { %3041 = vrot.lane.b32.xlu0 %v6556_v52, %s5619_s17  ;;  %3033 = vrot.lane.b32.xlu2 %v6582_v5, %s5620_s18 }
0x1105   :  { %5113 = vrot.lane.b32.xlu1 %v6614_v18, %s5618_s4 }
0x110c   :  { %3031 = vrot.lane.b32.xlu0 %v6577_v59, %s5620_s18  ;;  %2884 = vrot.lane.b32.xlu2 %v6546_v49, %s5618_s4 }
0x110d   :  { %3089 = vrot.lane.b32.xlu1 %v6597_v11, %s5619_s17 }
0x1115   :  { %3081 = vrot.lane.b32.xlu1 %v6629_v37, %s5620_s18 }
0x1139   :  { %v2681_v31 = vpop.f32.mrf.mxu1 }
0x113a   :  { %v2740_v30 = vsel %vm623_vm10, %v2681_v31, -inf }
0x113b   :  { %2741 = vmax.xlane.f32.xlu0 %v2740_v30 }
0x1141   :  { %v2684_v17 = vpop.f32.mrf.mxu1 }
0x1142   :  { %v2743_v60 = vsel %vm623_vm10, %v2684_v17, -inf }
0x1143   :  { %2744 = vmax.xlane.f32.xlu2 %v2743_v60 }
0x1149   :  { %v2687_v63 = vpop.f32.mrf.mxu1 }
0x114a   :  { %v2746_v16 = vsel %vm623_vm10, %v2687_v63, -inf }
0x114b   :  { %2747 = vmax.xlane.f32.xlu1 %v2746_v16 }
0x114e   :  { %v2696_v25 = vpop.permute.xlu2 %2695 }
0x114f   :  { %3091 = vrot.lane.b32.xlu0 %v6604_v34, %s5619_s17 }
0x1156   :  { %v3040_v56 = vpop.permute.xlu2 %3039 }
0x115b   :  { %3087 = vrot.lane.b32.xlu2 %v6592_v38, %s5619_s17 }
0x115e   :  { %v2694_v54 = vpop.permute.xlu1 %2693  ;;  %v3034_v12 = vpop.permute.xlu2 %3033 }
0x1164   :  { %3083 = vrot.lane.b32.xlu1 %v6641_v32, %s5620_s18 }
0x1166   :  { %v3038_v27 = vpop.permute.xlu1 %3037  ;;  %v2885_v42 = vpop.permute.xlu2 %2884 }
0x116e   :  { %v2698_v7 = vpop.permute.xlu0 %2697 }
0x116f   :  { %v3036_v22 = vpop.permute.xlu1 %3035  ;;  %4942 = vmatpush.xpose.msk.msrb.mxu2 %vm531_vm15, %v2698_v7 }
0x1173   :  { %4943 = vmatpush.xpose.msk.msrb.mxu2 %vm531_vm15, %v2696_v25 }
0x1176   :  { %v3042_v10 = vpop.permute.xlu0 %3041 }
0x1177   :  { %v5114_v6 = vpop.permute.xlu1 %5113  ;;  %4944 = vmatpush.xpose.msk.msrb.mxu2 %vm531_vm15, %v2694_v54  ;;  %v6701_v54 = vpack.i.bf16 %v6597_v11, %v6604_v34 }
0x1178   :  { %v5115_v26 = vunpack.i.l.bf16 %v5114_v6  ;;  %v5116_v55 = vunpack.i.h.bf16 %v5114_v6 }
0x117a   :  { %2915 = vmatpush.msrb.mxu3 %v5115_v26  ;;  %4945 = vmatmul.msk.f32.vlgmr.msrb.gmra.mxu2 %vm531_vm15, %v6629_v37 }
0x117b   :  { %4960 = vmatpush.xpose.msk.msra.mxu2 %vm531_vm15, %v3042_v10 }
0x117c   :  { %2916 = vmatpush.msrb.mxu3 %v5116_v55 }
0x117e   :  { %2917 = vmatpush.msrb.mxu3 %v2885_v42  ;;  %v3032_v47 = vpop.permute.xlu0 %3031 }
0x117f   :  { %4961 = vmatpush.xpose.msk.msra.mxu2 %vm531_vm15, %v3040_v56  ;;  %v3090_v39 = vpop.permute.xlu1 %3089 }
0x1182   :  { %4946 = vmatmul.msk.f32.gmra.mxu2 %vm531_vm15, %v6641_v32 }
0x1183   :  { %4962 = vmatpush.xpose.msk.msra.mxu2 %vm531_vm15, %v3038_v27 }
0x1187   :  { %v6670_v33 = vpop.permute.xlu1 %3081 }
0x118a   :  { %4947 = vmatmul.msk.f32.gmra.mxu2 %vm531_vm15, %v6656_v40 }
0x1192   :  { %4963 = vmatmul.msk.f32.vlgmr.msra.gmra.mxu2 %vm531_vm15, %v3032_v47 }
0x119a   :  { %4964 = vmatmul.msk.f32.gmra.mxu2 %vm531_vm15, %v3034_v12 }
0x11a2   :  { %4965 = vmatmul.msk.f32.gmra.mxu2 %vm531_vm15, %v3036_v22 }
0x11ae   :  { %v2742_v46 = vpop.xlane.xlu0 %2741 }
0x11af   :  { %v2758_v24 = vsub.f32 %v2681_v31, %v2742_v46 }
0x11b1   :  { %v2764_v23 = vmul.f32 1.442695, %v2758_v24 }
0x11b6   :  { %v2745_v35 = vpop.xlane.xlu2 %2744 }
0x11b7   :  { %v2759_v2 = vsub.f32 %v2684_v17, %v2745_v35 }
0x11b9   :  { %v2766_v8 = vmul.f32 1.442695, %v2759_v2 }
0x11bb   :  { %5338 = vpow2.f32 %v2766_v8 }
0x11bc   :  { %5340 = vpow2.f32 %v2764_v23 }
0x11be   :  { %v3088_v48 = vpop.permute.xlu2 %3087  ;;  %v2748_v57 = vpop.xlane.xlu1 %2747 }
0x11bf   :  { %v2760_v15 = vsub.f32 %v2687_v63, %v2748_v57 }
0x11c1   :  { %v6663_v21 = vpop.eup %5338  ;;  %v3092_v0 = vpop.permute.xlu0 %3091  ;;  %v2768_v58 = vmul.f32 1.442695, %v2760_v15 }
0x11c2   :  { %4966 = vmatpush.xpose.msk.msra.mxu3 %vm531_vm15, %v3092_v0  ;;  %v2779_v3 = vsel %vm623_vm10, %v6663_v21, 0.0  ;;  %v6673_v4 = vpop.eup %5340 }
0x11c3   :  { %2780 = vadd.xlane.f32.xlu2 %v2779_v3  ;;  %5342 = vpow2.f32 %v2768_v58  ;;  %v2776_v20 = vsel %vm623_vm10, %v6673_v4, 0.0 }
0x11c6   :  { %4967 = vmatpush.xpose.msk.msra.mxu3 %vm531_vm15, %v3090_v39 }
0x11c9   :  { %v6678_v43 = vpop.eup %5342 }
0x11ca   :  { %4968 = vmatpush.xpose.msk.msra.mxu3 %vm531_vm15, %v3088_v48  ;;  %v2782_v44 = vsel %vm623_vm10, %v6678_v43, 0.0 }
0x11d6   :  { %v6710_v22 = vpop.permute.xlu1 %3083 }
0x11fd   :  { %v2731_v45 = vpop.f32.mrf.mxu2 }
0x11fe   :  { %v2749_v28 = vsel %vm623_vm10, %v2731_v45, -inf }
0x11ff   :  { %2750 = vmax.xlane.f32.xlu0 %v2749_v28 }
0x1205   :  { %v2734_v53 = vpop.f32.mrf.mxu2 }
0x1206   :  { %v2752_v51 = vsel %vm623_vm10, %v2734_v53, -inf }
0x1207   :  { %2777 = vadd.xlane.f32.xlu0 %v2776_v20  ;;  %2753 = vmax.xlane.f32.xlu2 %v2752_v51 }
0x120d   :  { %v2737_v41 = vpop.f32.mrf.mxu2 }
0x120e   :  { %v2755_v62 = vsel %vm623_vm10, %v2737_v41, -inf }
0x120f   :  { %2783 = vadd.xlane.f32.xlu0 %v2782_v44  ;;  %2756 = vmax.xlane.f32.xlu1 %v2755_v62 }
0x1215   :  { %v6683_v31 = vpop.f32.mrf.mxu2 }
0x1216   :  { %v3131_v30 = vsel %vm623_vm10, %v6683_v31, -inf }
0x1217   :  { %3132 = vmax.xlane.f32.xlu2 %v3131_v30 }
0x121d   :  { %v6687_v17 = vpop.f32.mrf.mxu2 }
0x121e   :  { %v3134_v60 = vsel %vm623_vm10, %v6687_v17, -inf }
0x121f   :  { %3135 = vmax.xlane.f32.xlu2 %v3134_v60 }
0x1223   :  { %3085 = vrot.lane.b32.xlu0 %v6656_v40, %s5620_s18 }
0x1225   :  { %v6693_v63 = vpop.f32.mrf.mxu2 }
0x1226   :  { %v3137_v16 = vsel %vm623_vm10, %v6693_v63, -inf }
0x1227   :  { %3138 = vmax.xlane.f32.xlu1 %v3137_v16 }
0x1236   :  { %v6707_v25 = vpop.xlane.xlu2 %2780 }
0x1237   :  { %2928 = vrot.lane.b32.xlu2 %v6592_v38, %s5618_s4  ;;  %5344 = vrcp.f32 %v6707_v25  ;;  %v2820_v60 = vand.u32 2147483648, %v6707_v25  ;;  %vm2814_vm4 = vweird.f32 %v6707_v25 }
0x123d   :  { %v5345_v12 = vpop.eup %5344 }
0x123e   :  { %v2810_v42 = vmul.f32 %v5345_v12, %v6707_v25  ;;  %vm2815_vm2 = vweird.f32 %v5345_v12 }
0x123f   :  { %vm2816_vm5 = vmor %vm2814_vm4, %vm2815_vm2 }
0x1240   :  { %5118 = vrot.lane.b32.xlu1 %v6701_v54, %s5618_s4  ;;  %v2811_v46 = vsub.f32 1.0, %v2810_v42 }
0x1242   :  { %v2812_v24 = vmul.f32 %v5345_v12, %v2811_v46 }
0x1244   :  { %v2813_v30 = vadd.f32 %v5345_v12, %v2812_v24 }
0x1248   :  { %3275 = vrot.lane.b32.xlu1 %v6546_v49, %s5621_s19 }
0x1272   :  { %v2751_v27 = vpop.xlane.xlu0 %2750 }
0x1273   :  { %v2761_v56 = vsub.f32 %v2731_v45, %v2751_v27 }
0x1275   :  { %v2770_v7 = vmul.f32 1.442695, %v2761_v56 }
0x1277   :  { %5346 = vpow2.f32 %v2770_v7 }
0x127a   :  { %v2778_v10 = vpop.xlane.xlu0 %2777  ;;  %v2754_v6 = vpop.xlane.xlu2 %2753 }
0x127b   :  { %5348 = vrcp.f32 %v2778_v10  ;;  %v2762_v26 = vsub.f32 %v2734_v53, %v2754_v6  ;;  %v2805_v23 = vand.u32 2147483648, %v2778_v10  ;;  %v2803_v45 = vand.u32 2147483647, %v2778_v10 }
0x127c   :  { %vm2799_vm14 = vweird.f32 %v2778_v10 }
0x127d   :  { %v6712_v55 = vpop.eup %5346  ;;  %v2772_v47 = vmul.f32 1.442695, %v2762_v26  ;;  %v2806_v51 = vor.u32 1.1754944e-38, %v2805_v23  ;;  %vm2804_vm3 = vcmp.eq.f32.partialorder %v2803_v45, 8.507059e+37 }
0x127e   :  { %v2785_v35 = vsel %vm623_vm10, %v6712_v55, 0.0 }
0x127f   :  { %2786 = vadd.xlane.f32.xlu0 %v2785_v35  ;;  %5350 = vpow2.f32 %v2772_v47  ;;  %v2817_v47 = vsel %vm2816_vm5, %v5345_v12, %v2813_v30  ;;  %v2821_v35 = vor.u32 1.1754944e-38, %v2820_v60 }
0x1281   :  { %v5349_v2 = vpop.eup %5348 }
0x1282   :  { %v2795_v8 = vmul.f32 %v5349_v2, %v2778_v10  ;;  %v6717_v0 = vpop.xlane.xlu0 %2783  ;;  %v2757_v3 = vpop.xlane.xlu1 %2756  ;;  %vm2800_vm13 = vweird.f32 %v5349_v2  ;;  %v2818_v10 = vand.u32 2147483647, %v6707_v25 }
0x1283   :  { %5352 = vrcp.f32 %v6717_v0  ;;  %v2763_v48 = vsub.f32 %v2737_v41, %v2757_v3  ;;  %vm2801_vm1 = vmor %vm2799_vm14, %vm2800_vm13  ;;  %v2835_v25 = vand.u32 2147483648, %v6717_v0  ;;  %vm2829_vm8 = vweird.f32 %v6717_v0 }
0x1284   :  { %v2796_v39 = vsub.f32 1.0, %v2795_v8  ;;  %vm2819_vm6 = vcmp.eq.f32.partialorder %v2818_v10, 8.507059e+37  ;;  %v2833_v12 = vand.u32 2147483647, %v6717_v0 }
0x1285   :  { %v6720_v57 = vpop.eup %5350  ;;  %v2774_v28 = vmul.f32 1.442695, %v2763_v48 }
0x1286   :  { %v2797_v15 = vmul.f32 %v5349_v2, %v2796_v39  ;;  %v2788_v58 = vsel %vm623_vm10, %v6720_v57, 0.0  ;;  %vm2834_vm11 = vcmp.eq.f32.partialorder %v2833_v12, 8.507059e+37 }
0x1287   :  { %5354 = vpow2.f32 %v2774_v28  ;;  %2789 = vadd.xlane.f32.xlu2 %v2788_v58 }
0x1288   :  { %v2798_v53 = vadd.f32 %v5349_v2, %v2797_v15 }
0x1289   :  { %v5353_v20 = vpop.eup %5352 }
0x128a   :  { %v2802_v41 = vsel %vm2801_vm1, %v5349_v2, %v2798_v53  ;;  %v2825_v44 = vmul.f32 %v5353_v20, %v6717_v0  ;;  %v3133_v62 = vpop.xlane.xlu2 %3132  ;;  %v2822_v2 = vsel %vm2819_vm6, %v2821_v35, %v2817_v47  ;;  %vm2830_vm7 = vweird.f32 %v5353_v20 }
0x128b   :  { %v2807_v16 = vsel %vm2804_vm3, %v2806_v51, %v2802_v41  ;;  %v3149_v27 = vsub.f32 %v6683_v31, %v3133_v62  ;;  %v2823_v3 = vmul.f32 %v6663_v21, %v2822_v2  ;;  %vm2831_vm9 = vmor %vm2829_vm8, %vm2830_vm7  ;;  %v2622_v62 = vld [vmem:[#allocation6 + $0x100] sm:$0xff] }
0x128c   :  { %v2826_v56 = vsub.f32 1.0, %v2825_v44  ;;  %v2808_v7 = vmul.f32 %v6673_v4, %v2807_v16  ;;  %3005 = vmatpush.msra.mxu1 %v2622_v62 }
0x128d   :  { %v3155_v6 = vmul.f32 1.442695, %v3149_v27  ;;  %v6730_v26 = vpop.eup %5354 }
0x128e   :  { %v2827_v42 = vmul.f32 %v5353_v20, %v2826_v56  ;;  %4948 = vmatmul.msk.f32.vlgmr.msrb.gmra.mxu3 %vm623_vm10, %v2808_v7  ;;  %v2791_v31 = vsel %vm623_vm10, %v6730_v26, 0.0 }
0x128f   :  { %5356 = vpow2.f32 %v3155_v6  ;;  %2792 = vadd.xlane.f32.xlu2 %v2791_v31 }
0x1290   :  { %v2828_v46 = vadd.f32 %v5353_v20, %v2827_v42 }
0x1292   :  { %v3136_v4 = vpop.xlane.xlu2 %3135  ;;  %v2832_v23 = vsel %vm2831_vm9, %v5353_v20, %v2828_v46 }
0x1293   :  { %v3150_v8 = vsub.f32 %v6687_v17, %v3136_v4  ;;  %5123 = vrot.lane.b32.xlu0 %v6614_v18, %s5621_s19  ;;  %v2836_v17 = vor.u32 1.1754944e-38, %v2835_v25 }
0x1295   :  { %v6742_v39 = vpop.eup %5356  ;;  %v3157_v48 = vmul.f32 1.442695, %v3150_v8  ;;  %v2837_v15 = vsel %vm2834_vm11, %v2836_v17, %v2832_v23  ;;  %v3086_v51 = vpop.permute.xlu0 %3085 }
0x1296   :  { %4949 = vmatmul.msk.f32.gmra.mxu3 %vm623_vm10, %v2823_v3  ;;  %v3167_v24 = vsel %vm623_vm10, %v6742_v39, 0.0  ;;  %v2838_v45 = vmul.f32 %v6678_v43, %v2837_v15 }
0x1297   :  { %5358 = vpow2.f32 %v3157_v48  ;;  %3168 = vadd.xlane.f32.xlu1 %v3167_v24 }
0x129a   :  { %v3139_v28 = vpop.xlane.xlu1 %3138 }
0x129b   :  { %v3151_v58 = vsub.f32 %v6693_v63, %v3139_v28 }
0x129d   :  { %v6748_v0 = vpop.eup %5358  ;;  %v3159_v53 = vmul.f32 1.442695, %v3151_v58 }
0x129e   :  { %4950 = vmatmul.msk.f32.gmra.mxu3 %vm623_vm10, %v2838_v45  ;;  %v3170_v21 = vsel %vm623_vm10, %v6748_v0, 0.0 }
0x129f   :  { %3171 = vadd.xlane.f32.xlu2 %v3170_v21  ;;  %5360 = vpow2.f32 %v3159_v53 }
0x12a5   :  { %v6765_v63 = vpop.eup %5360 }
0x12a6   :  { %4969 = vmatmul.msk.f32.vlgmr.msra.gmra.mxu3 %vm531_vm15, %v6670_v33  ;;  %v2929_v33 = vpop.permute.xlu2 %2928 }
0x12ae   :  { %4970 = vmatmul.msk.f32.gmra.mxu3 %vm531_vm15, %v6710_v22  ;;  %v3173_v22 = vsel %vm623_vm10, %v6765_v63, 0.0 }
0x12b0   :  { %3430 = vrot.lane.b32.xlu1 %v6551_v50, %s5622_s20 }
0x12b2   :  { %v5119_v43 = vpop.permute.xlu1 %5118 }
0x12b3   :  { %v5120_v20 = vunpack.i.l.bf16 %v5119_v43  ;;  %v5121_v41 = vunpack.i.h.bf16 %v5119_v43 }
0x12b5   :  { %2959 = vmatpush.msrb.mxu0 %v5120_v20 }
0x12b6   :  { %4971 = vmatmul.msk.f32.gmra.mxu3 %vm531_vm15, %v3086_v51 }
0x12b7   :  { %2960 = vmatpush.msrb.mxu0 %v5121_v41  ;;  %3432 = vrot.lane.b32.xlu2 %v6556_v52, %s5622_s20 }
0x12b8   :  { %3422 = vrot.lane.b32.xlu1 %v6577_v59, %s5623_s21 }
0x12b9   :  { %2961 = vmatpush.msrb.mxu0 %v2929_v33 }
0x12ba   :  { %v3276_v35 = vpop.permute.xlu1 %3275 }
0x12bd   :  { %3174 = vadd.xlane.f32.xlu0 %v3173_v22 }
0x12bf   :  { %3424 = vrot.lane.b32.xlu2 %v6582_v5, %s5623_s21 }
0x12c0   :  { %3426 = vrot.lane.b32.xlu1 %v6587_v1, %s5623_s21 }
0x12d1   :  { %3428 = vrot.lane.b32.xlu0 %v6546_v49, %s5622_s20 }
0x12f2   :  { %v2787_v44 = vpop.xlane.xlu0 %2786 }
0x12f3   :  { %5362 = vrcp.f32 %v2787_v44  ;;  %v2850_v56 = vand.u32 2147483648, %v2787_v44  ;;  %v2848_v10 = vand.u32 2147483647, %v2787_v44  ;;  %vm2844_vm13 = vweird.f32 %v2787_v44 }
0x12f5   :  { %v2851_v42 = vor.u32 1.1754944e-38, %v2850_v56  ;;  %vm2849_vm1 = vcmp.eq.f32.partialorder %v2848_v10, 8.507059e+37 }
0x12f9   :  { %v5363_v30 = vpop.eup %5362 }
0x12fa   :  { %v2840_v60 = vmul.f32 %v5363_v30, %v2787_v44  ;;  %v2790_v16 = vpop.xlane.xlu2 %2789  ;;  %vm2845_vm12 = vweird.f32 %v5363_v30 }
0x12fb   :  { %5364 = vrcp.f32 %v2790_v16  ;;  %vm2846_vm14 = vmor %vm2844_vm13, %vm2845_vm12  ;;  %v2865_v24 = vand.u32 2147483648, %v2790_v16  ;;  %v2863_v23 = vand.u32 2147483647, %v2790_v16  ;;  %vm2859_vm3 = vweird.f32 %v2790_v16 }
0x12fc   :  { %v2841_v27 = vsub.f32 1.0, %v2840_v60 }
0x12fd   :  { %v2866_v28 = vor.u32 1.1754944e-38, %v2865_v24  ;;  %vm2864_vm5 = vcmp.eq.f32.partialorder %v2863_v23, 8.507059e+37 }
0x12fe   :  { %v2842_v7 = vmul.f32 %v5363_v30, %v2841_v27 }
0x1300   :  { %v2843_v6 = vadd.f32 %v5363_v30, %v2842_v7 }
0x1301   :  { %v5365_v47 = vpop.eup %5364 }
0x1302   :  { %v2847_v31 = vsel %vm2846_vm14, %v5363_v30, %v2843_v6  ;;  %v2855_v46 = vmul.f32 %v5365_v47, %v2790_v16  ;;  %v2793_v4 = vpop.xlane.xlu2 %2792  ;;  %vm2860_vm2 = vweird.f32 %v5365_v47 }
0x1303   :  { %v2852_v2 = vsel %vm2849_vm1, %v2851_v42, %v2847_v31  ;;  %5366 = vrcp.f32 %v2793_v4  ;;  %vm2861_vm4 = vmor %vm2859_vm3, %vm2860_vm2  ;;  %v2880_v41 = vand.u32 2147483648, %v2793_v4  ;;  %v2878_v33 = vand.u32 2147483647, %v2793_v4 }
0x1304   :  { %v2853_v25 = vmul.f32 %v6712_v55, %v2852_v2  ;;  %v2856_v8 = vsub.f32 1.0, %v2855_v46  ;;  %vm2874_vm7 = vweird.f32 %v2793_v4 }
0x1305   :  { %v5124_v12 = vpop.permute.xlu0 %5123  ;;  %v2881_v16 = vor.u32 1.1754944e-38, %v2880_v41  ;;  %vm2879_vm9 = vcmp.eq.f32.partialorder %v2878_v33, 8.507059e+37 }
0x1306   :  { %v5125_v3 = vunpack.i.l.bf16 %v5124_v12  ;;  %4951 = vmatmul.msk.f32.vlgmr.msrb.gmra.mxu0 %vm623_vm10, %v2853_v25  ;;  %v2857_v48 = vmul.f32 %v5365_v47, %v2856_v8  ;;  %v5126_v17 = vunpack.i.h.bf16 %v5124_v12 }
0x1308   :  { %3306 = vmatpush.msra.mxu0 %v5125_v3  ;;  %v2858_v15 = vadd.f32 %v5365_v47, %v2857_v48 }
0x1309   :  { %v5367_v45 = vpop.eup %5366 }
0x130a   :  { %v3169_v21 = vpop.xlane.xlu1 %3168  ;;  %3307 = vmatpush.msra.mxu0 %v5126_v17  ;;  %v2870_v55 = vmul.f32 %v5367_v45, %v2793_v4  ;;  %v2862_v58 = vsel %vm2861_vm4, %v5365_v47, %v2858_v15  ;;  %vm2875_vm6 = vweird.f32 %v5367_v45 }
0x130b   :  { %5368 = vrcp.f32 %v3169_v21  ;;  %v2867_v43 = vsel %vm2864_vm5, %v2866_v28, %v2862_v58  ;;  %vm2876_vm8 = vmor %vm2874_vm7, %vm2875_vm6  ;;  %v3196_v56 = vand.u32 2147483648, %v3169_v21  ;;  %v3194_v6 = vand.u32 2147483647, %v3169_v21 }
0x130c   :  { %3308 = vmatpush.msra.mxu0 %v3276_v35  ;;  %v2871_v53 = vsub.f32 1.0, %v2870_v55  ;;  %v2868_v20 = vmul.f32 %v6720_v57, %v2867_v43  ;;  %vm3190_vm12 = vweird.f32 %v3169_v21 }
0x130d   :  { %v3197_v31 = vor.u32 1.1754944e-38, %v3196_v56  ;;  %vm3195_vm14 = vcmp.eq.f32.partialorder %v3194_v6, 8.507059e+37 }
0x130e   :  { %v2872_v51 = vmul.f32 %v5367_v45, %v2871_v53  ;;  %4952 = vmatmul.msk.f32.gmra.mxu0 %vm623_vm10, %v2868_v20 }
0x1310   :  { %v2873_v44 = vadd.f32 %v5367_v45, %v2872_v51 }
0x1311   :  { %v5369_v22 = vpop.eup %5368  ;;  %v2919_v62 = vpop.f32.mrf.mxu3 }
0x1312   :  { %v3186_v30 = vmul.f32 %v5369_v22, %v3169_v21  ;;  %4954 = vmatmul.msk.f32.vlgmr.msra.gmra.mxu1 %vm531_vm15, %v2919_v62  ;;  %v3172_v60 = vpop.xlane.xlu2 %3171  ;;  %v2877_v57 = vsel %vm2876_vm8, %v5367_v45, %v2873_v44  ;;  %vm3191_vm11 = vweird.f32 %v5369_v22 }
0x1313   :  { %5370 = vrcp.f32 %v3172_v60  ;;  %v2882_v7 = vsel %vm2879_vm9, %v2881_v16, %v2877_v57  ;;  %vm3192_vm13 = vmor %vm3190_vm12, %vm3191_vm11  ;;  %v3211_v3 = vand.u32 2147483648, %v3172_v60  ;;  %v3209_v24 = vand.u32 2147483647, %v3172_v60 }
0x1314   :  { %v3187_v27 = vsub.f32 1.0, %v3186_v30  ;;  %v2883_v42 = vmul.f32 %v6730_v26, %v2882_v7  ;;  %vm3205_vm2 = vweird.f32 %v3172_v60 }
0x1315   :  { %v3212_v17 = vor.u32 1.1754944e-38, %v3211_v3  ;;  %vm3210_vm4 = vcmp.eq.f32.partialorder %v3209_v24, 8.507059e+37 }
0x1316   :  { %v3188_v10 = vmul.f32 %v5369_v22, %v3187_v27  ;;  %4953 = vmatmul.msk.f32.gmra.mxu0 %vm623_vm10, %v2883_v42 }
0x1318   :  { %v3189_v47 = vadd.f32 %v5369_v22, %v3188_v10 }
0x1319   :  { %v5371_v35 = vpop.eup %5370  ;;  %v2922_v2 = vpop.f32.mrf.mxu3 }
0x131a   :  { %v3193_v46 = vsel %vm3192_vm13, %v5369_v22, %v3189_v47  ;;  %v3201_v4 = vmul.f32 %v5371_v35, %v3172_v60  ;;  %4955 = vmatmul.msk.f32.gmra.mxu1 %vm531_vm15, %v2922_v2  ;;  %v3433_v25 = vpop.permute.xlu2 %3432  ;;  %vm3206_vm1 = vweird.f32 %v5371_v35  ;;  %v2623_v47 = vld [vmem:[#allocation6 + $0x108] sm:$0xff] }
0x131b   :  { %v3198_v8 = vsel %vm3195_vm14, %v3197_v31, %v3193_v46  ;;  %4984 = vmatpush.xpose.msk.msrb.mxu0 %vm531_vm15, %v3433_v25  ;;  %vm3207_vm3 = vmor %vm3205_vm2, %vm3206_vm1  ;;  %3396 = vmatpush.msrb.mxu3 %v2623_v47 }
0x131c   :  { %v3199_v12 = vmul.f32 %v6742_v39, %v3198_v8  ;;  %v3202_v26 = vsub.f32 1.0, %v3201_v4 }
0x131e   :  { %v3203_v48 = vmul.f32 %v5371_v35, %v3202_v26  ;;  %4972 = vmatmul.msk.f32.vlgmr.msra.gmra.mxu0 %vm623_vm10, %v3199_v12 }
0x1320   :  { %v3204_v23 = vadd.f32 %v5371_v35, %v3203_v48 }
0x1321   :  { %v2925_v15 = vpop.f32.mrf.mxu3 }
0x1322   :  { %4956 = vmatmul.msk.f32.gmra.mxu1 %vm531_vm15, %v2925_v15  ;;  %v3431_v45 = vpop.permute.xlu1 %3430  ;;  %v3208_v21 = vsel %vm3207_vm3, %v5371_v35, %v3204_v23  ;;  %v3425_v6 = vpop.permute.xlu2 %3424 }
0x1323   :  { %4985 = vmatpush.xpose.msk.msrb.mxu0 %vm531_vm15, %v3431_v45  ;;  %v3213_v39 = vsel %vm3210_vm4, %v3212_v17, %v3208_v21 }
0x1324   :  { %v3214_v28 = vmul.f32 %v6748_v0, %v3213_v39 }
0x1326   :  { %4973 = vmatmul.msk.f32.gmra.mxu0 %vm623_vm10, %v3214_v28 }
0x1329   :  { %v3122_v55 = vpop.f32.mrf.mxu3 }
0x132a   :  { %v3140_v58 = vsel %vm623_vm10, %v3122_v55, -inf  ;;  %v3423_v10 = vpop.permute.xlu1 %3422 }
0x132b   :  { %3141 = vmax.xlane.f32.xlu2 %v3140_v58 }
0x1330   :  { %v3175_v53 = vpop.xlane.xlu0 %3174 }
0x1331   :  { %5372 = vrcp.f32 %v3175_v53  ;;  %v3125_v43 = vpop.f32.mrf.mxu3  ;;  %v3226_v44 = vand.u32 2147483648, %v3175_v53  ;;  %v3224_v30 = vand.u32 2147483647, %v3175_v53  ;;  %vm3220_vm6 = vweird.f32 %v3175_v53 }
0x1332   :  { %v3143_v20 = vsel %vm623_vm10, %v3125_v43, -inf  ;;  %v3427_v42 = vpop.permute.xlu1 %3426 }
0x1333   :  { %3144 = vmax.xlane.f32.xlu1 %v3143_v20  ;;  %v3227_v16 = vor.u32 1.1754944e-38, %v3226_v44  ;;  %vm3225_vm8 = vcmp.eq.f32.partialorder %v3224_v30, 8.507059e+37  ;;  %v6855_v44 = vld [vmem:[#allocation7 + $0x13] ss:$0 sm:$0xff] }
0x1337   :  { %v5373_v51 = vpop.eup %5372 }
0x1338   :  { %v3216_v41 = vmul.f32 %v5373_v51, %v3175_v53  ;;  %vm3221_vm5 = vweird.f32 %v5373_v51 }
0x1339   :  { %v6792_v33 = vpop.f32.mrf.mxu3  ;;  %vm3222_vm7 = vmor %vm3220_vm6, %vm3221_vm5 }
0x133a   :  { %v3217_v22 = vsub.f32 1.0, %v3216_v41  ;;  %v3146_v0 = vsel %vm623_vm10, %v6792_v33, -inf }
0x133b   :  { %3147 = vmax.xlane.f32.xlu0 %v3146_v0 }
0x133c   :  { %v3218_v62 = vmul.f32 %v5373_v51, %v3217_v22 }
0x133e   :  { %v3219_v60 = vadd.f32 %v5373_v51, %v3218_v62 }
0x1340   :  { %v3223_v27 = vsel %vm3222_vm7, %v5373_v51, %v3219_v60 }
0x1341   :  { %v3228_v57 = vsel %vm3225_vm8, %v3227_v16, %v3223_v27 }
0x1342   :  { %v3229_v56 = vmul.f32 %v6765_v63, %v3228_v57  ;;  %v2629_v57 = vadd.f32 %v6855_v44, %v6464_v29 }
0x1343   :  { %v3429_v7 = vpop.permute.xlu0 %3428 }
0x1344   :  { %4974 = vmatmul.msk.f32.gmra.mxu0 %vm623_vm10, %v3229_v56 }
0x1345   :  { %4986 = vmatpush.xpose.msk.msrb.mxu0 %vm531_vm15, %v3429_v7 }
0x134c   :  { %5128 = vrot.lane.b32.xlu1 %v6701_v54, %s5621_s19  ;;  %4987 = vmatmul.msk.f32.vlgmr.msrb.gmra.mxu0 %vm531_vm15, %v3423_v10 }
0x1354   :  { %4988 = vmatmul.msk.f32.gmra.mxu0 %vm531_vm15, %v3425_v6 }
0x135c   :  { %4989 = vmatmul.msk.f32.gmra.mxu0 %vm531_vm15, %v3427_v42 }
0x1383   :  { %v2963_v63 = vpop.f32.mrf.mxu0 }
0x1384   :  { %4957 = vmatmul.msk.f32.gmra.mxu1 %vm531_vm15, %v2963_v63 }
0x138b   :  { %v2966_v35 = vpop.f32.mrf.mxu0 }
0x138c   :  { %4958 = vmatmul.msk.f32.gmra.mxu1 %vm531_vm15, %v2966_v35 }
0x1393   :  { %v2969_v31 = vpop.f32.mrf.mxu0 }
0x1394   :  { %4959 = vmatmul.msk.f32.gmra.mxu1 %vm531_vm15, %v2969_v31 }
0x139b   :  { %v3310_v2 = vpop.f32.mrf.mxu0 }
0x139c   :  { %4978 = vmatmul.msk.f32.vlgmr.msrb.gmra.mxu3 %vm531_vm15, %v3310_v2 }
0x139e   :  { %v3142_v46 = vpop.xlane.xlu2 %3141 }
0x139f   :  { %v3152_v4 = vsub.f32 %v3122_v55, %v3142_v46 }
0x13a1   :  { %v3161_v25 = vmul.f32 1.442695, %v3152_v4 }
0x13a3   :  { %5374 = vpow2.f32 %v3161_v25  ;;  %v3313_v8 = vpop.f32.mrf.mxu0 }
0x13a4   :  { %4979 = vmatmul.msk.f32.gmra.mxu3 %vm531_vm15, %v3313_v8 }
0x13a6   :  { %v3145_v12 = vpop.xlane.xlu1 %3144 }
0x13a7   :  { %v3153_v26 = vsub.f32 %v3125_v43, %v3145_v12 }
0x13a9   :  { %v6809_v3 = vpop.eup %5374  ;;  %v3163_v48 = vmul.f32 1.442695, %v3153_v26 }
0x13aa   :  { %v3176_v24 = vsel %vm623_vm10, %v6809_v3, 0.0 }
0x13ab   :  { %5376 = vpow2.f32 %v3163_v48  ;;  %3177 = vadd.xlane.f32.xlu2 %v3176_v24 }
0x13ae   :  { %v3148_v51 = vpop.xlane.xlu0 %3147 }
0x13af   :  { %v3154_v41 = vsub.f32 %v6792_v33, %v3148_v51  ;;  %v3007_v33 = vpop.f32.mrf.mxu1 }
0x13b1   :  { %v6813_v23 = vpop.eup %5376  ;;  %v3165_v22 = vmul.f32 1.442695, %v3154_v41 }
0x13b2   :  { %v3179_v17 = vsel %vm623_vm10, %v6813_v23, 0.0 }
0x13b3   :  { %3180 = vadd.xlane.f32.xlu2 %v3179_v17  ;;  %5378 = vpow2.f32 %v3165_v22 }
0x13be   :  { %v5129_v15 = vpop.permute.xlu1 %5128 }
0x13bf   :  { %v5130_v45 = vunpack.i.l.bf16 %v5129_v15  ;;  %v5131_v21 = vunpack.i.h.bf16 %v5129_v15 }
0x13c1   :  { %v3316_v39 = vpop.f32.mrf.mxu0  ;;  %3350 = vmatpush.msrb.mxu2 %v5130_v45 }
0x13c2   :  { %4980 = vmatmul.msk.f32.gmra.mxu3 %vm531_vm15, %v3316_v39 }
0x13c3   :  { %3351 = vmatpush.msrb.mxu2 %v5131_v21 }
0x13c9   :  { %v6818_v28 = vpop.f32.mrf.mxu0 }
0x13ca   :  { %v3522_v55 = vsel %vm623_vm10, %v6818_v28, -inf }
0x13cb   :  { %3523 = vmax.xlane.f32.xlu0 %v3522_v55  ;;  %3319 = vrot.lane.b32.xlu2 %v6592_v38, %s5621_s19 }
0x13d1   :  { %v6824_v58 = vpop.f32.mrf.mxu0 }
0x13d2   :  { %v3525_v53 = vsel %vm623_vm10, %v6824_v58, -inf }
0x13d3   :  { %3526 = vmax.xlane.f32.xlu0 %v3525_v53  ;;  %3666 = vrot.lane.b32.xlu2 %v6546_v49, %s5624_s22 }
0x13d9   :  { %v6830_v43 = vpop.f32.mrf.mxu0 }
0x13da   :  { %v3528_v20 = vsel %vm623_vm10, %v6830_v43, -inf }
0x13db   :  { %3529 = vmax.xlane.f32.xlu1 %v3528_v20  ;;  %3472 = vrot.lane.b32.xlu2 %v6629_v37, %s5623_s21 }
0x13e3   :  { %3821 = vrot.lane.b32.xlu2 %v6551_v50, %s5625_s23  ;;  %v6849_v50 = vpop.eup %5378 }
0x13e4   :  { %v3182_v0 = vsel %vm623_vm10, %v6849_v50, 0.0 }
0x13e7   :  { %3482 = vrot.lane.b32.xlu0 %v6604_v34, %s5622_s20 }
0x13f4   :  { %3480 = vrot.lane.b32.xlu1 %v6597_v11, %s5622_s20 }
0x13fc   :  { %3478 = vrot.lane.b32.xlu1 %v6592_v38, %s5622_s20 }
0x1404   :  { %3823 = vrot.lane.b32.xlu1 %v6556_v52, %s5625_s23  ;;  %v2628_v52 = vadd.f32 %v6855_v44, %v6458_v9 }
0x1406   :  { %v3025_v30 = vadd.f32 %v3007_v33, %v2628_v52 }
0x140c   :  { %3819 = vrot.lane.b32.xlu1 %v6546_v49, %s5625_s23 }
0x1411   :  { %3183 = vadd.xlane.f32.xlu0 %v3182_v0 }
0x1414   :  { %3813 = vrot.lane.b32.xlu1 %v6577_v59, %s5626_s24  ;;  %v3010_v59 = vpop.f32.mrf.mxu1 }
0x1415   :  { %v3026_v9 = vadd.f32 %v3010_v59, %v2629_v57 }
0x141c   :  { %3871 = vrot.lane.b32.xlu1 %v6597_v11, %s5625_s23 }
0x141e   :  { %v3178_v62 = vpop.xlane.xlu2 %3177 }
0x141f   :  { %5380 = vrcp.f32 %v3178_v62  ;;  %v3398_v60 = vpop.f32.mrf.mxu3  ;;  %v3241_v6 = vand.u32 2147483648, %v3178_v62  ;;  %v3239_v63 = vand.u32 2147483647, %v3178_v62  ;;  %vm3235_vm11 = vweird.f32 %v3178_v62 }
0x1420   :  { %v6861_v16 = vadd.f32 %v3398_v60, %v3025_v30 }
0x1421   :  { %v3242_v2 = vor.u32 1.1754944e-38, %v3241_v6  ;;  %vm3240_vm13 = vcmp.eq.f32.partialorder %v3239_v63, 8.507059e+37 }
0x1424   :  { %3863 = vrot.lane.b32.xlu1 %v6629_v37, %s5626_s24 }
0x1425   :  { %v5381_v27 = vpop.eup %5380  ;;  %5133 = vrot.lane.b32.xlu0 %v6614_v18, %s5624_s22 }
0x1426   :  { %v3231_v56 = vmul.f32 %v5381_v27, %v3178_v62  ;;  %v3181_v7 = vpop.xlane.xlu2 %3180  ;;  %vm3236_vm9 = vweird.f32 %v5381_v27 }
0x1427   :  { %5382 = vrcp.f32 %v3181_v7  ;;  %v3401_v42 = vpop.f32.mrf.mxu3  ;;  %vm3237_vm12 = vmor %vm3235_vm11, %vm3236_vm9  ;;  %v3256_v26 = vand.u32 2147483648, %v3181_v7  ;;  %v3254_v24 = vand.u32 2147483647, %v3181_v7  ;;  %vm3250_vm1 = vweird.f32 %v3181_v7 }
0x1428   :  { %v3232_v10 = vsub.f32 1.0, %v3231_v56  ;;  %v6869_v35 = vadd.f32 %v3401_v42, %v3026_v9 }
0x1429   :  { %v3257_v15 = vor.u32 1.1754944e-38, %v3256_v26  ;;  %vm3255_vm3 = vcmp.eq.f32.partialorder %v3254_v24, 8.507059e+37 }
0x142a   :  { %v3233_v47 = vmul.f32 %v5381_v27, %v3232_v10 }
0x142c   :  { %v3234_v37 = vadd.f32 %v5381_v27, %v3233_v47 }
0x142d   :  { %v5383_v31 = vpop.eup %5382 }
0x142e   :  { %v3238_v46 = vsel %vm3237_vm12, %v5381_v27, %v3234_v37  ;;  %v3246_v29 = vmul.f32 %v5383_v31, %v3181_v7  ;;  %v3320_v4 = vpop.permute.xlu2 %3319  ;;  %vm3251_vm14 = vweird.f32 %v5383_v31 }
0x142f   :  { %v3243_v25 = vsel %vm3240_vm13, %v3242_v2, %v3238_v46  ;;  %3352 = vmatpush.msrb.mxu2 %v3320_v4  ;;  %vm3252_vm2 = vmor %vm3250_vm1, %vm3251_vm14 }
0x1430   :  { %v3244_v8 = vmul.f32 %v6809_v3, %v3243_v25  ;;  %v3247_v12 = vsub.f32 1.0, %v3246_v29 }
0x1432   :  { %v3248_v48 = vmul.f32 %v5383_v31, %v3247_v12  ;;  %4975 = vmatmul.msk.f32.vlgmr.msrb.gmra.mxu2 %vm623_vm10, %v3244_v8 }
0x1434   :  { %v3249_v17 = vadd.f32 %v5383_v31, %v3248_v48 }
0x1436   :  { %v3253_v45 = vsel %vm3252_vm2, %v5383_v31, %v3249_v17  ;;  %v3667_v62 = vpop.permute.xlu2 %3666 }
0x1437   :  { %v3258_v21 = vsel %vm3255_vm3, %v3257_v15, %v3253_v45  ;;  %v6917_v15 = vpop.f32.mrf.mxu1 }
0x1438   :  { %v3259_v39 = vmul.f32 %v6813_v23, %v3258_v21 }
0x143a   :  { %4976 = vmatmul.msk.f32.gmra.mxu2 %vm623_vm10, %v3259_v39 }
0x143e   :  { %v3524_v55 = vpop.xlane.xlu0 %3523  ;;  %v3473_v60 = vpop.permute.xlu2 %3472 }
0x143f   :  { %v3540_v3 = vsub.f32 %v6818_v28, %v3524_v55 }
0x1441   :  { %v3546_v53 = vmul.f32 1.442695, %v3540_v3 }
0x1443   :  { %5384 = vpow2.f32 %v3546_v53 }
0x1446   :  { %v3527_v20 = vpop.xlane.xlu0 %3526  ;;  %v3822_v8 = vpop.permute.xlu2 %3821 }
0x1447   :  { %v3541_v51 = vsub.f32 %v6824_v58, %v3527_v20 }
0x1449   :  { %v3548_v41 = vmul.f32 1.442695, %v3541_v51  ;;  %v6877_v22 = vpop.eup %5384 }
0x144a   :  { %v3558_v0 = vsel %vm623_vm10, %v6877_v22, 0.0 }
0x144b   :  { %5386 = vpow2.f32 %v3548_v41 }
0x144e   :  { %v3530_v52 = vpop.xlane.xlu1 %3529 }
0x144f   :  { %3559 = vadd.xlane.f32.xlu0 %v3558_v0  ;;  %v3542_v27 = vsub.f32 %v6830_v43, %v3530_v52 }
0x1451   :  { %v6881_v33 = vpop.eup %5386  ;;  %v3550_v59 = vmul.f32 1.442695, %v3542_v27 }
0x1452   :  { %v3561_v23 = vsel %vm623_vm10, %v6881_v33, 0.0 }
0x1453   :  { %3562 = vadd.xlane.f32.xlu2 %v3561_v23  ;;  %5388 = vpow2.f32 %v3550_v59 }
0x1459   :  { %v3483_v28 = vpop.permute.xlu0 %3482  ;;  %v6900_v56 = vpop.eup %5388 }
0x145a   :  { %4990 = vmatpush.xpose.msk.msrb.mxu1 %vm531_vm15, %v3483_v28  ;;  %v3564_v10 = vsel %vm623_vm10, %v6900_v56, 0.0  ;;  %v3016_v28 = vpop.f32.mrf.mxu1 }
0x1463   :  { %3474 = vrot.lane.b32.xlu0 %v6641_v32, %s5623_s21 }
0x1466   :  { %v3481_v58 = vpop.permute.xlu1 %3480 }
0x1467   :  { %4991 = vmatpush.xpose.msk.msrb.mxu1 %vm531_vm15, %v3481_v58 }
0x146b   :  { %3476 = vrot.lane.b32.xlu2 %v6656_v40, %s5623_s21 }
0x146e   :  { %v3479_v30 = vpop.permute.xlu1 %3478 }
0x146f   :  { %4992 = vmatpush.xpose.msk.msrb.mxu1 %vm531_vm15, %v3479_v30 }
0x1472   :  { %4993 = vmatmul.msk.f32.vlgmr.msrb.gmra.mxu1 %vm531_vm15, %v3473_v60 }
0x1473   :  { %3873 = vrot.lane.b32.xlu2 %v6604_v34, %s5625_s23 }
0x1476   :  { %v3824_v25 = vpop.permute.xlu1 %3823 }
0x147b   :  { %3869 = vrot.lane.b32.xlu2 %v6592_v38, %s5625_s23 }
0x147e   :  { %v3820_v12 = vpop.permute.xlu1 %3819 }
0x1483   :  { %3865 = vrot.lane.b32.xlu2 %v6641_v32, %s5626_s24 }
0x1484   :  { %v3184_v57 = vpop.xlane.xlu0 %3183 }
0x1485   :  { %5390 = vrcp.f32 %v3184_v57  ;;  %v3271_v43 = vand.u32 2147483648, %v3184_v57  ;;  %v3269_v47 = vand.u32 2147483647, %v3184_v57  ;;  %vm3265_vm5 = vweird.f32 %v3184_v57 }
0x1486   :  { %v3814_v53 = vpop.permute.xlu1 %3813 }
0x1487   :  { %v3272_v37 = vor.u32 1.1754944e-38, %v3271_v43  ;;  %vm3270_vm7 = vcmp.eq.f32.partialorder %v3269_v47, 8.507059e+37 }
0x148b   :  { %v5391_v7 = vpop.eup %5390 }
0x148c   :  { %v3261_v9 = vmul.f32 %v5391_v7, %v3184_v57  ;;  %vm3266_vm4 = vweird.f32 %v5391_v7 }
0x148d   :  { %3565 = vadd.xlane.f32.xlu0 %v3564_v10  ;;  %vm3267_vm6 = vmor %vm3265_vm5, %vm3266_vm4 }
0x148e   :  { %v3262_v6 = vsub.f32 1.0, %v3261_v9  ;;  %v3872_v10 = vpop.permute.xlu1 %3871 }
0x1490   :  { %v3263_v42 = vmul.f32 %v5391_v7, %v3262_v6  ;;  %v6925_v6 = vpop.f32.mrf.mxu1 }
0x1492   :  { %v3264_v63 = vadd.f32 %v5391_v7, %v3263_v42 }
0x1494   :  { %v3268_v32 = vsel %vm3267_vm6, %v5391_v7, %v3264_v63 }
0x1495   :  { %v3273_v31 = vsel %vm3270_vm7, %v3272_v37, %v3268_v32 }
0x1496   :  { %v3274_v2 = vmul.f32 %v6849_v50, %v3273_v31 }
0x1497   :  { %v5134_v46 = vpop.permute.xlu0 %5133 }
0x1498   :  { %v5135_v29 = vunpack.i.l.bf16 %v5134_v46  ;;  %4977 = vmatmul.msk.f32.gmra.mxu2 %vm623_vm10, %v3274_v2  ;;  %v5136_v4 = vunpack.i.h.bf16 %v5134_v46  ;;  %v6930_v42 = vpop.f32.mrf.mxu1 }
0x149a   :  { %3697 = vmatpush.msra.mxu2 %v5135_v29 }
0x149c   :  { %3698 = vmatpush.msra.mxu2 %v5136_v4 }
0x149e   :  { %3699 = vmatpush.msra.mxu2 %v3667_v62 }
0x14a0   :  { %5008 = vmatpush.xpose.msk.msrb.mxu2 %vm531_vm15, %v3824_v25 }
0x14a1   :  { %3815 = vrot.lane.b32.xlu0 %v6582_v5, %s5626_s24 }
0x14a4   :  { %5009 = vmatpush.xpose.msk.msrb.mxu2 %vm531_vm15, %v3822_v8 }
0x14a8   :  { %5010 = vmatpush.xpose.msk.msrb.mxu2 %vm531_vm15, %v3820_v12 }
0x14a9   :  { %3817 = vrot.lane.b32.xlu0 %v6587_v1, %s5626_s24 }
0x14b1   :  { %3867 = vrot.lane.b32.xlu0 %v6656_v40, %s5626_s24 }
0x14b5   :  { %v3354_v50 = vpop.f32.mrf.mxu2 }
0x14b6   :  { %4981 = vmatmul.msk.f32.gmra.mxu3 %vm531_vm15, %v3354_v50 }
0x14bd   :  { %v3357_v26 = vpop.f32.mrf.mxu2 }
0x14be   :  { %4982 = vmatmul.msk.f32.gmra.mxu3 %vm531_vm15, %v3357_v26 }
0x14c2   :  { %v3560_v48 = vpop.xlane.xlu0 %3559 }
0x14c3   :  { %5392 = vrcp.f32 %v3560_v48  ;;  %v3587_v1 = vand.u32 2147483648, %v3560_v48  ;;  %v3585_v40 = vand.u32 2147483647, %v3560_v48  ;;  %vm3581_vm9 = vweird.f32 %v3560_v48 }
0x14c5   :  { %v3588_v41 = vor.u32 1.1754944e-38, %v3587_v1  ;;  %vm3586_vm12 = vcmp.eq.f32.partialorder %v3585_v40, 8.507059e+37  ;;  %v2624_v40 = vld [vmem:[#allocation6 + $0x110] sm:$0xff] }
0x14c6   :  { %v3563_v5 = vpop.xlane.xlu2 %3562  ;;  %3787 = vmatpush.msra.mxu1 %v2624_v40 }
0x14c7   :  { %5394 = vrcp.f32 %v3563_v5  ;;  %v3602_v58 = vand.u32 2147483648, %v3563_v5  ;;  %vm3596_vm14 = vweird.f32 %v3563_v5  ;;  %v3600_v60 = vand.u32 2147483647, %v3563_v5 }
0x14c9   :  { %v5393_v24 = vpop.eup %5392  ;;  %v3603_v7 = vor.u32 1.1754944e-38, %v3602_v58  ;;  %vm3601_vm2 = vcmp.eq.f32.partialorder %v3600_v60, 8.507059e+37 }
0x14ca   :  { %v3577_v17 = vmul.f32 %v5393_v24, %v3560_v48  ;;  %vm3582_vm8 = vweird.f32 %v5393_v24 }
0x14cb   :  { %vm3583_vm11 = vmor %vm3581_vm9, %vm3582_vm8 }
0x14cc   :  { %v3578_v45 = vsub.f32 1.0, %v3577_v17 }
0x14cd   :  { %v5395_v21 = vpop.eup %5394 }
0x14ce   :  { %v3579_v39 = vmul.f32 %v5393_v24, %v3578_v45  ;;  %v3592_v55 = vmul.f32 %v5395_v21, %v3563_v5  ;;  %v3477_v3 = vpop.permute.xlu2 %3476  ;;  %vm3597_vm13 = vweird.f32 %v5395_v21  ;;  %v3864_v5 = vpop.permute.xlu1 %3863 }
0x14cf   :  { %vm3598_vm1 = vmor %vm3596_vm14, %vm3597_vm13 }
0x14d0   :  { %v3580_v20 = vadd.f32 %v5393_v24, %v3579_v39  ;;  %v3593_v51 = vsub.f32 1.0, %v3592_v55 }
0x14d2   :  { %v3584_v0 = vsel %vm3583_vm11, %v5393_v24, %v3580_v20  ;;  %v3594_v23 = vmul.f32 %v5395_v21, %v3593_v51 }
0x14d3   :  { %v3589_v52 = vsel %vm3586_vm12, %v3588_v41, %v3584_v0 }
0x14d4   :  { %v3590_v62 = vmul.f32 %v6877_v22, %v3589_v52  ;;  %v3595_v30 = vadd.f32 %v5395_v21, %v3594_v23 }
0x14d5   :  { %v3475_v27 = vpop.permute.xlu0 %3474 }
0x14d6   :  { %4994 = vmatmul.msk.f32.gmra.mxu1 %vm531_vm15, %v3475_v27  ;;  %4996 = vmatmul.msk.f32.vlgmr.msra.gmra.mxu2 %vm623_vm10, %v3590_v62  ;;  %v3874_v59 = vpop.permute.xlu2 %3873  ;;  %v3599_v57 = vsel %vm3598_vm1, %v5395_v21, %v3595_v30  ;;  %v2631_v21 = vadd.f32 %v6855_v44, %v6496_v36 }
0x14d7   :  { %5014 = vmatpush.xpose.msk.msra.mxu3 %vm531_vm15, %v3874_v59  ;;  %v3604_v9 = vsel %vm3601_vm2, %v3603_v7, %v3599_v57 }
0x14d8   :  { %v3605_v22 = vmul.f32 %v6881_v33, %v3604_v9  ;;  %v3028_v1 = vadd.f32 %v3016_v28, %v2631_v21  ;;  %v5147_v9 = vpack.i.bf16 %v6604_v34, %v6546_v49 }
0x14db   :  { %5015 = vmatpush.xpose.msk.msra.mxu3 %vm531_vm15, %v3872_v10 }
0x14de   :  { %4995 = vmatmul.msk.f32.gmra.mxu1 %vm531_vm15, %v3477_v3  ;;  %4997 = vmatmul.msk.f32.gmra.mxu2 %vm623_vm10, %v3605_v22  ;;  %v3870_v43 = vpop.permute.xlu2 %3869 }
0x14df   :  { %5016 = vmatpush.xpose.msk.msra.mxu3 %vm531_vm15, %v3870_v43 }
0x14e6   :  { %v3866_v17 = vpop.permute.xlu2 %3865 }
0x14ef   :  { %v3513_v47 = vpop.f32.mrf.mxu1 }
0x14f0   :  { %v3531_v63 = vsel %vm623_vm10, %v3513_v47, -inf }
0x14f1   :  { %3532 = vmax.xlane.f32.xlu1 %v3531_v63 }
0x1500   :  { %v3566_v37 = vpop.xlane.xlu0 %3565 }
0x1501   :  { %5396 = vrcp.f32 %v3566_v37  ;;  %v3617_v2 = vand.u32 2147483648, %v3566_v37  ;;  %v3615_v29 = vand.u32 2147483647, %v3566_v37  ;;  %vm3611_vm4 = vweird.f32 %v3566_v37 }
0x1503   :  { %v3618_v25 = vor.u32 1.1754944e-38, %v3617_v2  ;;  %vm3616_vm6 = vcmp.eq.f32.partialorder %v3615_v29, 8.507059e+37 }
0x1507   :  { %v5397_v32 = vpop.eup %5396 }
0x1508   :  { %v3607_v31 = vmul.f32 %v5397_v32, %v3566_v37  ;;  %vm3612_vm3 = vweird.f32 %v5397_v32 }
0x1509   :  { %vm3613_vm5 = vmor %vm3611_vm4, %vm3612_vm3 }
0x150a   :  { %v3608_v33 = vsub.f32 1.0, %v3607_v31 }
0x150c   :  { %v3609_v46 = vmul.f32 %v5397_v32, %v3608_v33 }
0x150e   :  { %v3610_v4 = vadd.f32 %v5397_v32, %v3609_v46 }
0x1510   :  { %v3614_v8 = vsel %vm3613_vm5, %v5397_v32, %v3610_v4 }
0x1511   :  { %v3619_v12 = vsel %vm3616_vm6, %v3618_v25, %v3614_v8 }
0x1512   :  { %v3620_v50 = vmul.f32 %v6900_v56, %v3619_v12  ;;  %v6941_v56 = vpop.f32.mrf.mxu3 }
0x1513   :  { %v3816_v48 = vpop.permute.xlu0 %3815 }
0x1514   :  { %4998 = vmatmul.msk.f32.gmra.mxu2 %vm623_vm10, %v3620_v50 }
0x151b   :  { %v3360_v26 = vpop.f32.mrf.mxu2  ;;  %v3818_v24 = vpop.permute.xlu0 %3817 }
0x151c   :  { %4983 = vmatmul.msk.f32.gmra.mxu3 %vm531_vm15, %v3360_v26  ;;  %5011 = vmatmul.msk.f32.vlgmr.msrb.gmra.mxu2 %vm531_vm15, %v3814_v53 }
0x1523   :  { %v3868_v45 = vpop.permute.xlu0 %3867 }
0x1524   :  { %5012 = vmatmul.msk.f32.gmra.mxu2 %vm531_vm15, %v3816_v48  ;;  %5017 = vmatmul.msk.f32.vlgmr.msra.gmra.mxu3 %vm531_vm15, %v3864_v5 }
0x152c   :  { %5013 = vmatmul.msk.f32.gmra.mxu2 %vm531_vm15, %v3818_v24  ;;  %5018 = vmatmul.msk.f32.gmra.mxu3 %vm531_vm15, %v3866_v17 }
0x1534   :  { %5019 = vmatmul.msk.f32.gmra.mxu3 %vm531_vm15, %v3868_v45 }
0x1539   :  { %v3407_v39 = vpop.f32.mrf.mxu3 }
0x153a   :  { %v6946_v55 = vadd.f32 %v3407_v39, %v3028_v1 }
0x1541   :  { %v6967_v27 = vpop.f32.mrf.mxu3 }
0x1553   :  { %v3516_v3 = vpop.f32.mrf.mxu1 }
0x1554   :  { %v3534_v53 = vsel %vm623_vm10, %v3516_v3, -inf }
0x1555   :  { %3535 = vmax.xlane.f32.xlu2 %v3534_v53 }
0x1559   :  { %v3701_v20 = vpop.f32.mrf.mxu2 }
0x155a   :  { %5002 = vmatmul.msk.f32.vlgmr.msra.gmra.mxu1 %vm531_vm15, %v3701_v20 }
0x155b   :  { %v3519_v51 = vpop.f32.mrf.mxu1 }
0x155c   :  { %v3537_v41 = vsel %vm623_vm10, %v3519_v51, -inf }
0x155d   :  { %3538 = vmax.xlane.f32.xlu0 %v3537_v41 }
0x1561   :  { %v3704_v0 = vpop.f32.mrf.mxu2 }
0x1562   :  { %5003 = vmatmul.msk.f32.gmra.mxu1 %vm531_vm15, %v3704_v0 }
0x1564   :  { %v3533_v36 = vpop.xlane.xlu1 %3532 }
0x1565   :  { %v3543_v44 = vsub.f32 %v3513_v47, %v3533_v36 }
0x1567   :  { %v3552_v23 = vmul.f32 1.442695, %v3543_v44 }
0x1569   :  { %5398 = vpow2.f32 %v3552_v23 }
0x156f   :  { %v6954_v28 = vpop.eup %5398 }
0x1570   :  { %v3567_v58 = vsel %vm623_vm10, %v6954_v28, 0.0 }
0x1571   :  { %5138 = vrot.lane.b32.xlu0 %v6701_v54, %s5624_s22 }
0x1597   :  { %v3707_v52 = vpop.f32.mrf.mxu2 }
0x1598   :  { %5004 = vmatmul.msk.f32.gmra.mxu1 %vm531_vm15, %v3707_v52 }
0x159b   :  { %3568 = vadd.xlane.f32.xlu0 %v3567_v58 }
0x159f   :  { %v6959_v62 = vpop.f32.mrf.mxu2  ;;  %v6973_v10 = vpop.f32.mrf.mxu3 }
0x15a0   :  { %v3913_v46 = vsel %vm623_vm10, %v6959_v62, -inf }
0x15a7   :  { %v6961_v30 = vpop.f32.mrf.mxu2 }
0x15a8   :  { %v3916_v34 = vsel %vm623_vm10, %v6961_v30, -inf }
0x15af   :  { %v6963_v60 = vpop.f32.mrf.mxu2 }
0x15b0   :  { %v3919_v54 = vsel %vm623_vm10, %v6963_v60, -inf }
0x15b1   :  { %3920 = vmax.xlane.f32.xlu0 %v3919_v54 }
0x15c5   :  { %5143 = vrot.lane.b32.xlu0 %v6614_v18, %s5627_s25  ;;  %v6980_v18 = vpop.f32.mrf.mxu3 }
0x15c6   :  { %v3922_v25 = vsel %vm623_vm10, %v6980_v18, -inf }
0x15c8   :  { %v3536_v59 = vpop.xlane.xlu2 %3535 }
0x15c9   :  { %v3544_v57 = vsub.f32 %v3516_v3, %v3536_v59 }
0x15cb   :  { %v3554_v7 = vmul.f32 1.442695, %v3544_v57 }
0x15cd   :  { %5400 = vpow2.f32 %v3554_v7  ;;  %5148 = vrot.lane.b32.xlu0 %v5147_v9, %s5627_s25  ;;  %v6988_v31 = vpop.f32.mrf.mxu3 }
0x15ce   :  { %v3925_v29 = vsel %vm623_vm10, %v6988_v31, -inf }
0x15d0   :  { %v3539_v22 = vpop.xlane.xlu0 %3538 }
0x15d1   :  { %v3545_v43 = vsub.f32 %v3519_v51, %v3539_v22 }
0x15d3   :  { %v6976_v47 = vpop.eup %5400  ;;  %v3556_v63 = vmul.f32 1.442695, %v3545_v43 }
0x15d4   :  { %v3570_v37 = vsel %vm623_vm10, %v6976_v47, 0.0 }
0x15d5   :  { %5402 = vpow2.f32 %v3556_v63  ;;  %3571 = vadd.xlane.f32.xlu2 %v3570_v37  ;;  %v6996_v8 = vpop.f32.mrf.mxu3 }
0x15d6   :  { %v3928_v12 = vsel %vm623_vm10, %v6996_v8, -inf }
0x15db   :  { %v6982_v32 = vpop.eup %5402 }
0x15dc   :  { %v3573_v49 = vsel %vm623_vm10, %v6982_v32, 0.0 }
0x15dd   :  { %3574 = vadd.xlane.f32.xlu1 %v3573_v49  ;;  %3917 = vmax.xlane.f32.xlu2 %v3916_v34 }
0x15e3   :  { %v5139_v33 = vpop.permute.xlu0 %5138 }
0x15e4   :  { %v5140_v2 = vunpack.i.l.bf16 %v5139_v33  ;;  %v5141_v4 = vunpack.i.h.bf16 %v5139_v33 }
0x15e5   :  { %3914 = vmax.xlane.f32.xlu1 %v3913_v46  ;;  %3926 = vmax.xlane.f32.xlu2 %v3925_v29 }
0x15e6   :  { %3741 = vmatpush.msra.mxu0 %v5140_v2 }
0x15e8   :  { %3742 = vmatpush.msra.mxu0 %v5141_v4 }
0x15ed   :  { %3923 = vmax.xlane.f32.xlu1 %v3922_v25 }
0x15f5   :  { %3929 = vmax.xlane.f32.xlu1 %v3928_v12 }
0x15fd   :  { %3710 = vrot.lane.b32.xlu2 %v6592_v38, %s5624_s22 }
0x160e   :  { %v3569_v50 = vpop.xlane.xlu0 %3568 }
0x160f   :  { %5404 = vrcp.f32 %v3569_v50  ;;  %v3632_v36 = vand.u32 2147483648, %v3569_v50  ;;  %vm3626_vm8 = vweird.f32 %v3569_v50  ;;  %v3630_v44 = vand.u32 2147483647, %v3569_v50 }
0x1611   :  { %v3633_v7 = vor.u32 1.1754944e-38, %v3632_v36  ;;  %vm3631_vm11 = vcmp.eq.f32.partialorder %v3630_v44, 8.507059e+37 }
0x1615   :  { %v5405_v17 = vpop.eup %5404 }
0x1616   :  { %v3622_v21 = vmul.f32 %v5405_v17, %v3569_v50  ;;  %vm3627_vm7 = vweird.f32 %v5405_v17 }
0x1617   :  { %vm3628_vm9 = vmor %vm3626_vm8, %vm3627_vm7 }
0x1618   :  { %v3623_v1 = vsub.f32 1.0, %v3622_v21 }
0x161a   :  { %v3624_v53 = vmul.f32 %v5405_v17, %v3623_v1 }
0x161c   :  { %v3625_v51 = vadd.f32 %v5405_v17, %v3624_v53 }
0x161e   :  { %v3629_v54 = vsel %vm3628_vm9, %v5405_v17, %v3625_v51 }
0x161f   :  { %v3634_v43 = vsel %vm3631_vm11, %v3633_v7, %v3629_v54 }
0x1620   :  { %v3635_v33 = vmul.f32 %v6954_v28, %v3634_v43 }
0x1624   :  { %v7002_v26 = vpop.xlane.xlu0 %3920 }
0x1625   :  { %v3933_v25 = vsub.f32 %v6963_v60, %v7002_v26 }
0x1627   :  { %v3941_v1 = vmul.f32 1.442695, %v3933_v25 }
0x1637   :  { %v7004_v48 = vpop.permute.xlu0 %5143 }
0x1638   :  { %v5145_v29 = vunpack.i.l.bf16 %v7004_v48 }
0x163f   :  { %v7006_v5 = vpop.permute.xlu0 %5148 }
0x1640   :  { %v5151_v24 = vunpack.i.h.bf16 %v7006_v5  ;;  %v5150_v60 = vunpack.i.l.bf16 %v7006_v5 }
0x1642   :  { %4132 = vmatpush.msra.mxu2 %v5151_v24  ;;  %v5146_v24 = vunpack.i.h.bf16 %v7004_v48 }
0x1648   :  { %v3572_v45 = vpop.xlane.xlu2 %3571 }
0x1649   :  { %5406 = vrcp.f32 %v3572_v45  ;;  %v3647_v49 = vand.u32 2147483648, %v3572_v45  ;;  %vm3641_vm13 = vweird.f32 %v3572_v45 }
0x164b   :  { %v3648_v17 = vor.u32 1.1754944e-38, %v3647_v49 }
0x164f   :  { %v5407_v39 = vpop.eup %5406 }
0x1650   :  { %v7009_v40 = vpop.xlane.xlu1 %3574  ;;  %v3918_v3 = vpop.xlane.xlu2 %3917  ;;  %v3637_v20 = vmul.f32 %v5407_v39, %v3572_v45  ;;  %vm3642_vm12 = vweird.f32 %v5407_v39 }
0x1651   :  { %5408 = vrcp.f32 %v7009_v40  ;;  %v3932_v9 = vsub.f32 %v6961_v30, %v3918_v3  ;;  %vm7022_vm14 = vmor %vm3641_vm13, %vm3642_vm12  ;;  %v3662_v48 = vand.u32 2147483648, %v7009_v40  ;;  %vm3656_vm3 = vweird.f32 %v7009_v40 }
0x1652   :  { %v3638_v41 = vsub.f32 1.0, %v3637_v20 }
0x1653   :  { %v3939_v34 = vmul.f32 1.442695, %v3932_v9  ;;  %v5152_v9 = vpack.i.bf16 %v6592_v38, %v6597_v11 }
0x1654   :  { %v3639_v59 = vmul.f32 %v5407_v39, %v3638_v41 }
0x1656   :  { %v3640_v63 = vadd.f32 %v5407_v39, %v3639_v59 }
0x1657   :  { %v7012_v0 = vpop.eup %5408 }
0x1658   :  { %v3915_v23 = vpop.xlane.xlu1 %3914  ;;  %v7014_v52 = vpop.xlane.xlu2 %3926  ;;  %v3652_v57 = vmul.f32 %v7012_v0, %v7009_v40  ;;  %v3644_v28 = vsel %vm7022_vm14, %v5407_v39, %v3640_v63  ;;  %vm3657_vm2 = vweird.f32 %v7012_v0  ;;  %v3660_v39 = vand.u32 2147483647, %v7009_v40 }
0x1659   :  { %v3931_v58 = vsub.f32 %v6959_v62, %v3915_v23  ;;  %v3645_v62 = vand.u32 2147483647, %v3572_v45  ;;  %vm7047_vm4 = vmor %vm3656_vm3, %vm3657_vm2  ;;  %v3663_v40 = vor.u32 1.1754944e-38, %v3662_v48 }
0x165a   :  { %v3653_v37 = vsub.f32 1.0, %v3652_v57  ;;  %vm3661_vm5 = vcmp.eq.f32.partialorder %v3660_v39, 8.507059e+37 }
0x165b   :  { %v3937_v22 = vmul.f32 1.442695, %v3931_v58  ;;  %vm3646_vm1 = vcmp.eq.f32.partialorder %v3645_v62, 8.507059e+37 }
0x165c   :  { %v3654_v12 = vmul.f32 %v7012_v0, %v3653_v37  ;;  %v3649_v26 = vsel %vm3646_vm1, %v3648_v17, %v3644_v28 }
0x165d   :  { %5410 = vpow2.f32 %v3937_v22  ;;  %v3650_v53 = vmul.f32 %v6976_v47, %v3649_v26  ;;  %v3935_v47 = vsub.f32 %v6988_v31, %v7014_v52 }
0x165e   :  { %5412 = vpow2.f32 %v3939_v34  ;;  %v3655_v21 = vadd.f32 %v7012_v0, %v3654_v12 }
0x1660   :  { %v3924_v2 = vpop.xlane.xlu1 %3923  ;;  %v3711_v46 = vpop.permute.xlu2 %3710  ;;  %v3659_v41 = vsel %vm7047_vm4, %v7012_v0, %v3655_v21  ;;  %v3945_v0 = vmul.f32 1.442695, %v3935_v47 }
0x1661   :  { %v3934_v30 = vsub.f32 %v6980_v18, %v3924_v2  ;;  %3743 = vmatpush.msra.mxu0 %v3711_v46  ;;  %v3664_v58 = vsel %vm3661_vm5, %v3663_v40, %v3659_v41 }
0x1662   :  { %4999 = vmatmul.msk.f32.vlgmr.msra.gmra.mxu0 %vm623_vm10, %v3635_v33  ;;  %v3665_v54 = vmul.f32 %v6982_v32, %v3664_v58 }
0x1663   :  { %v7033_v50 = vpop.eup %5410  ;;  %v3943_v45 = vmul.f32 1.442695, %v3934_v30  ;;  %4088 = vmatpush.msrb.mxu0 %v5145_v29 }
0x1664   :  { %v3949_v18 = vsel %vm623_vm10, %v7033_v50, 0.0  ;;  %v7045_v5 = vpop.eup %5412 }
0x1665   :  { %5414 = vpow2.f32 %v3943_v45  ;;  %4089 = vmatpush.msrb.mxu0 %v5146_v24  ;;  %3950 = vadd.xlane.f32.xlu1 %v3949_v18 }
0x1666   :  { %5416 = vpow2.f32 %v3941_v1 }
0x1667   :  { %4090 = vmatpush.msrb.mxu0 %v5150_v60 }
0x1668   :  { %v3930_v3 = vpop.xlane.xlu1 %3929 }
0x1669   :  { %v3936_v51 = vsub.f32 %v6996_v8, %v3930_v3  ;;  %v3952_v8 = vsel %vm623_vm10, %v7045_v5, 0.0 }
0x166a   :  { %5000 = vmatmul.msk.f32.gmra.mxu0 %vm623_vm10, %v3650_v53 }
0x166b   :  { %v7056_v36 = vpop.eup %5414  ;;  %v3947_v44 = vmul.f32 1.442695, %v3936_v51 }
0x166c   :  { %v3958_v23 = vsel %vm623_vm10, %v7056_v36, 0.0  ;;  %v7065_v59 = vpop.eup %5416 }
0x166d   :  { %5418 = vpow2.f32 %v3947_v44  ;;  %3959 = vadd.xlane.f32.xlu2 %v3958_v23  ;;  %3953 = vadd.xlane.f32.xlu1 %v3952_v8  ;;  %v3955_v57 = vsel %vm623_vm10, %v7065_v59, 0.0 }
0x166e   :  { %5420 = vpow2.f32 %v3945_v0 }
0x1672   :  { %5001 = vmatmul.msk.f32.gmra.mxu0 %vm623_vm10, %v3665_v54 }
0x1673   :  { %v7068_v31 = vpop.eup %5418 }
0x1674   :  { %v3964_v52 = vsel %vm623_vm10, %v7068_v31, 0.0  ;;  %v7074_v7 = vpop.eup %5420 }
0x1675   :  { %3965 = vadd.xlane.f32.xlu0 %v3964_v52  ;;  %3956 = vadd.xlane.f32.xlu1 %v3955_v57  ;;  %v3961_v32 = vsel %vm623_vm10, %v7074_v7, 0.0 }
0x167d   :  { %3962 = vadd.xlane.f32.xlu1 %v3961_v32 }
0x1696   :  { %5153 = vrot.lane.b32.xlu1 %v5152_v9, %s5627_s25 }
0x16d8   :  { %v3951_v22 = vpop.xlane.xlu1 %3950 }
0x16d9   :  { %5422 = vrcp.f32 %v3951_v22  ;;  %v3978_v33 = vand.u32 2147483648, %v3951_v22  ;;  %v3976_v2 = vand.u32 2147483647, %v3951_v22  ;;  %vm3972_vm7 = vweird.f32 %v3951_v22 }
0x16db   :  { %v3979_v38 = vor.u32 1.1754944e-38, %v3978_v33  ;;  %vm3977_vm9 = vcmp.eq.f32.partialorder %v3976_v2, 8.507059e+37 }
0x16df   :  { %v5423_v43 = vpop.eup %5422  ;;  %v3745_v63 = vpop.f32.mrf.mxu0 }
0x16e0   :  { %v3968_v37 = vmul.f32 %v5423_v43, %v3951_v22  ;;  %v3954_v49 = vpop.xlane.xlu1 %3953  ;;  %5005 = vmatmul.msk.f32.gmra.mxu1 %vm531_vm15, %v3745_v63  ;;  %vm3973_vm6 = vweird.f32 %v5423_v43  ;;  %v3960_v17 = vpop.xlane.xlu2 %3959 }
0x16e1   :  { %5424 = vrcp.f32 %v3954_v49  ;;  %vm3974_vm8 = vmor %vm3972_vm7, %vm3973_vm6  ;;  %v3993_v18 = vand.u32 2147483648, %v3954_v49  ;;  %vm3987_vm12 = vweird.f32 %v3954_v49  ;;  %v3991_v26 = vand.u32 2147483647, %v3954_v49 }
0x16e2   :  { %v3969_v34 = vsub.f32 1.0, %v3968_v37  ;;  %vm4017_vm6 = vweird.f32 %v3960_v17 }
0x16e3   :  { %v3994_v39 = vor.u32 1.1754944e-38, %v3993_v18  ;;  %vm3992_vm14 = vcmp.eq.f32.partialorder %v3991_v26, 8.507059e+37 }
0x16e4   :  { %v3970_v62 = vmul.f32 %v5423_v43, %v3969_v34  ;;  %v4021_v34 = vand.u32 2147483647, %v3960_v17 }
0x16e6   :  { %v3971_v46 = vadd.f32 %v5423_v43, %v3970_v62 }
0x16e7   :  { %v5425_v29 = vpop.eup %5424  ;;  %v3748_v11 = vpop.f32.mrf.mxu0 }
0x16e8   :  { %v3975_v4 = vsel %vm3974_vm8, %v5423_v43, %v3971_v46  ;;  %v3983_v30 = vmul.f32 %v5425_v29, %v3954_v49  ;;  %v3957_v25 = vpop.xlane.xlu1 %3956  ;;  %5006 = vmatmul.msk.f32.gmra.mxu1 %vm531_vm15, %v3748_v11  ;;  %vm3988_vm11 = vweird.f32 %v5425_v29  ;;  %v3966_v54 = vpop.xlane.xlu0 %3965  ;;  %v4023_v49 = vand.u32 2147483648, %v3960_v17 }
0x16e9   :  { %v3980_v12 = vsel %vm3977_vm9, %v3979_v38, %v3975_v4  ;;  %5426 = vrcp.f32 %v3957_v25  ;;  %vm3989_vm13 = vmor %vm3987_vm12, %vm3988_vm11  ;;  %v4008_v40 = vand.u32 2147483648, %v3957_v25  ;;  %v4006_v23 = vand.u32 2147483647, %v3957_v25 }
0x16ea   :  { %v3981_v28 = vmul.f32 %v7033_v50, %v3980_v12  ;;  %v3984_v24 = vsub.f32 1.0, %v3983_v30  ;;  %5428 = vrcp.f32 %v3960_v17  ;;  %vm4002_vm2 = vweird.f32 %v3957_v25 }
0x16eb   :  { %v4009_v58 = vor.u32 1.1754944e-38, %v4008_v40  ;;  %vm4007_vm4 = vcmp.eq.f32.partialorder %v4006_v23, 8.507059e+37  ;;  %v4024_v46 = vor.u32 1.1754944e-38, %v4023_v49  ;;  %vm4022_vm8 = vcmp.eq.f32.partialorder %v4021_v34, 8.507059e+37  ;;  %v3789_v40 = vpop.f32.mrf.mxu1 }
0x16ec   :  { %v3985_v45 = vmul.f32 %v5425_v29, %v3984_v24  ;;  %5020 = vmatmul.msk.f32.vlgmr.msrb.gmra.mxu0 %vm623_vm10, %v3981_v28  ;;  %v4053_v26 = vand.u32 2147483648, %v3966_v54 }
0x16ee   :  { %v3986_v60 = vadd.f32 %v5425_v29, %v3985_v45 }
0x16ef   :  { %v3751_v21 = vpop.f32.mrf.mxu0  ;;  %v5427_v48 = vpop.eup %5426 }
0x16f0   :  { %5007 = vmatmul.msk.f32.gmra.mxu1 %vm531_vm15, %v3751_v21  ;;  %v3990_v1 = vsel %vm3989_vm13, %v5425_v29, %v3986_v60  ;;  %v3998_v50 = vmul.f32 %v5427_v48, %v3957_v25  ;;  %v3963_v3 = vpop.xlane.xlu1 %3962  ;;  %v5429_v53 = vpop.eup %5428  ;;  %vm4003_vm1 = vweird.f32 %v5427_v48  ;;  %v4051_v21 = vand.u32 2147483647, %v3966_v54 }
0x16f1   :  { %v3995_v20 = vsel %vm3992_vm14, %v3994_v39, %v3990_v1  ;;  %5430 = vrcp.f32 %v3963_v3  ;;  %v4013_v47 = vmul.f32 %v5429_v53, %v3960_v17  ;;  %vm4004_vm3 = vmor %vm4002_vm2, %vm4003_vm1  ;;  %vm4018_vm5 = vweird.f32 %v5429_v53 }
0x16f2   :  { %v3999_v51 = vsub.f32 1.0, %v3998_v50  ;;  %v3996_v41 = vmul.f32 %v7045_v5, %v3995_v20  ;;  %5432 = vrcp.f32 %v3966_v54  ;;  %vm4019_vm7 = vmor %vm4017_vm6, %vm4018_vm5  ;;  %v4038_v30 = vand.u32 2147483648, %v3963_v3 }
0x16f3   :  { %v4014_v0 = vsub.f32 1.0, %v4013_v47  ;;  %vm4032_vm11 = vweird.f32 %v3963_v3  ;;  %v4036_v28 = vand.u32 2147483647, %v3963_v3  ;;  %vm4047_vm1 = vweird.f32 %v3966_v54 }
0x16f4   :  { %v4000_v44 = vmul.f32 %v5427_v48, %v3999_v51  ;;  %5021 = vmatmul.msk.f32.gmra.mxu0 %vm623_vm10, %v3996_v41  ;;  %v4039_v45 = vor.u32 1.1754944e-38, %v4038_v30  ;;  %v3807_v47 = vadd.f32 %v3789_v40, %v6861_v16 }
0x16f5   :  { %v4015_v9 = vmul.f32 %v5429_v53, %v4014_v0  ;;  %vm4037_vm13 = vcmp.eq.f32.partialorder %v4036_v28, 8.507059e+37 }
0x16f6   :  { %v4001_v8 = vadd.f32 %v5427_v48, %v4000_v44 }
0x16f7   :  { %v5431_v57 = vpop.eup %5430  ;;  %v4016_v43 = vadd.f32 %v5429_v53, %v4015_v9 }
0x16f8   :  { %v4005_v52 = vsel %vm4004_vm3, %v5427_v48, %v4001_v8  ;;  %v4028_v22 = vmul.f32 %v5431_v57, %v3963_v3  ;;  %v5433_v37 = vpop.eup %5432  ;;  %vm4033_vm9 = vweird.f32 %v5431_v57  ;;  %v4054_v48 = vor.u32 1.1754944e-38, %v4053_v26  ;;  %v2625_v3 = vld [vmem:[#allocation6 + $0x118] sm:$0xff] }
0x16f9   :  { %v4010_v32 = vsel %vm4007_vm4, %v4009_v58, %v4005_v52  ;;  %v4020_v33 = vsel %vm4019_vm7, %v5429_v53, %v4016_v43  ;;  %v4043_v62 = vmul.f32 %v5433_v37, %v3966_v54  ;;  %vm4034_vm12 = vmor %vm4032_vm11, %vm4033_vm9  ;;  %vm4048_vm14 = vweird.f32 %v5433_v37  ;;  %4178 = vmatpush.msrb.mxu3 %v2625_v3  ;;  %v3792_v58 = vpop.f32.mrf.mxu1  ;;  %v5482_v52 = vld [vmem:[#allocation7 + $0x13] ss:$0 sm:$0xff] }
0x16fa   :  { %v4011_v5 = vmul.f32 %v7065_v59, %v4010_v32  ;;  %v4029_v63 = vsub.f32 1.0, %v4028_v22  ;;  %v4025_v59 = vsel %vm4022_vm8, %v4024_v46, %v4020_v33  ;;  %vm4049_vm2 = vmor %vm4047_vm1, %vm4048_vm14  ;;  %vm4052_vm3 = vcmp.eq.f32.partialorder %v4051_v21, 8.507059e+37 }
0x16fb   :  { %v4044_v11 = vsub.f32 1.0, %v4043_v62  ;;  %v4026_v12 = vmul.f32 %v7056_v36, %v4025_v59  ;;  %v3808_v0 = vadd.f32 %v3792_v58, %v6869_v35 }
0x16fc   :  { %5022 = vmatmul.msk.f32.gmra.mxu0 %vm623_vm10, %v4011_v5  ;;  %v4030_v2 = vmul.f32 %v5431_v57, %v4029_v63 }
0x16fd   :  { %v4045_v24 = vmul.f32 %v5433_v37, %v4044_v11 }
0x16fe   :  { %v4031_v4 = vadd.f32 %v5431_v57, %v4030_v2 }
0x16ff   :  { %v4046_v60 = vadd.f32 %v5433_v37, %v4045_v24 }
0x1700   :  { %v4035_v17 = vsel %vm4034_vm12, %v5431_v57, %v4031_v4  ;;  %v2630_v57 = vadd.f32 %v5482_v52, %v6470_v13 }
0x1701   :  { %v4040_v18 = vsel %vm4037_vm13, %v4039_v45, %v4035_v17  ;;  %v4050_v36 = vsel %vm4049_vm2, %v5433_v37, %v4046_v60  ;;  %v3795_v9 = vpop.f32.mrf.mxu1 }
0x1702   :  { %v4041_v1 = vmul.f32 %v7074_v7, %v4040_v18  ;;  %v4055_v39 = vsel %vm4052_vm3, %v4054_v48, %v4050_v36  ;;  %v3027_v5 = vadd.f32 %v6917_v15, %v2630_v57  ;;  %v2632_v15 = vadd.f32 %v5482_v52, %v6502_v61  ;;  %v4354_v57 = vld [vmem:[#allocation6 + $0x130] sm:$0xff] }
0x1703   :  { %v4056_v50 = vmul.f32 %v7068_v31, %v4055_v39 }
0x1704   :  { %v3418_v22 = vadd.f32 %v6941_v56, %v3027_v5  ;;  %v3029_v2 = vadd.f32 %v6925_v6, %v2632_v15  ;;  %v4353_v5 = vld [vmem:[#allocation6 + $0x128] sm:$0xff] }
0x1706   :  { %v3809_v43 = vadd.f32 %v3795_v9, %v3418_v22  ;;  %v3420_v46 = vadd.f32 %v6967_v27, %v3029_v2 }
0x1708   :  { %v5154_v29 = vpop.permute.xlu1 %5153 }
0x1709   :  { %v5155_v38 = vunpack.i.l.bf16 %v5154_v29  ;;  %v5156_v25 = vunpack.i.h.bf16 %v5154_v29 }
0x170b   :  { %4133 = vmatpush.msra.mxu2 %v5155_v38  ;;  %v2633_v38 = vadd.f32 %v5482_v52, %v6508_v19  ;;  %v4355_v52 = vld [vmem:[#allocation6 + $0x138] sm:$0xff] }
0x170c   :  { %4388 = vmatpush.msra.mxu0 %v4355_v52  ;;  %v4480_v52 = vld [vmem:[#allocation6 + $0x1b8] sm:$0xff] }
0x170d   :  { %4134 = vmatpush.msra.mxu2 %v5156_v25  ;;  %4481 = vmatpush.msrb.mxu1 %v4480_v52 }
0x170e   :  { %5023 = vmatmul.msk.f32.vlgmr.msra.gmra.mxu2 %vm623_vm10, %v4026_v12  ;;  %4389 = vmatpush.msra.mxu0 %v4354_v57  ;;  %v4479_v57 = vld [vmem:[#allocation6 + $0x1b0] sm:$0xff] }
0x170f   :  { %4482 = vmatpush.msrb.mxu1 %v4479_v57 }
0x1710   :  { %4390 = vmatpush.msra.mxu0 %v4353_v5  ;;  %v4478_v5 = vld [vmem:[#allocation6 + $0x1a8] sm:$0xff] }
0x1711   :  { %4483 = vmatpush.msrb.mxu1 %v4478_v5 }
0x1716   :  { %5024 = vmatmul.msk.f32.gmra.mxu2 %vm623_vm10, %v4041_v1 }
0x171e   :  { %5025 = vmatmul.msk.f32.gmra.mxu2 %vm623_vm10, %v4056_v50 }
0x175d   :  { %v3798_v13 = vpop.f32.mrf.mxu1 }
0x175e   :  { %v3810_v49 = vadd.f32 %v3798_v13, %v6946_v55  ;;  %v3030_v55 = vadd.f32 %v6930_v42, %v2633_v38  ;;  %v7183_v38 = vld [vmem:[#allocation7 + $0x14] ss:$0 sm:$0xff] }
0x1760   :  { %v3421_v6 = vadd.f32 %v6973_v10, %v3030_v55 }
0x1765   :  { %v3801_v62 = vpop.f32.mrf.mxu1 }
0x1766   :  { %v3811_v29 = vadd.f32 %v3801_v62, %v3420_v46 }
0x1769   :  { %v4092_v53 = vpop.f32.mrf.mxu0 }
0x176a   :  { %5026 = vmatmul.msk.f32.vlgmr.msrb.gmra.mxu3 %vm531_vm15, %v4092_v53 }
0x176d   :  { %v3804_v4 = vpop.f32.mrf.mxu1 }
0x176e   :  { %v3812_v30 = vadd.f32 %v3804_v4, %v3421_v6  ;;  %v7185_v6 = vld [vmem:[#allocation7 + $0x15] ss:$0 sm:$0xff] }
0x1771   :  { %v4095_v20 = vpop.f32.mrf.mxu0 }
0x1772   :  { %5027 = vmatmul.msk.f32.gmra.mxu3 %vm531_vm15, %v4095_v20 }
0x1779   :  { %v4098_v7 = vpop.f32.mrf.mxu0 }
0x177a   :  { %5028 = vmatmul.msk.f32.gmra.mxu3 %vm531_vm15, %v4098_v7 }
0x1791   :  { %v4136_v51 = vpop.f32.mrf.mxu2 }
0x1792   :  { %5029 = vmatmul.msk.f32.gmra.mxu3 %vm531_vm15, %v4136_v51 }
0x1799   :  { %v4139_v41 = vpop.f32.mrf.mxu2 }
0x179a   :  { %5030 = vmatmul.msk.f32.gmra.mxu3 %vm531_vm15, %v4139_v41 }
0x17a1   :  { %v4142_v31 = vpop.f32.mrf.mxu2 }
0x17a2   :  { %5031 = vmatmul.msk.f32.gmra.mxu3 %vm531_vm15, %v4142_v31 }
0x17ed   :  { %v4180_v44 = vpop.f32.mrf.mxu3 }
0x17ee   :  { %v7103_v23 = vadd.f32 %v4180_v44, %v3807_v47 }
0x17f0   :  { %v4206_v8 = vsel %vm143_vm0, %v7103_v23, 0.0 }
0x17f1   :  { %4207 = vadd.xlane.f32.xlu1 %v4206_v8 }
0x17f5   :  { %v4183_v54 = vpop.f32.mrf.mxu3 }
0x17f6   :  { %v7109_v32 = vadd.f32 %v4183_v54, %v3808_v0 }
0x17f8   :  { %v4209_v16 = vsel %vm143_vm0, %v7109_v32, 0.0 }
0x17f9   :  { %4210 = vadd.xlane.f32.xlu2 %v4209_v16  ;;  %v4352_v16 = vld [vmem:[#allocation6 + $0x120] sm:$0xff] }
0x17fa   :  { %4391 = vmatpush.msra.mxu0 %v4352_v16 }
0x17fd   :  { %v4186_v63 = vpop.f32.mrf.mxu3 }
0x17fe   :  { %v7115_v37 = vadd.f32 %v4186_v63, %v3809_v43 }
0x1800   :  { %v4212_v35 = vsel %vm143_vm0, %v7115_v37, 0.0 }
0x1801   :  { %4213 = vadd.xlane.f32.xlu2 %v4212_v35 }
0x1815   :  { %v4189_v34 = vpop.f32.mrf.mxu3 }
0x1816   :  { %v7121_v33 = vadd.f32 %v4189_v34, %v3810_v49 }
0x1818   :  { %v4215_v56 = vsel %vm143_vm0, %v7121_v33, 0.0 }
0x1819   :  { %4216 = vadd.xlane.f32.xlu0 %v4215_v56 }
0x181d   :  { %v4192_v59 = vpop.f32.mrf.mxu3 }
0x181e   :  { %v7128_v11 = vadd.f32 %v4192_v59, %v3811_v29 }
0x1820   :  { %v4218_v61 = vsel %vm143_vm0, %v7128_v11, 0.0 }
0x1821   :  { %4219 = vadd.xlane.f32.xlu2 %v4218_v61 }
0x1825   :  { %v4195_v25 = vpop.f32.mrf.mxu3 }
0x1826   :  { %v7134_v12 = vadd.f32 %v4195_v25, %v3812_v30 }
0x1828   :  { %v4221_v27 = vsel %vm143_vm0, %v7134_v12, 0.0 }
0x1829   :  { %4222 = vadd.xlane.f32.xlu0 %v4221_v27 }
0x1864   :  { %v4208_v19 = vpop.xlane.xlu1 %4207 }
0x1865   :  { %v4224_v28 = vmul.f32 %v4208_v19, %v5676_v14 }
0x1867   :  { %v7140_v42 = vsub.f32 %v7103_v23, %v4224_v28 }
0x1869   :  { %v4236_v24 = vmul.f32 %v7140_v42, %v7140_v42 }
0x186b   :  { %v4242_v17 = vsel %vm143_vm0, %v4236_v24, 0.0 }
0x186c   :  { %4243 = vadd.xlane.f32.xlu2 %v4242_v17  ;;  %v4211_v10 = vpop.xlane.xlu2 %4210 }
0x186d   :  { %v4225_v45 = vmul.f32 %v4211_v10, %v5676_v14 }
0x186f   :  { %v7147_v18 = vsub.f32 %v7109_v32, %v4225_v45 }
0x1871   :  { %v4237_v60 = vmul.f32 %v7147_v18, %v7147_v18 }
0x1873   :  { %v4245_v26 = vsel %vm143_vm0, %v4237_v60, 0.0 }
0x1874   :  { %4246 = vadd.xlane.f32.xlu0 %v4245_v26  ;;  %v4214_v21 = vpop.xlane.xlu2 %4213 }
0x1875   :  { %v4226_v1 = vmul.f32 %v4214_v21, %v5676_v14 }
0x1877   :  { %v7154_v36 = vsub.f32 %v7115_v37, %v4226_v1 }
0x1879   :  { %v4238_v48 = vmul.f32 %v7154_v36, %v7154_v36 }
0x187b   :  { %v4248_v39 = vsel %vm143_vm0, %v4238_v48, 0.0 }
0x187c   :  { %4249 = vadd.xlane.f32.xlu2 %v4248_v39 }
0x188c   :  { %v4217_v50 = vpop.xlane.xlu0 %4216 }
0x188d   :  { %v4227_v3 = vmul.f32 %v4217_v50, %v5676_v14 }
0x188f   :  { %v7161_v53 = vsub.f32 %v7121_v33, %v4227_v3 }
0x1891   :  { %v4239_v20 = vmul.f32 %v7161_v53, %v7161_v53 }
0x1893   :  { %v4251_v7 = vsel %vm143_vm0, %v4239_v20, 0.0 }
0x1894   :  { %4252 = vadd.xlane.f32.xlu0 %v4251_v7  ;;  %v4220_v51 = vpop.xlane.xlu2 %4219 }
0x1895   :  { %v4228_v41 = vmul.f32 %v4220_v51, %v5676_v14 }
0x1897   :  { %v7168_v31 = vsub.f32 %v7128_v11, %v4228_v41 }
0x1899   :  { %v4240_v40 = vmul.f32 %v7168_v31, %v7168_v31 }
0x189b   :  { %v4254_v47 = vsel %vm143_vm0, %v4240_v40, 0.0 }
0x189c   :  { %v4223_v44 = vpop.xlane.xlu0 %4222  ;;  %4255 = vadd.xlane.f32.xlu1 %v4254_v47 }
0x189d   :  { %v4229_v8 = vmul.f32 %v4223_v44, %v5676_v14 }
0x189f   :  { %v7175_v58 = vsub.f32 %v7134_v12, %v4229_v8 }
0x18a1   :  { %v4241_v0 = vmul.f32 %v7175_v58, %v7175_v58 }
0x18a3   :  { %v4257_v54 = vsel %vm143_vm0, %v4241_v0, 0.0 }
0x18a4   :  { %4258 = vadd.xlane.f32.xlu2 %v4257_v54 }
0x18df   :  { %v4244_v9 = vpop.xlane.xlu2 %4243 }
0x18e0   :  { %v4260_v22 = vmul.f32 %v4244_v9, %v5676_v14 }
0x18e2   :  { %v4266_v43 = vadd.f32 1e-05, %v4260_v22 }
0x18e4   :  { %5434 = vrsqrt.f32 %v4266_v43  ;;  %vm4278_vm10 = vweird.f32 %v4266_v43 }
0x18e7   :  { %v4247_v63 = vpop.xlane.xlu0 %4246 }
0x18e8   :  { %v4261_v13 = vmul.f32 %v4247_v63, %v5676_v14 }
0x18ea   :  { %v5435_v35 = vpop.eup %5434  ;;  %v4267_v34 = vadd.f32 1e-05, %v4261_v13 }
0x18eb   :  { %v4273_v49 = vmul.f32 %v5435_v35, %v4266_v43  ;;  %vm4279_vm15 = vweird.f32 %v5435_v35  ;;  %v4477_v43 = vld [vmem:[#allocation6 + $0x1a0] sm:$0xff] }
0x18ec   :  { %5436 = vrsqrt.f32 %v4267_v34  ;;  %vm4280_vm4 = vmor %vm4278_vm10, %vm4279_vm15  ;;  %vm4288_vm6 = vweird.f32 %v4267_v34  ;;  %4484 = vmatpush.msrb.mxu1 %v4477_v43 }
0x18ed   :  { %v4274_v15 = vmul.f32 %v5435_v35, %v4273_v49 }
0x18ef   :  { %v4275_v62 = vmul.f32 0.5, %v4274_v15  ;;  %v4250_v56 = vpop.xlane.xlu2 %4249 }
0x18f0   :  { %v4262_v46 = vmul.f32 %v4250_v56, %v5676_v14 }
0x18f1   :  { %v4276_v2 = vsub.f32 1.5, %v4275_v62 }
0x18f2   :  { %v5437_v59 = vpop.eup %5436  ;;  %v4268_v55 = vadd.f32 1e-05, %v4262_v46 }
0x18f3   :  { %v4277_v29 = vmul.f32 %v5435_v35, %v4276_v2  ;;  %v4283_v4 = vmul.f32 %v5437_v59, %v4267_v34  ;;  %vm4289_vm5 = vweird.f32 %v5437_v59 }
0x18f4   :  { %5438 = vrsqrt.f32 %v4268_v55  ;;  %vm4290_vm7 = vmor %vm4288_vm6, %vm4289_vm5  ;;  %vm4298_vm9 = vweird.f32 %v4268_v55 }
0x18f5   :  { %v4281_v61 = vsel %vm4280_vm4, %v5435_v35, %v4277_v29  ;;  %v4284_v25 = vmul.f32 %v5437_v59, %v4283_v4 }
0x18f6   :  { %v4332_v30 = vmul.f32 %v4281_v61, %v7140_v42 }
0x18f7   :  { %v4285_v19 = vmul.f32 0.5, %v4284_v25 }
0x18f8   :  { %v4339_v27 = vmul.f32 %v7183_v38, %v4332_v30 }
0x18f9   :  { %v4286_v24 = vsub.f32 1.5, %v4285_v19 }
0x18fa   :  { %v4346_v28 = vadd.f32 %v7185_v6, %v4339_v27  ;;  %v5439_v17 = vpop.eup %5438 }
0x18fb   :  { %v4287_v10 = vmul.f32 %v5437_v59, %v4286_v24  ;;  %v4293_v45 = vmul.f32 %v5439_v17, %v4268_v55  ;;  %vm4299_vm8 = vweird.f32 %v5439_v17 }
0x18fc   :  { %5032 = vmatmul.msk.f32.vlgmr.msra.gmra.mxu0 %vm143_vm0, %v4346_v28  ;;  %vm4300_vm11 = vmor %vm4298_vm9, %vm4299_vm8 }
0x18fd   :  { %v4291_v60 = vsel %vm4290_vm7, %v5437_v59, %v4287_v10  ;;  %v4294_v26 = vmul.f32 %v5439_v17, %v4293_v45 }
0x18fe   :  { %v4333_v42 = vmul.f32 %v4291_v60, %v7147_v18 }
0x18ff   :  { %v4295_v21 = vmul.f32 0.5, %v4294_v26 }
0x1900   :  { %v4340_v1 = vmul.f32 %v7183_v38, %v4333_v42  ;;  %v4475_v42 = vld [vmem:[#allocation6 + $0x190] sm:$0xff] }
0x1901   :  { %v4296_v48 = vsub.f32 1.5, %v4295_v21  ;;  %v4474_v21 = vld [vmem:[#allocation6 + $0x188] sm:$0xff] }
0x1902   :  { %v4347_v39 = vadd.f32 %v7185_v6, %v4340_v1  ;;  %v4473_v1 = vld [vmem:[#allocation6 + $0x180] sm:$0xff] }
0x1903   :  { %v4297_v50 = vmul.f32 %v5439_v17, %v4296_v48  ;;  %v4472_v48 = vld [vmem:[#allocation6 + $0x178] sm:$0xff] }
0x1904   :  { %5033 = vmatmul.msk.f32.gmra.mxu0 %vm143_vm0, %v4347_v39  ;;  %v4471_v39 = vld [vmem:[#allocation6 + $0x170] sm:$0xff] }
0x1905   :  { %v4301_v3 = vsel %vm4300_vm11, %v5439_v17, %v4297_v50  ;;  %v4470_v50 = vld [vmem:[#allocation6 + $0x168] sm:$0xff] }
0x1906   :  { %v4334_v7 = vmul.f32 %v4301_v3, %v7154_v36  ;;  %v4466_v3 = vld [vmem:[#allocation6 + $0x148] sm:$0xff] }
0x1907   :  { %v4253_v20 = vpop.xlane.xlu0 %4252 }
0x1908   :  { %v4263_v51 = vmul.f32 %v4253_v20, %v5676_v14  ;;  %v4341_v18 = vmul.f32 %v7183_v38, %v4334_v7  ;;  %v4465_v20 = vld [vmem:[#allocation6 + $0x140] sm:$0xff]  ;;  %v5174_v7 = vld [vmem:[#allocation7 + $0x16] ss:$0 sm:$0xff] }
0x190a   :  { %v4269_v41 = vadd.f32 1e-05, %v4263_v51  ;;  %v4348_v40 = vadd.f32 %v7185_v6, %v4341_v18 }
0x190c   :  { %5440 = vrsqrt.f32 %v4269_v41  ;;  %5034 = vmatmul.msk.f32.gmra.mxu0 %vm143_vm0, %v4348_v40  ;;  %vm4308_vm13 = vweird.f32 %v4269_v41 }
0x190f   :  { %v4256_v47 = vpop.xlane.xlu1 %4255 }
0x1910   :  { %v4264_v44 = vmul.f32 %v4256_v47, %v5676_v14 }
0x1912   :  { %v5441_v8 = vpop.eup %5440  ;;  %v4270_v0 = vadd.f32 1e-05, %v4264_v44 }
0x1913   :  { %v4303_v54 = vmul.f32 %v5441_v8, %v4269_v41  ;;  %vm4309_vm12 = vweird.f32 %v5441_v8 }
0x1914   :  { %5442 = vrsqrt.f32 %v4270_v0  ;;  %vm4310_vm14 = vmor %vm4308_vm13, %vm4309_vm12  ;;  %vm4318_vm2 = vweird.f32 %v4270_v0 }
0x1915   :  { %v4304_v36 = vmul.f32 %v5441_v8, %v4303_v54 }
0x1917   :  { %v4305_v16 = vmul.f32 0.5, %v4304_v36  ;;  %v4259_v9 = vpop.xlane.xlu2 %4258 }
0x1918   :  { %v4265_v22 = vmul.f32 %v4259_v9, %v5676_v14 }
0x1919   :  { %v4306_v63 = vsub.f32 1.5, %v4305_v16 }
0x191a   :  { %v5443_v35 = vpop.eup %5442  ;;  %v4271_v13 = vadd.f32 1e-05, %v4265_v22 }
0x191b   :  { %v4307_v49 = vmul.f32 %v5441_v8, %v4306_v63  ;;  %v4313_v34 = vmul.f32 %v5443_v35, %v4270_v0  ;;  %vm4319_vm1 = vweird.f32 %v5443_v35 }
0x191c   :  { %5444 = vrsqrt.f32 %v4271_v13  ;;  %vm4320_vm3 = vmor %vm4318_vm2, %vm4319_vm1  ;;  %vm4328_vm10 = vweird.f32 %v4271_v13 }
0x191d   :  { %v4311_v15 = vsel %vm4310_vm14, %v5441_v8, %v4307_v49  ;;  %v4314_v62 = vmul.f32 %v5443_v35, %v4313_v34 }
0x191e   :  { %v4335_v2 = vmul.f32 %v4311_v15, %v7161_v53 }
0x191f   :  { %v4315_v56 = vmul.f32 0.5, %v4314_v62 }
0x1920   :  { %v4342_v46 = vmul.f32 %v7183_v38, %v4335_v2 }
0x1921   :  { %v4316_v29 = vsub.f32 1.5, %v4315_v56 }
0x1922   :  { %v5445_v59 = vpop.eup %5444  ;;  %v4349_v55 = vadd.f32 %v7185_v6, %v4342_v46 }
0x1923   :  { %v4317_v61 = vmul.f32 %v5443_v35, %v4316_v29  ;;  %v4323_v4 = vmul.f32 %v5445_v59, %v4271_v13  ;;  %vm4329_vm15 = vweird.f32 %v5445_v59 }
0x1924   :  { %5035 = vmatmul.msk.f32.gmra.mxu0 %vm143_vm0, %v4349_v55  ;;  %vm4330_vm4 = vmor %vm4328_vm10, %vm4329_vm15 }
0x1925   :  { %v4321_v30 = vsel %vm4320_vm3, %v5443_v35, %v4317_v61  ;;  %v4324_v25 = vmul.f32 %v5445_v59, %v4323_v4 }
0x1926   :  { %v4336_v27 = vmul.f32 %v4321_v30, %v7168_v31  ;;  %v4476_v31 = vld [vmem:[#allocation6 + $0x198] sm:$0xff] }
0x1927   :  { %v4325_v19 = vmul.f32 0.5, %v4324_v25  ;;  %4485 = vmatpush.msrb.mxu1 %v4476_v31 }
0x1928   :  { %v4343_v53 = vmul.f32 %v7183_v38, %v4336_v27 }
0x1929   :  { %v4326_v28 = vsub.f32 1.5, %v4325_v19  ;;  %4486 = vmatpush.msrb.mxu1 %v4475_v42 }
0x192a   :  { %v4350_v24 = vadd.f32 %v7185_v6, %v4343_v53 }
0x192b   :  { %v4327_v17 = vmul.f32 %v5445_v59, %v4326_v28  ;;  %4487 = vmatpush.msrb.mxu1 %v4474_v21 }
0x192c   :  { %5036 = vmatmul.msk.f32.gmra.mxu0 %vm143_vm0, %v4350_v24 }
0x192d   :  { %v4331_v10 = vsel %vm4330_vm4, %v5445_v59, %v4327_v17  ;;  %4488 = vmatpush.msrb.mxu1 %v4473_v1 }
0x192e   :  { %v4337_v45 = vmul.f32 %v4331_v10, %v7175_v58  ;;  %v4469_v58 = vld [vmem:[#allocation6 + $0x160] sm:$0xff] }
0x192f   :  { %4489 = vmatpush.msrb.mxu1 %v4472_v48 }
0x1930   :  { %v4344_v60 = vmul.f32 %v7183_v38, %v4337_v45  ;;  %v4468_v38 = vld [vmem:[#allocation6 + $0x158] sm:$0xff] }
0x1931   :  { %4490 = vmatpush.msrb.mxu1 %v4471_v39 }
0x1932   :  { %v4351_v26 = vadd.f32 %v7185_v6, %v4344_v60  ;;  %v4467_v6 = vld [vmem:[#allocation6 + $0x150] sm:$0xff] }
0x1933   :  { %4491 = vmatpush.msrb.mxu1 %v4470_v50 }
0x1934   :  { %5037 = vmatmul.msk.f32.gmra.mxu0 %vm143_vm0, %v4351_v26 }
0x1935   :  { %4492 = vmatpush.msrb.mxu1 %v4469_v58 }
0x1937   :  { %4493 = vmatpush.msrb.mxu1 %v4468_v38 }
0x1939   :  { %4494 = vmatpush.msrb.mxu1 %v4467_v6 }
0x193b   :  { %4495 = vmatpush.msrb.mxu1 %v4466_v3 }
0x193d   :  { %4496 = vmatpush.msrb.mxu1 %v4465_v20 }
0x1979   :  { %v4393_v51 = vpop.f32.mrf.mxu0 }
0x197a   :  { %v4394_v41 = vadd.f32 %v5174_v7, %v4393_v51 }
0x197c   :  { %v4417_v18 = vmul.f32 %v4394_v41, %v4394_v41  ;;  %v4411_v43 = vmul.f32 0.5, %v4394_v41 }
0x197e   :  { %v4423_v40 = vmul.f32 %v4417_v18, %v4394_v41 }
0x1980   :  { %v4429_v47 = vmul.f32 0.044715, %v4423_v40 }
0x1981   :  { %v4396_v8 = vpop.f32.mrf.mxu0 }
0x1982   :  { %v4435_v44 = vadd.f32 %v4429_v47, %v4394_v41  ;;  %v4397_v54 = vadd.f32 %v5174_v7, %v4396_v8 }
0x1984   :  { %v4441_v0 = vmul.f32 0.7978845, %v4435_v44  ;;  %v4418_v52 = vmul.f32 %v4397_v54, %v4397_v54  ;;  %v4412_v46 = vmul.f32 0.5, %v4397_v54 }
0x1986   :  { %5446 = vtanh.f32 %v4441_v0  ;;  %v4424_v57 = vmul.f32 %v4418_v52, %v4397_v54  ;;  %v5175_v52 = vld [vmem:[#allocation7 + $0x17] ss:$0 sm:$0xff] }
0x1988   :  { %v4430_v36 = vmul.f32 0.044715, %v4424_v57 }
0x1989   :  { %v4399_v5 = vpop.f32.mrf.mxu0 }
0x198a   :  { %v4436_v9 = vadd.f32 %v4430_v36, %v4397_v54  ;;  %v4400_v22 = vadd.f32 %v5174_v7, %v4399_v5 }
0x198c   :  { %v5447_v16 = vpop.eup %5446  ;;  %v4419_v35 = vmul.f32 %v4400_v22, %v4400_v22  ;;  %v4442_v13 = vmul.f32 0.7978845, %v4436_v9  ;;  %v4413_v61 = vmul.f32 0.5, %v4400_v22 }
0x198d   :  { %v4453_v63 = vadd.f32 1.0, %v5447_v16 }
0x198e   :  { %v4425_v34 = vmul.f32 %v4419_v35, %v4400_v22  ;;  %5448 = vtanh.f32 %v4442_v13 }
0x198f   :  { %v4459_v49 = vmul.f32 %v4453_v63, %v4411_v43 }
0x1990   :  { %v4431_v15 = vmul.f32 0.044715, %v4425_v34 }
0x1991   :  { %4497 = vmatmul.f32.vlgmr.msrb.gmra.mxu1 %v4459_v49 }
0x1992   :  { %v4437_v62 = vadd.f32 %v4431_v15, %v4400_v22 }
0x1994   :  { %v5449_v2 = vpop.eup %5448  ;;  %v4443_v56 = vmul.f32 0.7978845, %v4437_v62 }
0x1995   :  { %v4454_v29 = vadd.f32 1.0, %v5449_v2 }
0x1996   :  { %5450 = vtanh.f32 %v4443_v56 }
0x1997   :  { %v4460_v59 = vmul.f32 %v4454_v29, %v4412_v46 }
0x1999   :  { %4500 = vmatmul.f32.gmra.mxu1 %v4460_v59 }
0x199c   :  { %v5451_v55 = vpop.eup %5450 }
0x199d   :  { %v4455_v4 = vadd.f32 1.0, %v5451_v55 }
0x199f   :  { %v4461_v25 = vmul.f32 %v4455_v4, %v4413_v61 }
0x19a1   :  { %v4402_v30 = vpop.f32.mrf.mxu0  ;;  %4503 = vmatmul.f32.gmra.mxu1 %v4461_v25 }
0x19a2   :  { %v4403_v27 = vadd.f32 %v5174_v7, %v4402_v30 }
0x19a4   :  { %v4420_v19 = vmul.f32 %v4403_v27, %v4403_v27  ;;  %v4414_v58 = vmul.f32 0.5, %v4403_v27 }
0x19a6   :  { %v4426_v53 = vmul.f32 %v4420_v19, %v4403_v27 }
0x19a8   :  { %v4432_v28 = vmul.f32 0.044715, %v4426_v53 }
0x19a9   :  { %v4405_v24 = vpop.f32.mrf.mxu0 }
0x19aa   :  { %v4438_v17 = vadd.f32 %v4432_v28, %v4403_v27  ;;  %v4406_v10 = vadd.f32 %v5174_v7, %v4405_v24 }
0x19ac   :  { %v4421_v45 = vmul.f32 %v4406_v10, %v4406_v10  ;;  %v4444_v60 = vmul.f32 0.7978845, %v4438_v17  ;;  %v4415_v40 = vmul.f32 0.5, %v4406_v10 }
0x19ae   :  { %v4427_v26 = vmul.f32 %v4421_v45, %v4406_v10  ;;  %5452 = vtanh.f32 %v4444_v60 }
0x19b0   :  { %v4433_v31 = vmul.f32 0.044715, %v4427_v26 }
0x19b1   :  { %v4408_v42 = vpop.f32.mrf.mxu0 }
0x19b2   :  { %v4439_v21 = vadd.f32 %v4433_v31, %v4406_v10  ;;  %v4409_v1 = vadd.f32 %v5174_v7, %v4408_v42 }
0x19b4   :  { %v5453_v48 = vpop.eup %5452  ;;  %v4422_v39 = vmul.f32 %v4409_v1, %v4409_v1  ;;  %v4445_v50 = vmul.f32 0.7978845, %v4439_v21  ;;  %v4416_v7 = vmul.f32 0.5, %v4409_v1 }
0x19b5   :  { %v4456_v38 = vadd.f32 1.0, %v5453_v48 }
0x19b6   :  { %v4428_v6 = vmul.f32 %v4422_v39, %v4409_v1  ;;  %5454 = vtanh.f32 %v4445_v50 }
0x19b7   :  { %v4462_v3 = vmul.f32 %v4456_v38, %v4414_v58 }
0x19b8   :  { %v4434_v20 = vmul.f32 0.044715, %v4428_v6 }
0x19b9   :  { %4506 = vmatmul.f32.gmra.mxu1 %v4462_v3 }
0x19ba   :  { %v4440_v51 = vadd.f32 %v4434_v20, %v4409_v1 }
0x19bc   :  { %v5455_v41 = vpop.eup %5454  ;;  %v4446_v18 = vmul.f32 0.7978845, %v4440_v51 }
0x19bd   :  { %v4457_v47 = vadd.f32 1.0, %v5455_v41 }
0x19be   :  { %5456 = vtanh.f32 %v4446_v18  ;;  %v4681_v18 = vld [vmem:[#allocation9 + $0x30] sm:$0xff] }
0x19bf   :  { %v4463_v44 = vmul.f32 %v4457_v47, %v4415_v40  ;;  %4714 = vmatpush.msrb.mxu2 %v4681_v18  ;;  %v4680_v40 = vld [vmem:[#allocation9 + $0x28] sm:$0xff]  ;;  %v4679_v47 = vld [vmem:[#allocation9 + $0x20] sm:$0xff] }
0x19c1   :  { %4509 = vmatmul.f32.gmra.mxu1 %v4463_v44  ;;  %4715 = vmatpush.msrb.mxu2 %v4680_v40  ;;  %v4678_v44 = vld [vmem:[#allocation9 + $0x18] sm:$0xff] }
0x19c3   :  { %4716 = vmatpush.msrb.mxu2 %v4679_v47 }
0x19c4   :  { %v5457_v8 = vpop.eup %5456 }
0x19c5   :  { %v4458_v0 = vadd.f32 1.0, %v5457_v8  ;;  %4717 = vmatpush.msrb.mxu2 %v4678_v44 }
0x19c7   :  { %v4464_v54 = vmul.f32 %v4458_v0, %v4416_v7 }
0x19c9   :  { %4512 = vmatmul.f32.gmra.mxu1 %v4464_v54 }
0x1a0e   :  { %v4498_v57 = vpop.f32.mrf.mxu1 }
0x1a0f   :  { %v4516_v36 = vadd.f32 %v4498_v57, %v7103_v23 }
0x1a11   :  { %v4524_v5 = vadd.f32 %v5175_v52, %v4516_v36 }
0x1a13   :  { %v4532_v16 = vsel %vm143_vm0, %v4524_v5, 0.0 }
0x1a14   :  { %4533 = vadd.xlane.f32.xlu0 %v4532_v16 }
0x1a16   :  { %v4501_v9 = vpop.f32.mrf.mxu1 }
0x1a17   :  { %v4517_v22 = vadd.f32 %v4501_v9, %v7109_v32 }
0x1a19   :  { %v4525_v43 = vadd.f32 %v5175_v52, %v4517_v22 }
0x1a1b   :  { %v4535_v63 = vsel %vm143_vm0, %v4525_v43, 0.0 }
0x1a1c   :  { %4536 = vadd.xlane.f32.xlu1 %v4535_v63 }
0x1a1e   :  { %v4504_v35 = vpop.f32.mrf.mxu1 }
0x1a1f   :  { %v4518_v13 = vadd.f32 %v4504_v35, %v7115_v37 }
0x1a21   :  { %v4526_v49 = vadd.f32 %v5175_v52, %v4518_v13 }
0x1a23   :  { %v4538_v34 = vsel %vm143_vm0, %v4526_v49, 0.0 }
0x1a24   :  { %4539 = vadd.xlane.f32.xlu2 %v4538_v34 }
0x1a36   :  { %v4507_v15 = vpop.f32.mrf.mxu1 }
0x1a37   :  { %v4519_v23 = vadd.f32 %v4507_v15, %v7121_v33 }
0x1a39   :  { %v4527_v62 = vadd.f32 %v5175_v52, %v4519_v23 }
0x1a3b   :  { %v4541_v2 = vsel %vm143_vm0, %v4527_v62, 0.0 }
0x1a3c   :  { %4542 = vadd.xlane.f32.xlu0 %v4541_v2 }
0x1a3e   :  { %v4510_v56 = vpop.f32.mrf.mxu1 }
0x1a3f   :  { %v4520_v32 = vadd.f32 %v4510_v56, %v7128_v11 }
0x1a41   :  { %v4528_v46 = vadd.f32 %v5175_v52, %v4520_v32 }
0x1a43   :  { %v4544_v29 = vsel %vm143_vm0, %v4528_v46, 0.0 }
0x1a44   :  { %4545 = vadd.xlane.f32.xlu1 %v4544_v29 }
0x1a46   :  { %v4513_v59 = vpop.f32.mrf.mxu1 }
0x1a47   :  { %v4521_v37 = vadd.f32 %v4513_v59, %v7134_v12 }
0x1a49   :  { %v4529_v55 = vadd.f32 %v5175_v52, %v4521_v37 }
0x1a4b   :  { %v4547_v61 = vsel %vm143_vm0, %v4529_v55, 0.0 }
0x1a4c   :  { %4548 = vadd.xlane.f32.xlu2 %v4547_v61 }
0x1a87   :  { %v4534_v4 = vpop.xlane.xlu0 %4533 }
0x1a88   :  { %v4550_v33 = vmul.f32 %v4534_v4, %v5676_v14 }
0x1a8a   :  { %v7227_v30 = vsub.f32 %v4524_v5, %v4550_v33 }
0x1a8c   :  { %v4562_v25 = vmul.f32 %v7227_v30, %v7227_v30 }
0x1a8e   :  { %v4568_v11 = vsel %vm143_vm0, %v4562_v25, 0.0 }
0x1a8f   :  { %4569 = vadd.xlane.f32.xlu0 %v4568_v11  ;;  %v4537_v27 = vpop.xlane.xlu1 %4536 }
0x1a90   :  { %v4551_v19 = vmul.f32 %v4537_v27, %v5676_v14 }
0x1a92   :  { %v7233_v53 = vsub.f32 %v4525_v43, %v4551_v19 }
0x1a94   :  { %v4563_v12 = vmul.f32 %v7233_v53, %v7233_v53 }
0x1a96   :  { %v4571_v28 = vsel %vm143_vm0, %v4563_v12, 0.0 }
0x1a97   :  { %4572 = vadd.xlane.f32.xlu1 %v4571_v28  ;;  %v4540_v24 = vpop.xlane.xlu2 %4539 }
0x1a98   :  { %v4552_v17 = vmul.f32 %v4540_v24, %v5676_v14 }
0x1a9a   :  { %v7239_v10 = vsub.f32 %v4526_v49, %v4552_v17  ;;  %v7265_v49 = vld [vmem:[#allocation7 + $0x3] ss:$0 sm:$0xff] }
0x1a9c   :  { %v4564_v45 = vmul.f32 %v7239_v10, %v7239_v10 }
0x1a9e   :  { %v4574_v60 = vsel %vm143_vm0, %v4564_v45, 0.0 }
0x1a9f   :  { %4575 = vadd.xlane.f32.xlu2 %v4574_v60 }
0x1aaf   :  { %v4543_v26 = vpop.xlane.xlu0 %4542 }
0x1ab0   :  { %v4553_v31 = vmul.f32 %v4543_v26, %v5676_v14 }
0x1ab2   :  { %v7245_v42 = vsub.f32 %v4527_v62, %v4553_v31  ;;  %v7267_v62 = vld [vmem:[#allocation7 + $0x4] ss:$0 sm:$0xff] }
0x1ab4   :  { %v4565_v21 = vmul.f32 %v7245_v42, %v7245_v42 }
0x1ab6   :  { %v4577_v1 = vsel %vm143_vm0, %v4565_v21, 0.0 }
0x1ab7   :  { %4578 = vadd.xlane.f32.xlu0 %v4577_v1  ;;  %v4546_v48 = vpop.xlane.xlu1 %4545 }
0x1ab8   :  { %v4554_v39 = vmul.f32 %v4546_v48, %v5676_v14 }
0x1aba   :  { %v7251_v50 = vsub.f32 %v4528_v46, %v4554_v39 }
0x1abc   :  { %v4566_v58 = vmul.f32 %v7251_v50, %v7251_v50 }
0x1abe   :  { %v4580_v38 = vsel %vm143_vm0, %v4566_v58, 0.0  ;;  %v4750_v58 = vld [vmem:[#allocation9 + $0x70] sm:$0xff] }
0x1abf   :  { %4581 = vadd.xlane.f32.xlu1 %v4580_v38  ;;  %v4549_v6 = vpop.xlane.xlu2 %4548  ;;  %v4749_v38 = vld [vmem:[#allocation9 + $0x68] sm:$0xff]  ;;  %4780 = vmatpush.msra.mxu3 %v4750_v58 }
0x1ac0   :  { %v4555_v3 = vmul.f32 %v4549_v6, %v5676_v14  ;;  %v4748_v6 = vld [vmem:[#allocation9 + $0x60] sm:$0xff] }
0x1ac1   :  { %4781 = vmatpush.msra.mxu3 %v4749_v38 }
0x1ac2   :  { %v7257_v20 = vsub.f32 %v4529_v55, %v4555_v3 }
0x1ac3   :  { %4782 = vmatpush.msra.mxu3 %v4748_v6 }
0x1ac4   :  { %v4567_v51 = vmul.f32 %v7257_v20, %v7257_v20 }
0x1ac6   :  { %v4583_v41 = vsel %vm143_vm0, %v4567_v51, 0.0 }
0x1ac7   :  { %4584 = vadd.xlane.f32.xlu2 %v4583_v41 }
0x1b02   :  { %v4570_v8 = vpop.xlane.xlu0 %4569 }
0x1b03   :  { %v4586_v7 = vmul.f32 %v4570_v8, %v5676_v14 }
0x1b05   :  { %v4592_v0 = vadd.f32 1e-05, %v4586_v7 }
0x1b07   :  { %5458 = vrsqrt.f32 %v4592_v0  ;;  %vm4604_vm6 = vweird.f32 %v4592_v0 }
0x1b0a   :  { %v4573_v54 = vpop.xlane.xlu1 %4572 }
0x1b0b   :  { %v4587_v57 = vmul.f32 %v4573_v54, %v5676_v14 }
0x1b0d   :  { %v5459_v52 = vpop.eup %5458  ;;  %v4593_v5 = vadd.f32 1e-05, %v4587_v57 }
0x1b0e   :  { %v4599_v36 = vmul.f32 %v5459_v52, %v4592_v0  ;;  %vm4605_vm5 = vweird.f32 %v5459_v52 }
0x1b0f   :  { %5460 = vrsqrt.f32 %v4593_v5  ;;  %vm4606_vm7 = vmor %vm4604_vm6, %vm4605_vm5  ;;  %vm4614_vm9 = vweird.f32 %v4593_v5 }
0x1b10   :  { %v4600_v16 = vmul.f32 %v5459_v52, %v4599_v36 }
0x1b12   :  { %v4601_v9 = vmul.f32 0.5, %v4600_v16  ;;  %v4576_v43 = vpop.xlane.xlu2 %4575 }
0x1b13   :  { %v4588_v63 = vmul.f32 %v4576_v43, %v5676_v14 }
0x1b14   :  { %v4602_v22 = vsub.f32 1.5, %v4601_v9 }
0x1b15   :  { %v5461_v13 = vpop.eup %5460  ;;  %v4594_v34 = vadd.f32 1e-05, %v4588_v63 }
0x1b16   :  { %v4603_v35 = vmul.f32 %v5459_v52, %v4602_v22  ;;  %v4609_v23 = vmul.f32 %v5461_v13, %v4593_v5  ;;  %vm4615_vm8 = vweird.f32 %v5461_v13 }
0x1b17   :  { %5462 = vrsqrt.f32 %v4594_v34  ;;  %vm4616_vm11 = vmor %vm4614_vm9, %vm4615_vm8  ;;  %vm4624_vm13 = vweird.f32 %v4594_v34  ;;  %vm4753_vm8 = vcmask 523264  }
0x1b18   :  { %v4607_v15 = vsel %vm4606_vm7, %v5459_v52, %v4603_v35  ;;  %v4610_v56 = vmul.f32 %v5461_v13, %v4609_v23 }
0x1b19   :  { %v4658_v2 = vmul.f32 %v4607_v15, %v7227_v30 }
0x1b1a   :  { %v4611_v46 = vmul.f32 0.5, %v4610_v56 }
0x1b1b   :  { %v4665_v32 = vmul.f32 %v7265_v49, %v4658_v2 }
0x1b1c   :  { %v4612_v59 = vsub.f32 1.5, %v4611_v46  ;;  %v4746_v46 = vld [vmem:[#allocation9 + $0x50] sm:$0xff] }
0x1b1d   :  { %v4672_v29 = vadd.f32 %v7267_v62, %v4665_v32  ;;  %v5463_v37 = vpop.eup %5462 }
0x1b1e   :  { %v4613_v55 = vmul.f32 %v5461_v13, %v4612_v59  ;;  %v4619_v61 = vmul.f32 %v5463_v37, %v4594_v34  ;;  %vm4625_vm12 = vweird.f32 %v5463_v37  ;;  %v4744_v59 = vld [vmem:[#allocation9 + $0x40] sm:$0xff] }
0x1b1f   :  { %5038 = vmatmul.msk.f32.vlgmr.msrb.gmra.mxu2 %vm143_vm0, %v4672_v29  ;;  %vm4626_vm14 = vmor %vm4624_vm13, %vm4625_vm12  ;;  %v4745_v29 = vld [vmem:[#allocation9 + $0x48] sm:$0xff] }
0x1b20   :  { %v4617_v4 = vsel %vm4616_vm11, %v5461_v13, %v4613_v55  ;;  %v4620_v33 = vmul.f32 %v5463_v37, %v4619_v61  ;;  %v5178_v55 = vld [vmem:[#allocation7 + $0x5] ss:$0 sm:$0xff] }
0x1b21   :  { %v4659_v30 = vmul.f32 %v4617_v4, %v7233_v53 }
0x1b22   :  { %v4621_v25 = vmul.f32 0.5, %v4620_v33 }
0x1b23   :  { %v4666_v11 = vmul.f32 %v7265_v49, %v4659_v30 }
0x1b24   :  { %v4622_v27 = vsub.f32 1.5, %v4621_v25 }
0x1b25   :  { %v4673_v19 = vadd.f32 %v7267_v62, %v4666_v11 }
0x1b26   :  { %v4623_v12 = vmul.f32 %v5463_v37, %v4622_v27 }
0x1b27   :  { %5039 = vmatmul.msk.f32.gmra.mxu2 %vm143_vm0, %v4673_v19 }
0x1b28   :  { %v4627_v28 = vsel %vm4626_vm14, %v5463_v37, %v4623_v12  ;;  %v4743_v37 = vld [vmem:[#allocation9 + $0x38] sm:$0xff] }
0x1b29   :  { %v4660_v17 = vmul.f32 %v4627_v28, %v7239_v10 }
0x1b2a   :  { %v4579_v24 = vpop.xlane.xlu0 %4578 }
0x1b2b   :  { %v4589_v45 = vmul.f32 %v4579_v24, %v5676_v14  ;;  %v4667_v53 = vmul.f32 %v7265_v49, %v4660_v17 }
0x1b2d   :  { %v4595_v60 = vadd.f32 1e-05, %v4589_v45  ;;  %v4674_v26 = vadd.f32 %v7267_v62, %v4667_v53 }
0x1b2f   :  { %5464 = vrsqrt.f32 %v4595_v60  ;;  %5040 = vmatmul.msk.f32.gmra.mxu2 %vm143_vm0, %v4674_v26  ;;  %vm4634_vm2 = vweird.f32 %v4595_v60  ;;  %v5179_v26 = vld [vmem:[#allocation7 + $0x6] ss:$0 sm:$0xff] }
0x1b32   :  { %v4582_v31 = vpop.xlane.xlu1 %4581 }
0x1b33   :  { %v4590_v21 = vmul.f32 %v4582_v31, %v5676_v14 }
0x1b35   :  { %v5465_v1 = vpop.eup %5464  ;;  %v4596_v48 = vadd.f32 1e-05, %v4590_v21 }
0x1b36   :  { %v4629_v39 = vmul.f32 %v5465_v1, %v4595_v60  ;;  %vm4635_vm1 = vweird.f32 %v5465_v1 }
0x1b37   :  { %5466 = vrsqrt.f32 %v4596_v48  ;;  %vm4636_vm3 = vmor %vm4634_vm2, %vm4635_vm1  ;;  %vm4644_vm10 = vweird.f32 %v4596_v48 }
0x1b38   :  { %v4630_v10 = vmul.f32 %v5465_v1, %v4629_v39 }
0x1b3a   :  { %v4631_v3 = vmul.f32 0.5, %v4630_v10  ;;  %v4585_v51 = vpop.xlane.xlu2 %4584 }
0x1b3b   :  { %v4591_v41 = vmul.f32 %v4585_v51, %v5676_v14 }
0x1b3c   :  { %v4632_v18 = vsub.f32 1.5, %v4631_v3 }
0x1b3d   :  { %v5467_v40 = vpop.eup %5466  ;;  %v4597_v47 = vadd.f32 1e-05, %v4591_v41 }
0x1b3e   :  { %v4633_v44 = vmul.f32 %v5465_v1, %v4632_v18  ;;  %v4639_v8 = vmul.f32 %v5467_v40, %v4596_v48  ;;  %vm4645_vm15 = vweird.f32 %v5467_v40 }
0x1b3f   :  { %5468 = vrsqrt.f32 %v4597_v47  ;;  %vm4646_vm4 = vmor %vm4644_vm10, %vm4645_vm15  ;;  %vm4654_vm6 = vweird.f32 %v4597_v47 }
0x1b40   :  { %v4637_v7 = vsel %vm4636_vm3, %v5465_v1, %v4633_v44  ;;  %v4640_v0 = vmul.f32 %v5467_v40, %v4639_v8 }
0x1b41   :  { %v4661_v54 = vmul.f32 %v4637_v7, %v7245_v42 }
0x1b42   :  { %v4641_v52 = vmul.f32 0.5, %v4640_v0 }
0x1b43   :  { %v4668_v57 = vmul.f32 %v7265_v49, %v4661_v54 }
0x1b44   :  { %v4642_v36 = vsub.f32 1.5, %v4641_v52 }
0x1b45   :  { %v5469_v14 = vpop.eup %5468  ;;  %v4675_v5 = vadd.f32 %v7267_v62, %v4668_v57 }
0x1b46   :  { %v4643_v16 = vmul.f32 %v5467_v40, %v4642_v36  ;;  %v4649_v9 = vmul.f32 %v5469_v14, %v4597_v47  ;;  %vm4655_vm5 = vweird.f32 %v5469_v14 }
0x1b47   :  { %5041 = vmatmul.msk.f32.gmra.mxu2 %vm143_vm0, %v4675_v5  ;;  %vm4656_vm7 = vmor %vm4654_vm6, %vm4655_vm5 }
0x1b48   :  { %v4647_v22 = vsel %vm4646_vm4, %v5467_v40, %v4643_v16  ;;  %v4650_v43 = vmul.f32 %v5469_v14, %v4649_v9 }
0x1b49   :  { %v4662_v63 = vmul.f32 %v4647_v22, %v7251_v50  ;;  %v4747_v50 = vld [vmem:[#allocation9 + $0x58] sm:$0xff] }
0x1b4a   :  { %v4651_v35 = vmul.f32 0.5, %v4650_v43  ;;  %4783 = vmatpush.msra.mxu3 %v4747_v50 }
0x1b4b   :  { %v4669_v42 = vmul.f32 %v7265_v49, %v4662_v63 }
0x1b4c   :  { %v4652_v13 = vsub.f32 1.5, %v4651_v35  ;;  %4784 = vmatpush.msra.mxu3 %v4746_v46 }
0x1b4d   :  { %v4676_v34 = vadd.f32 %v7267_v62, %v4669_v42 }
0x1b4e   :  { %v4653_v15 = vmul.f32 %v5469_v14, %v4652_v13  ;;  %4785 = vmatpush.msra.mxu3 %v4745_v29 }
0x1b4f   :  { %5042 = vmatmul.msk.f32.gmra.mxu2 %vm143_vm0, %v4676_v34 }
0x1b50   :  { %v4657_v23 = vsel %vm4656_vm7, %v5469_v14, %v4653_v15  ;;  %4786 = vmatpush.msra.mxu3 %v4744_v59 }
0x1b51   :  { %v4663_v2 = vmul.f32 %v4657_v23, %v7257_v20 }
0x1b52   :  { %4787 = vmatpush.msra.mxu3 %v4743_v37 }
0x1b53   :  { %v4670_v56 = vmul.f32 %v7265_v49, %v4663_v2 }
0x1b55   :  { %v4677_v32 = vadd.f32 %v7267_v62, %v4670_v56 }
0x1b57   :  { %5043 = vmatmul.msk.f32.gmra.mxu2 %vm143_vm0, %v4677_v32 }
0x1ba2   :  { %v4719_v61 = vpop.f32.mrf.mxu2 }
0x1ba3   :  { %v4720_v4 = vadd.f32 %v5178_v55, %v4719_v61 }
0x1ba5   :  { %5470 = vtanh.f32 %v4720_v4 }
0x1baa   :  { %v4722_v49 = vpop.f32.mrf.mxu2 }
0x1bab   :  { %v5471_v20 = vpop.eup %5470  ;;  %v4723_v62 = vadd.f32 %v5178_v55, %v4722_v49 }
0x1bac   :  { %5044 = vmatmul.msk.f32.vlgmr.msra.gmra.mxu3 %vm4753_vm8, %v5471_v20 }
0x1bad   :  { %5472 = vtanh.f32 %v4723_v62 }
0x1bb2   :  { %v4725_v33 = vpop.f32.mrf.mxu2 }
0x1bb3   :  { %v5473_v30 = vpop.eup %5472  ;;  %v4726_v25 = vadd.f32 %v5178_v55, %v4725_v33 }
0x1bb4   :  { %5045 = vmatmul.msk.f32.gmra.mxu3 %vm4753_vm8, %v5473_v30 }
0x1bb5   :  { %5474 = vtanh.f32 %v4726_v25 }
0x1bbb   :  { %v5475_v11 = vpop.eup %5474 }
0x1bbc   :  { %5046 = vmatmul.msk.f32.gmra.mxu3 %vm4753_vm8, %v5475_v11 }
0x1bca   :  { %v4728_v27 = vpop.f32.mrf.mxu2 }
0x1bcb   :  { %v4729_v19 = vadd.f32 %v5178_v55, %v4728_v27 }
0x1bcd   :  { %5476 = vtanh.f32 %v4729_v19 }
0x1bd2   :  { %v4731_v12 = vpop.f32.mrf.mxu2 }
0x1bd3   :  { %v5477_v28 = vpop.eup %5476  ;;  %v4732_v24 = vadd.f32 %v5178_v55, %v4731_v12 }
0x1bd4   :  { %5047 = vmatmul.msk.f32.gmra.mxu3 %vm4753_vm8, %v5477_v28 }
0x1bd5   :  { %5478 = vtanh.f32 %v4732_v24 }
0x1bda   :  { %v4734_v17 = vpop.f32.mrf.mxu2 }
0x1bdb   :  { %v5479_v45 = vpop.eup %5478  ;;  %v4735_v60 = vadd.f32 %v5178_v55, %v4734_v17 }
0x1bdc   :  { %5048 = vmatmul.msk.f32.gmra.mxu3 %vm4753_vm8, %v5479_v45 }
0x1bdd   :  { %5480 = vtanh.f32 %v4735_v60 }
0x1be3   :  { %v5481_v53 = vpop.eup %5480 }
0x1be4   :  { %5049 = vmatmul.msk.f32.gmra.mxu3 %vm4753_vm8, %v5481_v53 }
0x1c2f   :  { %v4789_v31 = vpop.f32.mrf.mxu3 }
0x1c30   :  { %v4790_v21 = vadd.f32 %v5179_v26, %v4789_v31 }
0x1c32   :  { %4807 = vst [vmem:[%s7325_s5] sm:$0xff] %v4790_v21 }
0x1c37   :  { %v4792_v1 = vpop.f32.mrf.mxu3 }
0x1c38   :  { %v4793_v48 = vadd.f32 %v5179_v26, %v4792_v1 }
0x1c3a   :  { %4808 = vst [vmem:[%s7325_s5 + $0x8] sm:$0xff] %v4793_v48 }
0x1c3f   :  { %v4795_v39 = vpop.f32.mrf.mxu3 }
0x1c40   :  { %v4796_v58 = vadd.f32 %v5179_v26, %v4795_v39 }
0x1c42   :  { %4809 = vst [vmem:[%s7325_s5 + $0x10] sm:$0xff] %v4796_v58 }
0x1c57   :  { %v4798_v38 = vpop.f32.mrf.mxu3 }
0x1c58   :  { %v4799_v10 = vadd.f32 %v5179_v26, %v4798_v38 }
0x1c5a   :  { %4810 = vst [vmem:[%s7325_s5 + $0x18] sm:$0xff] %v4799_v10 }
0x1c5f   :  { %v4801_v6 = vpop.f32.mrf.mxu3 }
0x1c60   :  { %v4802_v3 = vadd.f32 %v5179_v26, %v4801_v6 }
0x1c62   :  { %4811 = vst [vmem:[%s7325_s5 + $0x20] sm:$0xff] %v4802_v3 }
0x1c67   :  { %v4804_v51 = vpop.f32.mrf.mxu3 }
0x1c68   :  { %v4805_v41 = vadd.f32 %v5179_v26, %v4804_v51 }
0x1c6a   :  { %4812 = vst [vmem:[%s7325_s5 + $0x28] sm:$0xff] %v4805_v41 }
0x1c6b   :  { %4817 = vsyncpa [#allocation3], 1 }
0x1c6c   :  { %4818 = vsyncpa [#allocation5], 1 }
0x1c6d   :  { %4819 = vsyncpa [#allocation8], 1 }

</bundles_post_ra>
